<compile_context>
chip_gen: v6e
topology: v6e:2x2x1
jax: 0.10.0
libtpu: 0.0.40
codegen_flags: <defaults>
</compile_context>

<pallas_src>
import functools
import math

import jax
import jax.numpy as jnp
import numpy as np
from jax import lax
from jax.experimental import pallas as pl
from jax.experimental.pallas import tpu as pltpu

_MIB = 1024 * 1024


def _layernorm(x, gamma, beta, eps=1e-5):
    mean = jnp.mean(x, axis=-1, keepdims=True)
    var = jnp.mean((x - mean) ** 2, axis=-1, keepdims=True)
    return (x - mean) * lax.rsqrt(var + eps) * gamma + beta


def encoder_layer_kernel(
    x_ref, mask_ref,
    wq_ref, bq_ref, wk_ref, bk_ref, wv_ref, bv_ref, wo_ref, bo_ref,
    g1_ref, be1_ref,
    w1_ref, bf1_ref, w2_ref, bf2_ref,
    g2_ref, be2_ref,
    o_ref,
    k_scr, v_scr, ho_scr,
    *, num_heads, tile_q, kv_chunk,
):
    S, D = x_ref.shape            # full sequence block (f32) for this batch element
    depth = D // num_heads
    scale = 1.0 / math.sqrt(float(depth))
    qi = pl.program_id(1)

    # ---- K/V projection for the whole sequence, once per batch element ------
    # Chunked over S so live f32 intermediates stay bounded (kv_chunk x D).
    @pl.when(qi == 0)
    def _():
        def kv_body(c, carry):
            r0 = pl.multiple_of(c * kv_chunk, kv_chunk)
            xc = x_ref[pl.ds(r0, kv_chunk), :].astype(jnp.bfloat16)
            k = jnp.dot(xc, wk_ref[...],
                        preferred_element_type=jnp.float32) + bk_ref[...]
            v = jnp.dot(xc, wv_ref[...],
                        preferred_element_type=jnp.float32) + bv_ref[...]
            k_scr[pl.ds(r0, kv_chunk), :] = k.astype(jnp.bfloat16)
            v_scr[pl.ds(r0, kv_chunk), :] = v.astype(jnp.bfloat16)
            return carry
        lax.fori_loop(0, S // kv_chunk, kv_body, 0)

    # ---- per-query-tile attention -------------------------------------------
    q0 = pl.multiple_of(qi * tile_q, tile_q)
    x_q = x_ref[pl.ds(q0, tile_q), :]                       # f32 residual (exact)
    # 1/sqrt(depth) folded into q (incl. bias) once, instead of scaling (TQ,S) logits.
    q = (jnp.dot(x_q.astype(jnp.bfloat16), wq_ref[...],
                 preferred_element_type=jnp.float32) + bq_ref[...]) * scale

    neg_mask = mask_ref[...] * (-1e9)                       # (1, S) f32, hoisted
    k_all = k_scr[...]                                      # bf16 (S, D)
    v_all = v_scr[...]

    # TODO(synk): on v6e/v7x compute exp in bf16 (bf16 EUP ~2x transcendental
    # throughput); kept f32 here so the same kernel also runs on v5e.
    # TODO(synk): if the QK^T dot_general lowers to a per-head kh transpose,
    # store K transposed ((D, S) scratch written once at qi==0) instead.
    for h in range(num_heads):                              # static, small
        sl = slice(h * depth, (h + 1) * depth)
        qh = q[:, sl].astype(jnp.bfloat16)                  # (TQ, depth)
        kh = k_all[:, sl]                                   # (S, depth)
        vh = v_all[:, sl]
        # q @ k^T without materializing a transpose: contract depth of both.
        logits = lax.dot_general(qh, kh, (((1,), (1,)), ((), ())),
                                 preferred_element_type=jnp.float32)
        logits = logits + neg_mask                          # (TQ, S)
        m = jnp.max(logits, axis=-1, keepdims=True)
        e = jnp.exp(logits - m)                             # e in (0, 1]
        r = pl.reciprocal(jnp.sum(e, axis=-1, keepdims=True), approx=True)
        # Deferred normalization: PV matmul on unnormalized e, scale the small
        # (TQ, depth) head output by the (TQ, 1) reciprocal afterwards.
        ho = jnp.dot(e.astype(jnp.bfloat16), vh,
                     preferred_element_type=jnp.float32)    # (TQ, depth)
        ho_scr[:, sl] = (ho * r).astype(jnp.bfloat16)       # lane-offset store, no XLU

    # Single lane-dense K=D output projection (W_O fusion).
    attn_out = jnp.dot(ho_scr[...], wo_ref[...],
                       preferred_element_type=jnp.float32) + bo_ref[...]

    # dropout1 = identity (eval mode)
    out1 = _layernorm(x_q + attn_out, g1_ref[...], be1_ref[...])

    # ---- point-wise FFN: Linear -> LeakyReLU(0.2) -> Linear ------------------
    f = jnp.dot(out1.astype(jnp.bfloat16), w1_ref[...],
                preferred_element_type=jnp.float32) + bf1_ref[...]
    f = jnp.where(f > 0, f, 0.2 * f)
    f = jnp.dot(f.astype(jnp.bfloat16), w2_ref[...],
                preferred_element_type=jnp.float32) + bf2_ref[...]

    # dropout2 = identity (eval mode)
    out2 = _layernorm(out1 + f, g2_ref[...], be2_ref[...])
    o_ref[...] = out2.astype(o_ref.dtype)


def _as_bf16(w):
    return w if w.dtype == jnp.bfloat16 else w.astype(jnp.bfloat16)


def prepare_params(params):
    """One-time bf16 cast of the matmul weights (avoids a per-call HBM cast pass)."""
    out = dict(params)
    for k in ("wq", "wk", "wv", "wo", "w1", "w2"):
        out[k] = _as_bf16(params[k])
    return out


def _vmem_capacity_bytes():
    try:
        return int(pltpu.get_tpu_info().vmem_capacity_bytes)
    except Exception:
        return 64 * _MIB          # conservative default (v7x per-TC VMEM)


def encoder_layer(x, key_mask, params, *, num_heads, tile_q=None):
    """x: (B, S, D) f32.  key_mask: (B, S) — 1.0 where the key position is padding."""
    B, S, D = x.shape
    assert D % num_heads == 0
    dff = params["w1"].shape[1]

    if tile_q is None:
        tile_q = next((c for c in (256, 128, 64, 32, 16, 8) if S % c == 0), S)
    assert S % tile_q == 0 and tile_q % 8 == 0, "tile_q must divide S and be a multiple of 8"
    n_q = S // tile_q
    kv_chunk = math.gcd(S, 512) if S % 8 == 0 else S   # divides S, bounds live f32

    # bf16 matmul weights (no-op if prepare_params was already applied); biases /
    # LN params stay f32 (elementwise math is f32 everywhere).
    wm = {k: _as_bf16(params[k]) for k in ("wq", "wk", "wv", "wo", "w1", "w2")}
    mask3 = key_mask.astype(jnp.float32).reshape(B, 1, S)

    weights = [
        wm["wq"], params["bq"], wm["wk"], params["bk"],
        wm["wv"], params["bv"], wm["wo"], params["bo"],
        params["ln1_g"], params["ln1_b"],
        wm["w1"], params["bf1"], wm["w2"], params["bf2"],
        params["ln2_g"], params["ln2_b"],
    ]
    w_bytes = sum(int(np.prod(w.shape)) * w.dtype.itemsize for w in weights)

    kernel = functools.partial(encoder_layer_kernel, num_heads=num_heads,
                               tile_q=tile_q, kv_chunk=kv_chunk)

    flops = 2 * B * S * (4 * D * D + 2 * S * D + 2 * D * dff)
    bytes_accessed = int(x.size * 4 + mask3.size * 4 + w_bytes + B * S * D * 4)
    cost = pl.CostEstimate(flops=int(flops),
                           transcendentals=int(B * num_heads * S * S),
                           bytes_accessed=bytes_accessed)

    def build(single_buffer_weights):
        def full_spec(arr):
            nd = arr.ndim
            if single_buffer_weights:
                # Constant index_map -> DMA'd once; single-buffer to halve VMEM.
                return pl.BlockSpec(arr.shape, lambda b, qi, _n=nd: (0,) * _n,
                                    pipeline_mode=pl.Buffered(1))
            return pl.BlockSpec(arr.shape, lambda b, qi, _n=nd: (0,) * _n)

        in_specs = [
            pl.BlockSpec((None, S, D), lambda b, qi: (b, 0, 0)),   # x (f32), full seq per batch
            pl.BlockSpec((None, 1, S), lambda b, qi: (b, 0, 0)),   # key-padding mask
        ] + [full_spec(w) for w in weights]
        out_spec = pl.BlockSpec((None, tile_q, D), lambda b, qi: (b, qi, 0))

        # ---- VMEM budget (per-generation cap with Mosaic headroom) ------------
        f32b, bf16b = 4, 2
        wbuf = 1 if single_buffer_weights else 2
        blk_bytes = 2 * (S * D * f32b + S * f32b + tile_q * D * f32b)
        scratch_bytes = 2 * S * D * bf16b + tile_q * D * bf16b
        tmp_bytes = (8 * tile_q * max(S, D, dff) * f32b
                     + 4 * kv_chunk * max(D, dff) * f32b)
        est = blk_bytes + wbuf * w_bytes + scratch_bytes + tmp_bytes
        cap = _vmem_capacity_bytes()
        vmem_limit = max(16 * _MIB, min(cap - 8 * _MIB, max(32 * _MIB, int(1.5 * est))))

        # TODO(synk): for v7x with B < 2, split the q-tile axis into an outer
        # "parallel" factor (per-core K/V scratch) so both TensorCores get work.
        return pl.pallas_call(
            kernel,
            out_shape=jax.ShapeDtypeStruct((B, S, D), x.dtype),
            grid=(B, n_q),
            in_specs=in_specs,
            out_specs=out_spec,
            scratch_shapes=[pltpu.VMEM((S, D), jnp.bfloat16),         # K scratch
                            pltpu.VMEM((S, D), jnp.bfloat16),         # V scratch
                            pltpu.VMEM((tile_q, D), jnp.bfloat16)],   # per-head out (W_O fusion)
            compiler_params=pltpu.CompilerParams(
                dimension_semantics=("parallel", "arbitrary"),
                vmem_limit_bytes=int(vmem_limit),
            ),
            cost_estimate=cost,
        )

    args = (x, mask3, *weights)
    try:
        out = build(True)(*args)
        return jax.block_until_ready(out)   # surface any Buffered(1) issue here
    except Exception:
        # Fallback: some jax versions reject single-buffered (Buffered(1)) blocks.
        return build(False)(*args)


# -------------------- pure-JAX f32 reference (mirrors the PyTorch forward) ---
def encoder_layer_ref(x, key_mask, params, *, num_heads):
    B, S, D = x.shape
    depth = D // num_heads
    xf = x.astype(jnp.float32)
    mask = key_mask[:, None, None, :].astype(jnp.float32)    # (B,1,1,S) broadcastable

    def lin(t, w, b):
        return t @ w + b

    q = lin(xf, params["wq"], params["bq"])
    k = lin(xf, params["wk"], params["bk"])
    v = lin(xf, params["wv"], params["bv"])

    def split(t):
        return t.reshape(B, S, num_heads, depth).transpose(0, 2, 1, 3)

    q, k, v = split(q), split(k), split(v)
    logits = jnp.einsum("bhqd,bhkd->bhqk", q, k) / math.sqrt(depth)
    logits = logits + mask * (-1e9)
    attn = jax.nn.softmax(logits, axis=-1)
    o = jnp.einsum("bhqk,bhkd->bhqd", attn, v)
    o = o.transpose(0, 2, 1, 3).reshape(B, S, D)
    attn_out = lin(o, params["wo"], params["bo"])

    out1 = _layernorm(xf + attn_out, params["ln1_g"], params["ln1_b"])
    f = lin(out1, params["w1"], params["bf1"])
    f = jnp.where(f > 0, f, 0.2 * f)
    f = lin(f, params["w2"], params["bf2"])
    out2 = _layernorm(out1 + f, params["ln2_g"], params["ln2_b"])
    return out2.astype(x.dtype)


if __name__ == "__main__":
    B, S, D, H, DFF = 2, 16, 128, 4, 256   # D multiple of 128 -> lane-dense stores
    TILE_Q = 8                              # exercises the sequence tiling (smoke test size)

    key = jax.random.PRNGKey(0)
    ks = jax.random.split(key, 12)

    def rnd(k, shape, scale=0.05):
        return jax.random.normal(k, shape, dtype=jnp.float32) * scale

    params = {
        "wq": rnd(ks[0], (D, D)),    "bq": rnd(ks[1], (1, D)),
        "wk": rnd(ks[2], (D, D)),    "bk": rnd(ks[3], (1, D)),
        "wv": rnd(ks[4], (D, D)),    "bv": rnd(ks[5], (1, D)),
        "wo": rnd(ks[6], (D, D)),    "bo": rnd(ks[7], (1, D)),
        "ln1_g": jnp.ones((1, D), jnp.float32), "ln1_b": jnp.zeros((1, D), jnp.float32),
        "w1": rnd(ks[8], (D, DFF)),  "bf1": rnd(ks[9], (1, DFF)),
        "w2": rnd(ks[10], (DFF, D)), "bf2": rnd(ks[11], (1, D)),
        "ln2_g": jnp.ones((1, D), jnp.float32), "ln2_b": jnp.zeros((1, D), jnp.float32),
    }
    params_dev = prepare_params(params)      # one-time bf16 cast of matmul weights

    x = jax.random.normal(jax.random.PRNGKey(1), (B, S, D), dtype=jnp.float32)
    # key-padding mask: last 3 key positions masked for every query position
    key_mask = jnp.zeros((B, S), jnp.float32).at[:, -3:].set(1.0)

    out = encoder_layer(x, key_mask, params_dev, num_heads=H, tile_q=TILE_Q)
    out = jax.block_until_ready(out)

    ref = encoder_layer_ref(x, key_mask, params, num_heads=H)
    # bf16 matmul operands + approx reciprocal vs f32 reference -> loosened tolerance
    np.testing.assert_allclose(np.asarray(out), np.asarray(ref), rtol=3e-2, atol=3e-2)

    print("KERNEL_OK")
</pallas_src>

<mosaic_0001>
module attributes {stable_mosaic.version = 11 : i64} {
  func.func @encoder_layer_kernel(%arg0: i32, %arg1: i32, %arg2: memref<1x16x128xf32, #tpu.memory_space<vmem>>, %arg3: memref<1x1x16xf32, #tpu.memory_space<vmem>>, %arg4: memref<128x128xbf16, #tpu.memory_space<vmem>>, %arg5: memref<1x128xf32, #tpu.memory_space<vmem>>, %arg6: memref<128x128xbf16, #tpu.memory_space<vmem>>, %arg7: memref<1x128xf32, #tpu.memory_space<vmem>>, %arg8: memref<128x128xbf16, #tpu.memory_space<vmem>>, %arg9: memref<1x128xf32, #tpu.memory_space<vmem>>, %arg10: memref<128x128xbf16, #tpu.memory_space<vmem>>, %arg11: memref<1x128xf32, #tpu.memory_space<vmem>>, %arg12: memref<1x128xf32, #tpu.memory_space<vmem>>, %arg13: memref<1x128xf32, #tpu.memory_space<vmem>>, %arg14: memref<128x256xbf16, #tpu.memory_space<vmem>>, %arg15: memref<1x256xf32, #tpu.memory_space<vmem>>, %arg16: memref<256x128xbf16, #tpu.memory_space<vmem>>, %arg17: memref<1x128xf32, #tpu.memory_space<vmem>>, %arg18: memref<1x128xf32, #tpu.memory_space<vmem>>, %arg19: memref<1x128xf32, #tpu.memory_space<vmem>>, %arg20: memref<1x8x128xf32, #tpu.memory_space<vmem>>, %arg21: memref<16x128xbf16, #tpu.memory_space<vmem>>, %arg22: memref<16x128xbf16, #tpu.memory_space<vmem>>, %arg23: memref<8x128xbf16, #tpu.memory_space<vmem>>) attributes {dimension_semantics = [#tpu.dimension_semantics<parallel>, #tpu.dimension_semantics<arbitrary>], iteration_bounds = array<i64: 2, 2>, scalar_prefetch = 0 : i64, scratch_operands = 3 : i64, tpu.core_type = #tpu.core_type<tc>, window_params = [{transform_indices = @transform_0, window_bounds = array<i64: 1, 16, 128>}, {transform_indices = @transform_1, window_bounds = array<i64: 1, 1, 16>}, {pipeline_mode = #tpu.pipeline_mode<synchronous>, transform_indices = @transform_2, window_bounds = array<i64: 128, 128>}, {pipeline_mode = #tpu.pipeline_mode<synchronous>, transform_indices = @transform_3, window_bounds = array<i64: 1, 128>}, {pipeline_mode = #tpu.pipeline_mode<synchronous>, transform_indices = @transform_4, window_bounds = array<i64: 128, 128>}, {pipeline_mode = #tpu.pipeline_mode<synchronous>, transform_indices = @transform_5, window_bounds = array<i64: 1, 128>}, {pipeline_mode = #tpu.pipeline_mode<synchronous>, transform_indices = @transform_6, window_bounds = array<i64: 128, 128>}, {pipeline_mode = #tpu.pipeline_mode<synchronous>, transform_indices = @transform_7, window_bounds = array<i64: 1, 128>}, {pipeline_mode = #tpu.pipeline_mode<synchronous>, transform_indices = @transform_8, window_bounds = array<i64: 128, 128>}, {pipeline_mode = #tpu.pipeline_mode<synchronous>, transform_indices = @transform_9, window_bounds = array<i64: 1, 128>}, {pipeline_mode = #tpu.pipeline_mode<synchronous>, transform_indices = @transform_10, window_bounds = array<i64: 1, 128>}, {pipeline_mode = #tpu.pipeline_mode<synchronous>, transform_indices = @transform_11, window_bounds = array<i64: 1, 128>}, {pipeline_mode = #tpu.pipeline_mode<synchronous>, transform_indices = @transform_12, window_bounds = array<i64: 128, 256>}, {pipeline_mode = #tpu.pipeline_mode<synchronous>, transform_indices = @transform_13, window_bounds = array<i64: 1, 256>}, {pipeline_mode = #tpu.pipeline_mode<synchronous>, transform_indices = @transform_14, window_bounds = array<i64: 256, 128>}, {pipeline_mode = #tpu.pipeline_mode<synchronous>, transform_indices = @transform_15, window_bounds = array<i64: 1, 128>}, {pipeline_mode = #tpu.pipeline_mode<synchronous>, transform_indices = @transform_16, window_bounds = array<i64: 1, 128>}, {pipeline_mode = #tpu.pipeline_mode<synchronous>, transform_indices = @transform_17, window_bounds = array<i64: 1, 128>}, {transform_indices = @transform_18, window_bounds = array<i64: 1, 8, 128>}]} {
    %c0_i32 = arith.constant 0 : i32
    %0 = arith.cmpi eq, %arg1, %c0_i32 : i32
    %1 = arith.extui %0 : i1 to i32
    %c0_i32_0 = arith.constant 0 : i32
    %2 = arith.cmpi ne, %1, %c0_i32_0 : i32
    scf.if %2 {
      %c0_i32_76 = arith.constant 0 : i32
      %c16_i32 = arith.constant 16 : i32
      %182 = arith.muli %c0_i32_76, %c16_i32 : i32
      %183 = tpu.assume_multiple %182, 16 : i32
      %c0_77 = arith.constant 0 : index
      %184 = arith.index_cast %183 : i32 to index
      %c0_78 = arith.constant 0 : index
      %185 = vector.load %arg2[%c0_77, %184, %c0_78] : memref<1x16x128xf32, #tpu.memory_space<vmem>>, vector<1x16x128xf32>
      %186 = vector.shape_cast %185 : vector<1x16x128xf32> to vector<16x128xf32>
      %187 = arith.truncf %186 : vector<16x128xf32> to vector<16x128xbf16>
      %c0_79 = arith.constant 0 : index
      %c0_80 = arith.constant 0 : index
      %188 = vector.load %arg6[%c0_79, %c0_80] : memref<128x128xbf16, #tpu.memory_space<vmem>>, vector<128x128xbf16>
      %cst_81 = arith.constant dense<0.000000e+00> : vector<16x128xf32>
      %189 = tpu.matmul %187, %188, %cst_81 {dimension_numbers = #tpu.dot_dimension_numbers<[1], [0], [0], [1], [0, 0, 1, 1], [], []>} : vector<16x128xbf16>, vector<128x128xbf16>, vector<16x128xf32> -> vector<16x128xf32>
      %c0_82 = arith.constant 0 : index
      %c0_83 = arith.constant 0 : index
      %190 = vector.load %arg7[%c0_82, %c0_83] : memref<1x128xf32, #tpu.memory_space<vmem>>, vector<1x128xf32>
      %191 = vector.broadcast %190 : vector<1x128xf32> to vector<16x128xf32>
      %192 = arith.addf %189, %191 : vector<16x128xf32>
      %c0_84 = arith.constant 0 : index
      %c0_85 = arith.constant 0 : index
      %193 = vector.load %arg8[%c0_84, %c0_85] : memref<128x128xbf16, #tpu.memory_space<vmem>>, vector<128x128xbf16>
      %cst_86 = arith.constant dense<0.000000e+00> : vector<16x128xf32>
      %194 = tpu.matmul %187, %193, %cst_86 {dimension_numbers = #tpu.dot_dimension_numbers<[1], [0], [0], [1], [0, 0, 1, 1], [], []>} : vector<16x128xbf16>, vector<128x128xbf16>, vector<16x128xf32> -> vector<16x128xf32>
      %c0_87 = arith.constant 0 : index
      %c0_88 = arith.constant 0 : index
      %195 = vector.load %arg9[%c0_87, %c0_88] : memref<1x128xf32, #tpu.memory_space<vmem>>, vector<1x128xf32>
      %196 = vector.broadcast %195 : vector<1x128xf32> to vector<16x128xf32>
      %197 = arith.addf %194, %196 : vector<16x128xf32>
      %198 = arith.truncf %192 : vector<16x128xf32> to vector<16x128xbf16>
      %199 = arith.index_cast %183 : i32 to index
      %c0_89 = arith.constant 0 : index
      %200 = vector.load %arg21[%199, %c0_89] : memref<16x128xbf16, #tpu.memory_space<vmem>>, vector<16x128xbf16>
      tpu.vector_store %arg21[%199, %c0_89], %198 {strides = array<i32>} : memref<16x128xbf16, #tpu.memory_space<vmem>>, vector<16x128xbf16>,
      %201 = arith.truncf %197 : vector<16x128xf32> to vector<16x128xbf16>
      %202 = arith.index_cast %183 : i32 to index
      %c0_90 = arith.constant 0 : index
      %203 = vector.load %arg22[%202, %c0_90] : memref<16x128xbf16, #tpu.memory_space<vmem>>, vector<16x128xbf16>
      tpu.vector_store %arg22[%202, %c0_90], %201 {strides = array<i32>} : memref<16x128xbf16, #tpu.memory_space<vmem>>, vector<16x128xbf16>,
      %c1_i32 = arith.constant 1 : i32
    } else {
    }
    %c8_i32 = arith.constant 8 : i32
    %3 = arith.muli %arg1, %c8_i32 : i32
    %4 = tpu.assume_multiple %3, 8 : i32
    %c0 = arith.constant 0 : index
    %5 = arith.index_cast %4 : i32 to index
    %c0_1 = arith.constant 0 : index
    %6 = vector.load %arg2[%c0, %5, %c0_1] : memref<1x16x128xf32, #tpu.memory_space<vmem>>, vector<1x8x128xf32>
    %7 = vector.shape_cast %6 : vector<1x8x128xf32> to vector<8x128xf32>
    %8 = arith.truncf %7 : vector<8x128xf32> to vector<8x128xbf16>
    %c0_2 = arith.constant 0 : index
    %c0_3 = arith.constant 0 : index
    %9 = vector.load %arg4[%c0_2, %c0_3] : memref<128x128xbf16, #tpu.memory_space<vmem>>, vector<128x128xbf16>
    %cst = arith.constant dense<0.000000e+00> : vector<8x128xf32>
    %10 = tpu.matmul %8, %9, %cst {dimension_numbers = #tpu.dot_dimension_numbers<[1], [0], [0], [1], [0, 0, 1, 1], [], []>} : vector<8x128xbf16>, vector<128x128xbf16>, vector<8x128xf32> -> vector<8x128xf32>
    %c0_4 = arith.constant 0 : index
    %c0_5 = arith.constant 0 : index
    %11 = vector.load %arg5[%c0_4, %c0_5] : memref<1x128xf32, #tpu.memory_space<vmem>>, vector<1x128xf32>
    %12 = vector.broadcast %11 : vector<1x128xf32> to vector<8x128xf32>
    %13 = arith.addf %10, %12 : vector<8x128xf32>
    %cst_6 = arith.constant 0.176776692 : f32
    %14 = vector.broadcast %cst_6 : f32 to vector<8x128xf32>
    %15 = arith.mulf %13, %14 : vector<8x128xf32>
    %c0_7 = arith.constant 0 : index
    %c0_8 = arith.constant 0 : index
    %c0_9 = arith.constant 0 : index
    %16 = vector.load %arg3[%c0_7, %c0_8, %c0_9] : memref<1x1x16xf32, #tpu.memory_space<vmem>>, vector<1x1x16xf32>
    %17 = vector.shape_cast %16 : vector<1x1x16xf32> to vector<1x16xf32>
    %cst_10 = arith.constant -1.000000e+09 : f32
    %18 = vector.broadcast %cst_10 : f32 to vector<1x16xf32>
    %19 = arith.mulf %17, %18 : vector<1x16xf32>
    %c0_11 = arith.constant 0 : index
    %c0_12 = arith.constant 0 : index
    %20 = vector.load %arg21[%c0_11, %c0_12] : memref<16x128xbf16, #tpu.memory_space<vmem>>, vector<16x128xbf16>
    %c0_13 = arith.constant 0 : index
    %c0_14 = arith.constant 0 : index
    %21 = vector.load %arg22[%c0_13, %c0_14] : memref<16x128xbf16, #tpu.memory_space<vmem>>, vector<16x128xbf16>
    %22 = vector.extract_strided_slice %15 {offsets = [0, 0], sizes = [8, 32], strides = [1, 1]} : vector<8x128xf32> to vector<8x32xf32>
    %23 = arith.truncf %22 : vector<8x32xf32> to vector<8x32xbf16>
    %24 = vector.extract_strided_slice %20 {offsets = [0, 0], sizes = [16, 32], strides = [1, 1]} : vector<16x128xbf16> to vector<16x32xbf16>
    %25 = vector.extract_strided_slice %21 {offsets = [0, 0], sizes = [16, 32], strides = [1, 1]} : vector<16x128xbf16> to vector<16x32xbf16>
    %cst_15 = arith.constant dense<0.000000e+00> : vector<8x16xf32>
    %26 = tpu.matmul %23, %24, %cst_15 {dimension_numbers = #tpu.dot_dimension_numbers<[1], [1], [0], [0], [0, 0, 1, 0], [], []>} : vector<8x32xbf16>, vector<16x32xbf16>, vector<8x16xf32> -> vector<8x16xf32>
    %27 = vector.broadcast %19 : vector<1x16xf32> to vector<8x16xf32>
    %28 = arith.addf %26, %27 : vector<8x16xf32>
    %cst_16 = arith.constant dense<0xFF800000> : vector<8xf32>
    %29 = vector.multi_reduction <maximumf>, %28, %cst_16 [1] : vector<8x16xf32> to vector<8xf32>
    %30 = vector.shape_cast %29 : vector<8xf32> to vector<8x1xf32>
    %31 = vector.broadcast %30 : vector<8x1xf32> to vector<8x16xf32>
    %32 = arith.subf %28, %31 : vector<8x16xf32>
    %33 = math.exp %32 : vector<8x16xf32>
    %cst_17 = arith.constant dense<0.000000e+00> : vector<8xf32>
    %34 = vector.multi_reduction <add>, %33, %cst_17 [1] : vector<8x16xf32> to vector<8xf32>
    %35 = vector.shape_cast %34 : vector<8xf32> to vector<8x1xf32>
    %36 = tpu.reciprocal %35 {approx = true} : vector<8x1xf32> -> vector<8x1xf32>
    %37 = arith.truncf %33 : vector<8x16xf32> to vector<8x16xbf16>
    %cst_18 = arith.constant dense<0.000000e+00> : vector<8x32xf32>
    %38 = tpu.matmul %37, %25, %cst_18 {dimension_numbers = #tpu.dot_dimension_numbers<[1], [0], [0], [1], [0, 0, 1, 1], [], []>} : vector<8x16xbf16>, vector<16x32xbf16>, vector<8x32xf32> -> vector<8x32xf32>
    %39 = vector.broadcast %36 : vector<8x1xf32> to vector<8x32xf32>
    %40 = arith.mulf %38, %39 : vector<8x32xf32>
    %41 = arith.truncf %40 : vector<8x32xf32> to vector<8x32xbf16>
    %c0_19 = arith.constant 0 : index
    %c0_20 = arith.constant 0 : index
    %42 = vector.load %arg23[%c0_19, %c0_20] : memref<8x128xbf16, #tpu.memory_space<vmem>>, vector<8x32xbf16>
    tpu.vector_store %arg23[%c0_19, %c0_20], %41 {strides = array<i32>} : memref<8x128xbf16, #tpu.memory_space<vmem>>, vector<8x32xbf16>,
    %43 = vector.extract_strided_slice %15 {offsets = [0, 32], sizes = [8, 32], strides = [1, 1]} : vector<8x128xf32> to vector<8x32xf32>
    %44 = arith.truncf %43 : vector<8x32xf32> to vector<8x32xbf16>
    %45 = vector.extract_strided_slice %20 {offsets = [0, 32], sizes = [16, 32], strides = [1, 1]} : vector<16x128xbf16> to vector<16x32xbf16>
    %46 = vector.extract_strided_slice %21 {offsets = [0, 32], sizes = [16, 32], strides = [1, 1]} : vector<16x128xbf16> to vector<16x32xbf16>
    %cst_21 = arith.constant dense<0.000000e+00> : vector<8x16xf32>
    %47 = tpu.matmul %44, %45, %cst_21 {dimension_numbers = #tpu.dot_dimension_numbers<[1], [1], [0], [0], [0, 0, 1, 0], [], []>} : vector<8x32xbf16>, vector<16x32xbf16>, vector<8x16xf32> -> vector<8x16xf32>
    %48 = vector.broadcast %19 : vector<1x16xf32> to vector<8x16xf32>
    %49 = arith.addf %47, %48 : vector<8x16xf32>
    %cst_22 = arith.constant dense<0xFF800000> : vector<8xf32>
    %50 = vector.multi_reduction <maximumf>, %49, %cst_22 [1] : vector<8x16xf32> to vector<8xf32>
    %51 = vector.shape_cast %50 : vector<8xf32> to vector<8x1xf32>
    %52 = vector.broadcast %51 : vector<8x1xf32> to vector<8x16xf32>
    %53 = arith.subf %49, %52 : vector<8x16xf32>
    %54 = math.exp %53 : vector<8x16xf32>
    %cst_23 = arith.constant dense<0.000000e+00> : vector<8xf32>
    %55 = vector.multi_reduction <add>, %54, %cst_23 [1] : vector<8x16xf32> to vector<8xf32>
    %56 = vector.shape_cast %55 : vector<8xf32> to vector<8x1xf32>
    %57 = tpu.reciprocal %56 {approx = true} : vector<8x1xf32> -> vector<8x1xf32>
    %58 = arith.truncf %54 : vector<8x16xf32> to vector<8x16xbf16>
    %cst_24 = arith.constant dense<0.000000e+00> : vector<8x32xf32>
    %59 = tpu.matmul %58, %46, %cst_24 {dimension_numbers = #tpu.dot_dimension_numbers<[1], [0], [0], [1], [0, 0, 1, 1], [], []>} : vector<8x16xbf16>, vector<16x32xbf16>, vector<8x32xf32> -> vector<8x32xf32>
    %60 = vector.broadcast %57 : vector<8x1xf32> to vector<8x32xf32>
    %61 = arith.mulf %59, %60 : vector<8x32xf32>
    %62 = arith.truncf %61 : vector<8x32xf32> to vector<8x32xbf16>
    %c0_25 = arith.constant 0 : index
    %c32 = arith.constant 32 : index
    %63 = vector.load %arg23[%c0_25, %c32] : memref<8x128xbf16, #tpu.memory_space<vmem>>, vector<8x32xbf16>
    tpu.vector_store %arg23[%c0_25, %c32], %62 {strides = array<i32>} : memref<8x128xbf16, #tpu.memory_space<vmem>>, vector<8x32xbf16>,
    %64 = vector.extract_strided_slice %15 {offsets = [0, 64], sizes = [8, 32], strides = [1, 1]} : vector<8x128xf32> to vector<8x32xf32>
    %65 = arith.truncf %64 : vector<8x32xf32> to vector<8x32xbf16>
    %66 = vector.extract_strided_slice %20 {offsets = [0, 64], sizes = [16, 32], strides = [1, 1]} : vector<16x128xbf16> to vector<16x32xbf16>
    %67 = vector.extract_strided_slice %21 {offsets = [0, 64], sizes = [16, 32], strides = [1, 1]} : vector<16x128xbf16> to vector<16x32xbf16>
    %cst_26 = arith.constant dense<0.000000e+00> : vector<8x16xf32>
    %68 = tpu.matmul %65, %66, %cst_26 {dimension_numbers = #tpu.dot_dimension_numbers<[1], [1], [0], [0], [0, 0, 1, 0], [], []>} : vector<8x32xbf16>, vector<16x32xbf16>, vector<8x16xf32> -> vector<8x16xf32>
    %69 = vector.broadcast %19 : vector<1x16xf32> to vector<8x16xf32>
    %70 = arith.addf %68, %69 : vector<8x16xf32>
    %cst_27 = arith.constant dense<0xFF800000> : vector<8xf32>
    %71 = vector.multi_reduction <maximumf>, %70, %cst_27 [1] : vector<8x16xf32> to vector<8xf32>
    %72 = vector.shape_cast %71 : vector<8xf32> to vector<8x1xf32>
    %73 = vector.broadcast %72 : vector<8x1xf32> to vector<8x16xf32>
    %74 = arith.subf %70, %73 : vector<8x16xf32>
    %75 = math.exp %74 : vector<8x16xf32>
    %cst_28 = arith.constant dense<0.000000e+00> : vector<8xf32>
    %76 = vector.multi_reduction <add>, %75, %cst_28 [1] : vector<8x16xf32> to vector<8xf32>
    %77 = vector.shape_cast %76 : vector<8xf32> to vector<8x1xf32>
    %78 = tpu.reciprocal %77 {approx = true} : vector<8x1xf32> -> vector<8x1xf32>
    %79 = arith.truncf %75 : vector<8x16xf32> to vector<8x16xbf16>
    %cst_29 = arith.constant dense<0.000000e+00> : vector<8x32xf32>
    %80 = tpu.matmul %79, %67, %cst_29 {dimension_numbers = #tpu.dot_dimension_numbers<[1], [0], [0], [1], [0, 0, 1, 1], [], []>} : vector<8x16xbf16>, vector<16x32xbf16>, vector<8x32xf32> -> vector<8x32xf32>
    %81 = vector.broadcast %78 : vector<8x1xf32> to vector<8x32xf32>
    %82 = arith.mulf %80, %81 : vector<8x32xf32>
    %83 = arith.truncf %82 : vector<8x32xf32> to vector<8x32xbf16>
    %c0_30 = arith.constant 0 : index
    %c64 = arith.constant 64 : index
    %84 = vector.load %arg23[%c0_30, %c64] : memref<8x128xbf16, #tpu.memory_space<vmem>>, vector<8x32xbf16>
    tpu.vector_store %arg23[%c0_30, %c64], %83 {strides = array<i32>} : memref<8x128xbf16, #tpu.memory_space<vmem>>, vector<8x32xbf16>,
    %85 = vector.extract_strided_slice %15 {offsets = [0, 96], sizes = [8, 32], strides = [1, 1]} : vector<8x128xf32> to vector<8x32xf32>
    %86 = arith.truncf %85 : vector<8x32xf32> to vector<8x32xbf16>
    %87 = vector.extract_strided_slice %20 {offsets = [0, 96], sizes = [16, 32], strides = [1, 1]} : vector<16x128xbf16> to vector<16x32xbf16>
    %88 = vector.extract_strided_slice %21 {offsets = [0, 96], sizes = [16, 32], strides = [1, 1]} : vector<16x128xbf16> to vector<16x32xbf16>
    %cst_31 = arith.constant dense<0.000000e+00> : vector<8x16xf32>
    %89 = tpu.matmul %86, %87, %cst_31 {dimension_numbers = #tpu.dot_dimension_numbers<[1], [1], [0], [0], [0, 0, 1, 0], [], []>} : vector<8x32xbf16>, vector<16x32xbf16>, vector<8x16xf32> -> vector<8x16xf32>
    %90 = vector.broadcast %19 : vector<1x16xf32> to vector<8x16xf32>
    %91 = arith.addf %89, %90 : vector<8x16xf32>
    %cst_32 = arith.constant dense<0xFF800000> : vector<8xf32>
    %92 = vector.multi_reduction <maximumf>, %91, %cst_32 [1] : vector<8x16xf32> to vector<8xf32>
    %93 = vector.shape_cast %92 : vector<8xf32> to vector<8x1xf32>
    %94 = vector.broadcast %93 : vector<8x1xf32> to vector<8x16xf32>
    %95 = arith.subf %91, %94 : vector<8x16xf32>
    %96 = math.exp %95 : vector<8x16xf32>
    %cst_33 = arith.constant dense<0.000000e+00> : vector<8xf32>
    %97 = vector.multi_reduction <add>, %96, %cst_33 [1] : vector<8x16xf32> to vector<8xf32>
    %98 = vector.shape_cast %97 : vector<8xf32> to vector<8x1xf32>
    %99 = tpu.reciprocal %98 {approx = true} : vector<8x1xf32> -> vector<8x1xf32>
    %100 = arith.truncf %96 : vector<8x16xf32> to vector<8x16xbf16>
    %cst_34 = arith.constant dense<0.000000e+00> : vector<8x32xf32>
    %101 = tpu.matmul %100, %88, %cst_34 {dimension_numbers = #tpu.dot_dimension_numbers<[1], [0], [0], [1], [0, 0, 1, 1], [], []>} : vector<8x16xbf16>, vector<16x32xbf16>, vector<8x32xf32> -> vector<8x32xf32>
    %102 = vector.broadcast %99 : vector<8x1xf32> to vector<8x32xf32>
    %103 = arith.mulf %101, %102 : vector<8x32xf32>
    %104 = arith.truncf %103 : vector<8x32xf32> to vector<8x32xbf16>
    %c0_35 = arith.constant 0 : index
    %c96 = arith.constant 96 : index
    %105 = vector.load %arg23[%c0_35, %c96] : memref<8x128xbf16, #tpu.memory_space<vmem>>, vector<8x32xbf16>
    tpu.vector_store %arg23[%c0_35, %c96], %104 {strides = array<i32>} : memref<8x128xbf16, #tpu.memory_space<vmem>>, vector<8x32xbf16>,
    %c0_36 = arith.constant 0 : index
    %c0_37 = arith.constant 0 : index
    %106 = vector.load %arg23[%c0_36, %c0_37] : memref<8x128xbf16, #tpu.memory_space<vmem>>, vector<8x128xbf16>
    %c0_38 = arith.constant 0 : index
    %c0_39 = arith.constant 0 : index
    %107 = vector.load %arg10[%c0_38, %c0_39] : memref<128x128xbf16, #tpu.memory_space<vmem>>, vector<128x128xbf16>
    %cst_40 = arith.constant dense<0.000000e+00> : vector<8x128xf32>
    %108 = tpu.matmul %106, %107, %cst_40 {dimension_numbers = #tpu.dot_dimension_numbers<[1], [0], [0], [1], [0, 0, 1, 1], [], []>} : vector<8x128xbf16>, vector<128x128xbf16>, vector<8x128xf32> -> vector<8x128xf32>
    %c0_41 = arith.constant 0 : index
    %c0_42 = arith.constant 0 : index
    %109 = vector.load %arg11[%c0_41, %c0_42] : memref<1x128xf32, #tpu.memory_space<vmem>>, vector<1x128xf32>
    %110 = vector.broadcast %109 : vector<1x128xf32> to vector<8x128xf32>
    %111 = arith.addf %108, %110 : vector<8x128xf32>
    %112 = arith.addf %7, %111 : vector<8x128xf32>
    %c0_43 = arith.constant 0 : index
    %c0_44 = arith.constant 0 : index
    %113 = vector.load %arg12[%c0_43, %c0_44] : memref<1x128xf32, #tpu.memory_space<vmem>>, vector<1x128xf32>
    %c0_45 = arith.constant 0 : index
    %c0_46 = arith.constant 0 : index
    %114 = vector.load %arg13[%c0_45, %c0_46] : memref<1x128xf32, #tpu.memory_space<vmem>>, vector<1x128xf32>
    %cst_47 = arith.constant dense<0.000000e+00> : vector<8xf32>
    %115 = vector.multi_reduction <add>, %112, %cst_47 [1] : vector<8x128xf32> to vector<8xf32>
    %116 = vector.shape_cast %115 : vector<8xf32> to vector<8x1xf32>
    %cst_48 = arith.constant 1.280000e+02 : f32
    %117 = vector.broadcast %cst_48 : f32 to vector<8x1xf32>
    %118 = arith.divf %116, %117 : vector<8x1xf32>
    %119 = vector.broadcast %118 : vector<8x1xf32> to vector<8x128xf32>
    %120 = arith.subf %112, %119 : vector<8x128xf32>
    %121 = arith.mulf %120, %120 : vector<8x128xf32>
    %cst_49 = arith.constant dense<0.000000e+00> : vector<8xf32>
    %122 = vector.multi_reduction <add>, %121, %cst_49 [1] : vector<8x128xf32> to vector<8xf32>
    %123 = vector.shape_cast %122 : vector<8xf32> to vector<8x1xf32>
    %cst_50 = arith.constant 1.280000e+02 : f32
    %124 = vector.broadcast %cst_50 : f32 to vector<8x1xf32>
    %125 = arith.divf %123, %124 : vector<8x1xf32>
    %126 = vector.broadcast %118 : vector<8x1xf32> to vector<8x128xf32>
    %127 = arith.subf %112, %126 : vector<8x128xf32>
    %cst_51 = arith.constant 9.99999974E-6 : f32
    %128 = vector.broadcast %cst_51 : f32 to vector<8x1xf32>
    %129 = arith.addf %125, %128 : vector<8x1xf32>
    %130 = math.rsqrt %129 : vector<8x1xf32>
    %131 = vector.broadcast %130 : vector<8x1xf32> to vector<8x128xf32>
    %132 = arith.mulf %127, %131 : vector<8x128xf32>
    %133 = vector.broadcast %113 : vector<1x128xf32> to vector<8x128xf32>
    %134 = arith.mulf %132, %133 : vector<8x128xf32>
    %135 = vector.broadcast %114 : vector<1x128xf32> to vector<8x128xf32>
    %136 = arith.addf %134, %135 : vector<8x128xf32>
    %137 = arith.truncf %136 : vector<8x128xf32> to vector<8x128xbf16>
    %c0_52 = arith.constant 0 : index
    %c0_53 = arith.constant 0 : index
    %138 = vector.load %arg14[%c0_52, %c0_53] : memref<128x256xbf16, #tpu.memory_space<vmem>>, vector<128x256xbf16>
    %cst_54 = arith.constant dense<0.000000e+00> : vector<8x256xf32>
    %139 = tpu.matmul %137, %138, %cst_54 {dimension_numbers = #tpu.dot_dimension_numbers<[1], [0], [0], [1], [0, 0, 1, 1], [], []>} : vector<8x128xbf16>, vector<128x256xbf16>, vector<8x256xf32> -> vector<8x256xf32>
    %c0_55 = arith.constant 0 : index
    %c0_56 = arith.constant 0 : index
    %140 = vector.load %arg15[%c0_55, %c0_56] : memref<1x256xf32, #tpu.memory_space<vmem>>, vector<1x256xf32>
    %141 = vector.broadcast %140 : vector<1x256xf32> to vector<8x256xf32>
    %142 = arith.addf %139, %141 : vector<8x256xf32>
    %cst_57 = arith.constant 0.000000e+00 : f32
    %143 = vector.broadcast %cst_57 : f32 to vector<8x256xf32>
    %144 = arith.cmpf ogt, %142, %143 : vector<8x256xf32>
    %cst_58 = arith.constant 2.000000e-01 : f32
    %145 = vector.broadcast %cst_58 : f32 to vector<8x256xf32>
    %146 = arith.mulf %145, %142 : vector<8x256xf32>
    %147 = arith.select %144, %142, %146 : vector<8x256xi1>, vector<8x256xf32>
    %148 = arith.truncf %147 : vector<8x256xf32> to vector<8x256xbf16>
    %c0_59 = arith.constant 0 : index
    %c0_60 = arith.constant 0 : index
    %149 = vector.load %arg16[%c0_59, %c0_60] : memref<256x128xbf16, #tpu.memory_space<vmem>>, vector<256x128xbf16>
    %cst_61 = arith.constant dense<0.000000e+00> : vector<8x128xf32>
    %150 = tpu.matmul %148, %149, %cst_61 {dimension_numbers = #tpu.dot_dimension_numbers<[1], [0], [0], [1], [0, 0, 1, 1], [], []>} : vector<8x256xbf16>, vector<256x128xbf16>, vector<8x128xf32> -> vector<8x128xf32>
    %c0_62 = arith.constant 0 : index
    %c0_63 = arith.constant 0 : index
    %151 = vector.load %arg17[%c0_62, %c0_63] : memref<1x128xf32, #tpu.memory_space<vmem>>, vector<1x128xf32>
    %152 = vector.broadcast %151 : vector<1x128xf32> to vector<8x128xf32>
    %153 = arith.addf %150, %152 : vector<8x128xf32>
    %154 = arith.addf %136, %153 : vector<8x128xf32>
    %c0_64 = arith.constant 0 : index
    %c0_65 = arith.constant 0 : index
    %155 = vector.load %arg18[%c0_64, %c0_65] : memref<1x128xf32, #tpu.memory_space<vmem>>, vector<1x128xf32>
    %c0_66 = arith.constant 0 : index
    %c0_67 = arith.constant 0 : index
    %156 = vector.load %arg19[%c0_66, %c0_67] : memref<1x128xf32, #tpu.memory_space<vmem>>, vector<1x128xf32>
    %cst_68 = arith.constant dense<0.000000e+00> : vector<8xf32>
    %157 = vector.multi_reduction <add>, %154, %cst_68 [1] : vector<8x128xf32> to vector<8xf32>
    %158 = vector.shape_cast %157 : vector<8xf32> to vector<8x1xf32>
    %cst_69 = arith.constant 1.280000e+02 : f32
    %159 = vector.broadcast %cst_69 : f32 to vector<8x1xf32>
    %160 = arith.divf %158, %159 : vector<8x1xf32>
    %161 = vector.broadcast %160 : vector<8x1xf32> to vector<8x128xf32>
    %162 = arith.subf %154, %161 : vector<8x128xf32>
    %163 = arith.mulf %162, %162 : vector<8x128xf32>
    %cst_70 = arith.constant dense<0.000000e+00> : vector<8xf32>
    %164 = vector.multi_reduction <add>, %163, %cst_70 [1] : vector<8x128xf32> to vector<8xf32>
    %165 = vector.shape_cast %164 : vector<8xf32> to vector<8x1xf32>
    %cst_71 = arith.constant 1.280000e+02 : f32
    %166 = vector.broadcast %cst_71 : f32 to vector<8x1xf32>
    %167 = arith.divf %165, %166 : vector<8x1xf32>
    %168 = vector.broadcast %160 : vector<8x1xf32> to vector<8x128xf32>
    %169 = arith.subf %154, %168 : vector<8x128xf32>
    %cst_72 = arith.constant 9.99999974E-6 : f32
    %170 = vector.broadcast %cst_72 : f32 to vector<8x1xf32>
    %171 = arith.addf %167, %170 : vector<8x1xf32>
    %172 = math.rsqrt %171 : vector<8x1xf32>
    %173 = vector.broadcast %172 : vector<8x1xf32> to vector<8x128xf32>
    %174 = arith.mulf %169, %173 : vector<8x128xf32>
    %175 = vector.broadcast %155 : vector<1x128xf32> to vector<8x128xf32>
    %176 = arith.mulf %174, %175 : vector<8x128xf32>
    %177 = vector.broadcast %156 : vector<1x128xf32> to vector<8x128xf32>
    %178 = arith.addf %176, %177 : vector<8x128xf32>
    %c0_73 = arith.constant 0 : index
    %c0_74 = arith.constant 0 : index
    %c0_75 = arith.constant 0 : index
    %179 = vector.load %arg20[%c0_73, %c0_74, %c0_75] : memref<1x8x128xf32, #tpu.memory_space<vmem>>, vector<1x8x128xf32>
    %180 = vector.shape_cast %179 : vector<1x8x128xf32> to vector<8x128xf32>
    %181 = vector.shape_cast %178 : vector<8x128xf32> to vector<1x8x128xf32>
    tpu.vector_store %arg20[%c0_73, %c0_74, %c0_75], %181 {strides = array<i32>} : memref<1x8x128xf32, #tpu.memory_space<vmem>>, vector<1x8x128xf32>,
    return
  }
  func.func @transform_0(%arg0: i32, %arg1: i32) -> (i32, i32, i32) {
    %c0_i32 = arith.constant 0 : i32
    %c0_i32_0 = arith.constant 0 : i32
    %c0_i32_1 = arith.constant 0 : i32
    return %arg0, %c0_i32, %c0_i32_0 : i32, i32, i32
  }
  func.func @transform_1(%arg0: i32, %arg1: i32) -> (i32, i32, i32) {
    %c0_i32 = arith.constant 0 : i32
    %c0_i32_0 = arith.constant 0 : i32
    %c0_i32_1 = arith.constant 0 : i32
    return %arg0, %c0_i32, %c0_i32_0 : i32, i32, i32
  }
  func.func @transform_2(%arg0: i32, %arg1: i32) -> (i32, i32) {
    %c0_i32 = arith.constant 0 : i32
    %c0_i32_0 = arith.constant 0 : i32
    %c0_i32_1 = arith.constant 0 : i32
    return %c0_i32, %c0_i32_0 : i32, i32
  }
  func.func @transform_3(%arg0: i32, %arg1: i32) -> (i32, i32) {
    %c0_i32 = arith.constant 0 : i32
    %c0_i32_0 = arith.constant 0 : i32
    %c0_i32_1 = arith.constant 0 : i32
    return %c0_i32, %c0_i32_0 : i32, i32
  }
  func.func @transform_4(%arg0: i32, %arg1: i32) -> (i32, i32) {
    %c0_i32 = arith.constant 0 : i32
    %c0_i32_0 = arith.constant 0 : i32
    %c0_i32_1 = arith.constant 0 : i32
    return %c0_i32, %c0_i32_0 : i32, i32
  }
  func.func @transform_5(%arg0: i32, %arg1: i32) -> (i32, i32) {
    %c0_i32 = arith.constant 0 : i32
    %c0_i32_0 = arith.constant 0 : i32
    %c0_i32_1 = arith.constant 0 : i32
    return %c0_i32, %c0_i32_0 : i32, i32
  }
  func.func @transform_6(%arg0: i32, %arg1: i32) -> (i32, i32) {
    %c0_i32 = arith.constant 0 : i32
    %c0_i32_0 = arith.constant 0 : i32
    %c0_i32_1 = arith.constant 0 : i32
    return %c0_i32, %c0_i32_0 : i32, i32
  }
  func.func @transform_7(%arg0: i32, %arg1: i32) -> (i32, i32) {
    %c0_i32 = arith.constant 0 : i32
    %c0_i32_0 = arith.constant 0 : i32
    %c0_i32_1 = arith.constant 0 : i32
    return %c0_i32, %c0_i32_0 : i32, i32
  }
  func.func @transform_8(%arg0: i32, %arg1: i32) -> (i32, i32) {
    %c0_i32 = arith.constant 0 : i32
    %c0_i32_0 = arith.constant 0 : i32
    %c0_i32_1 = arith.constant 0 : i32
    return %c0_i32, %c0_i32_0 : i32, i32
  }
  func.func @transform_9(%arg0: i32, %arg1: i32) -> (i32, i32) {
    %c0_i32 = arith.constant 0 : i32
    %c0_i32_0 = arith.constant 0 : i32
    %c0_i32_1 = arith.constant 0 : i32
    return %c0_i32, %c0_i32_0 : i32, i32
  }
  func.func @transform_10(%arg0: i32, %arg1: i32) -> (i32, i32) {
    %c0_i32 = arith.constant 0 : i32
    %c0_i32_0 = arith.constant 0 : i32
    %c0_i32_1 = arith.constant 0 : i32
    return %c0_i32, %c0_i32_0 : i32, i32
  }
  func.func @transform_11(%arg0: i32, %arg1: i32) -> (i32, i32) {
    %c0_i32 = arith.constant 0 : i32
    %c0_i32_0 = arith.constant 0 : i32
    %c0_i32_1 = arith.constant 0 : i32
    return %c0_i32, %c0_i32_0 : i32, i32
  }
  func.func @transform_12(%arg0: i32, %arg1: i32) -> (i32, i32) {
    %c0_i32 = arith.constant 0 : i32
    %c0_i32_0 = arith.constant 0 : i32
    %c0_i32_1 = arith.constant 0 : i32
    return %c0_i32, %c0_i32_0 : i32, i32
  }
  func.func @transform_13(%arg0: i32, %arg1: i32) -> (i32, i32) {
    %c0_i32 = arith.constant 0 : i32
    %c0_i32_0 = arith.constant 0 : i32
    %c0_i32_1 = arith.constant 0 : i32
    return %c0_i32, %c0_i32_0 : i32, i32
  }
  func.func @transform_14(%arg0: i32, %arg1: i32) -> (i32, i32) {
    %c0_i32 = arith.constant 0 : i32
    %c0_i32_0 = arith.constant 0 : i32
    %c0_i32_1 = arith.constant 0 : i32
    return %c0_i32, %c0_i32_0 : i32, i32
  }
  func.func @transform_15(%arg0: i32, %arg1: i32) -> (i32, i32) {
    %c0_i32 = arith.constant 0 : i32
    %c0_i32_0 = arith.constant 0 : i32
    %c0_i32_1 = arith.constant 0 : i32
    return %c0_i32, %c0_i32_0 : i32, i32
  }
  func.func @transform_16(%arg0: i32, %arg1: i32) -> (i32, i32) {
    %c0_i32 = arith.constant 0 : i32
    %c0_i32_0 = arith.constant 0 : i32
    %c0_i32_1 = arith.constant 0 : i32
    return %c0_i32, %c0_i32_0 : i32, i32
  }
  func.func @transform_17(%arg0: i32, %arg1: i32) -> (i32, i32) {
    %c0_i32 = arith.constant 0 : i32
    %c0_i32_0 = arith.constant 0 : i32
    %c0_i32_1 = arith.constant 0 : i32
    return %c0_i32, %c0_i32_0 : i32, i32
  }
  func.func @transform_18(%arg0: i32, %arg1: i32) -> (i32, i32, i32) {
    %c0_i32 = arith.constant 0 : i32
    %c0_i32_0 = arith.constant 0 : i32
    return %arg0, %arg1, %c0_i32 : i32, i32, i32
  }
}

module attributes {stable_mosaic.version = 11 : i64} {
  func.func @encoder_layer_kernel(%arg0: i32, %arg1: i32, %arg2: memref<1x16x128xf32, #tpu.memory_space<vmem>>, %arg3: memref<1x1x16xf32, #tpu.memory_space<vmem>>, %arg4: memref<128x128xbf16, #tpu.memory_space<vmem>>, %arg5: memref<1x128xf32, #tpu.memory_space<vmem>>, %arg6: memref<128x128xbf16, #tpu.memory_space<vmem>>, %arg7: memref<1x128xf32, #tpu.memory_space<vmem>>, %arg8: memref<128x128xbf16, #tpu.memory_space<vmem>>, %arg9: memref<1x128xf32, #tpu.memory_space<vmem>>, %arg10: memref<128x128xbf16, #tpu.memory_space<vmem>>, %arg11: memref<1x128xf32, #tpu.memory_space<vmem>>, %arg12: memref<1x128xf32, #tpu.memory_space<vmem>>, %arg13: memref<1x128xf32, #tpu.memory_space<vmem>>, %arg14: memref<128x256xbf16, #tpu.memory_space<vmem>>, %arg15: memref<1x256xf32, #tpu.memory_space<vmem>>, %arg16: memref<256x128xbf16, #tpu.memory_space<vmem>>, %arg17: memref<1x128xf32, #tpu.memory_space<vmem>>, %arg18: memref<1x128xf32, #tpu.memory_space<vmem>>, %arg19: memref<1x128xf32, #tpu.memory_space<vmem>>, %arg20: memref<1x8x128xf32, #tpu.memory_space<vmem>>, %arg21: memref<16x128xbf16, #tpu.memory_space<vmem>>, %arg22: memref<16x128xbf16, #tpu.memory_space<vmem>>, %arg23: memref<8x128xbf16, #tpu.memory_space<vmem>>) attributes {dimension_semantics = [#tpu.dimension_semantics<parallel>, #tpu.dimension_semantics<arbitrary>], iteration_bounds = array<i64: 2, 2>, scalar_prefetch = 0 : i64, scratch_operands = 3 : i64, tpu.core_type = #tpu.core_type<tc>, window_params = [{transform_indices = @transform_0, window_bounds = array<i64: 1, 16, 128>}, {transform_indices = @transform_1, window_bounds = array<i64: 1, 1, 16>}, {pipeline_mode = #tpu.pipeline_mode<synchronous>, transform_indices = @transform_2, window_bounds = array<i64: 128, 128>}, {pipeline_mode = #tpu.pipeline_mode<synchronous>, transform_indices = @transform_3, window_bounds = array<i64: 1, 128>}, {pipeline_mode = #tpu.pipeline_mode<synchronous>, transform_indices = @transform_4, window_bounds = array<i64: 128, 128>}, {pipeline_mode = #tpu.pipeline_mode<synchronous>, transform_indices = @transform_5, window_bounds = array<i64: 1, 128>}, {pipeline_mode = #tpu.pipeline_mode<synchronous>, transform_indices = @transform_6, window_bounds = array<i64: 128, 128>}, {pipeline_mode = #tpu.pipeline_mode<synchronous>, transform_indices = @transform_7, window_bounds = array<i64: 1, 128>}, {pipeline_mode = #tpu.pipeline_mode<synchronous>, transform_indices = @transform_8, window_bounds = array<i64: 128, 128>}, {pipeline_mode = #tpu.pipeline_mode<synchronous>, transform_indices = @transform_9, window_bounds = array<i64: 1, 128>}, {pipeline_mode = #tpu.pipeline_mode<synchronous>, transform_indices = @transform_10, window_bounds = array<i64: 1, 128>}, {pipeline_mode = #tpu.pipeline_mode<synchronous>, transform_indices = @transform_11, window_bounds = array<i64: 1, 128>}, {pipeline_mode = #tpu.pipeline_mode<synchronous>, transform_indices = @transform_12, window_bounds = array<i64: 128, 256>}, {pipeline_mode = #tpu.pipeline_mode<synchronous>, transform_indices = @transform_13, window_bounds = array<i64: 1, 256>}, {pipeline_mode = #tpu.pipeline_mode<synchronous>, transform_indices = @transform_14, window_bounds = array<i64: 256, 128>}, {pipeline_mode = #tpu.pipeline_mode<synchronous>, transform_indices = @transform_15, window_bounds = array<i64: 1, 128>}, {pipeline_mode = #tpu.pipeline_mode<synchronous>, transform_indices = @transform_16, window_bounds = array<i64: 1, 128>}, {pipeline_mode = #tpu.pipeline_mode<synchronous>, transform_indices = @transform_17, window_bounds = array<i64: 1, 128>}, {transform_indices = @transform_18, window_bounds = array<i64: 1, 8, 128>}]} {
    %c0_i32 = arith.constant 0 : i32
    %0 = arith.cmpi eq, %arg1, %c0_i32 : i32
    %1 = arith.extui %0 : i1 to i32
    %c0_i32_0 = arith.constant 0 : i32
    %2 = arith.cmpi ne, %1, %c0_i32_0 : i32
    scf.if %2 {
      %c0_i32_76 = arith.constant 0 : i32
      %c16_i32 = arith.constant 16 : i32
      %182 = arith.muli %c0_i32_76, %c16_i32 : i32
      %183 = tpu.assume_multiple %182, 16 : i32
      %c0_77 = arith.constant 0 : index
      %184 = arith.index_cast %183 : i32 to index
      %c0_78 = arith.constant 0 : index
      %185 = vector.load %arg2[%c0_77, %184, %c0_78] : memref<1x16x128xf32, #tpu.memory_space<vmem>>, vector<1x16x128xf32>
      %186 = vector.shape_cast %185 : vector<1x16x128xf32> to vector<16x128xf32>
      %187 = arith.truncf %186 : vector<16x128xf32> to vector<16x128xbf16>
      %c0_79 = arith.constant 0 : index
      %c0_80 = arith.constant 0 : index
      %188 = vector.load %arg6[%c0_79, %c0_80] : memref<128x128xbf16, #tpu.memory_space<vmem>>, vector<128x128xbf16>
      %cst_81 = arith.constant dense<0.000000e+00> : vector<16x128xf32>
      %189 = tpu.matmul %187, %188, %cst_81 {dimension_numbers = #tpu.dot_dimension_numbers<[1], [0], [0], [1], [0, 0, 1, 1], [], []>} : vector<16x128xbf16>, vector<128x128xbf16>, vector<16x128xf32> -> vector<16x128xf32>
      %c0_82 = arith.constant 0 : index
      %c0_83 = arith.constant 0 : index
      %190 = vector.load %arg7[%c0_82, %c0_83] : memref<1x128xf32, #tpu.memory_space<vmem>>, vector<1x128xf32>
      %191 = vector.broadcast %190 : vector<1x128xf32> to vector<16x128xf32>
      %192 = arith.addf %189, %191 : vector<16x128xf32>
      %c0_84 = arith.constant 0 : index
      %c0_85 = arith.constant 0 : index
      %193 = vector.load %arg8[%c0_84, %c0_85] : memref<128x128xbf16, #tpu.memory_space<vmem>>, vector<128x128xbf16>
      %cst_86 = arith.constant dense<0.000000e+00> : vector<16x128xf32>
      %194 = tpu.matmul %187, %193, %cst_86 {dimension_numbers = #tpu.dot_dimension_numbers<[1], [0], [0], [1], [0, 0, 1, 1], [], []>} : vector<16x128xbf16>, vector<128x128xbf16>, vector<16x128xf32> -> vector<16x128xf32>
      %c0_87 = arith.constant 0 : index
      %c0_88 = arith.constant 0 : index
      %195 = vector.load %arg9[%c0_87, %c0_88] : memref<1x128xf32, #tpu.memory_space<vmem>>, vector<1x128xf32>
      %196 = vector.broadcast %195 : vector<1x128xf32> to vector<16x128xf32>
      %197 = arith.addf %194, %196 : vector<16x128xf32>
      %198 = arith.truncf %192 : vector<16x128xf32> to vector<16x128xbf16>
      %199 = arith.index_cast %183 : i32 to index
      %c0_89 = arith.constant 0 : index
      %200 = vector.load %arg21[%199, %c0_89] : memref<16x128xbf16, #tpu.memory_space<vmem>>, vector<16x128xbf16>
      tpu.vector_store %arg21[%199, %c0_89], %198 {strides = array<i32>} : memref<16x128xbf16, #tpu.memory_space<vmem>>, vector<16x128xbf16>,
      %201 = arith.truncf %197 : vector<16x128xf32> to vector<16x128xbf16>
      %202 = arith.index_cast %183 : i32 to index
      %c0_90 = arith.constant 0 : index
      %203 = vector.load %arg22[%202, %c0_90] : memref<16x128xbf16, #tpu.memory_space<vmem>>, vector<16x128xbf16>
      tpu.vector_store %arg22[%202, %c0_90], %201 {strides = array<i32>} : memref<16x128xbf16, #tpu.memory_space<vmem>>, vector<16x128xbf16>,
      %c1_i32 = arith.constant 1 : i32
    } else {
    }
    %c8_i32 = arith.constant 8 : i32
    %3 = arith.muli %arg1, %c8_i32 : i32
    %4 = tpu.assume_multiple %3, 8 : i32
    %c0 = arith.constant 0 : index
    %5 = arith.index_cast %4 : i32 to index
    %c0_1 = arith.constant 0 : index
    %6 = vector.load %arg2[%c0, %5, %c0_1] : memref<1x16x128xf32, #tpu.memory_space<vmem>>, vector<1x8x128xf32>
    %7 = vector.shape_cast %6 : vector<1x8x128xf32> to vector<8x128xf32>
    %8 = arith.truncf %7 : vector<8x128xf32> to vector<8x128xbf16>
    %c0_2 = arith.constant 0 : index
    %c0_3 = arith.constant 0 : index
    %9 = vector.load %arg4[%c0_2, %c0_3] : memref<128x128xbf16, #tpu.memory_space<vmem>>, vector<128x128xbf16>
    %cst = arith.constant dense<0.000000e+00> : vector<8x128xf32>
    %10 = tpu.matmul %8, %9, %cst {dimension_numbers = #tpu.dot_dimension_numbers<[1], [0], [0], [1], [0, 0, 1, 1], [], []>} : vector<8x128xbf16>, vector<128x128xbf16>, vector<8x128xf32> -> vector<8x128xf32>
    %c0_4 = arith.constant 0 : index
    %c0_5 = arith.constant 0 : index
    %11 = vector.load %arg5[%c0_4, %c0_5] : memref<1x128xf32, #tpu.memory_space<vmem>>, vector<1x128xf32>
    %12 = vector.broadcast %11 : vector<1x128xf32> to vector<8x128xf32>
    %13 = arith.addf %10, %12 : vector<8x128xf32>
    %cst_6 = arith.constant 0.176776692 : f32
    %14 = vector.broadcast %cst_6 : f32 to vector<8x128xf32>
    %15 = arith.mulf %13, %14 : vector<8x128xf32>
    %c0_7 = arith.constant 0 : index
    %c0_8 = arith.constant 0 : index
    %c0_9 = arith.constant 0 : index
    %16 = vector.load %arg3[%c0_7, %c0_8, %c0_9] : memref<1x1x16xf32, #tpu.memory_space<vmem>>, vector<1x1x16xf32>
    %17 = vector.shape_cast %16 : vector<1x1x16xf32> to vector<1x16xf32>
    %cst_10 = arith.constant -1.000000e+09 : f32
    %18 = vector.broadcast %cst_10 : f32 to vector<1x16xf32>
    %19 = arith.mulf %17, %18 : vector<1x16xf32>
    %c0_11 = arith.constant 0 : index
    %c0_12 = arith.constant 0 : index
    %20 = vector.load %arg21[%c0_11, %c0_12] : memref<16x128xbf16, #tpu.memory_space<vmem>>, vector<16x128xbf16>
    %c0_13 = arith.constant 0 : index
    %c0_14 = arith.constant 0 : index
    %21 = vector.load %arg22[%c0_13, %c0_14] : memref<16x128xbf16, #tpu.memory_space<vmem>>, vector<16x128xbf16>
    %22 = vector.extract_strided_slice %15 {offsets = [0, 0], sizes = [8, 32], strides = [1, 1]} : vector<8x128xf32> to vector<8x32xf32>
    %23 = arith.truncf %22 : vector<8x32xf32> to vector<8x32xbf16>
    %24 = vector.extract_strided_slice %20 {offsets = [0, 0], sizes = [16, 32], strides = [1, 1]} : vector<16x128xbf16> to vector<16x32xbf16>
    %25 = vector.extract_strided_slice %21 {offsets = [0, 0], sizes = [16, 32], strides = [1, 1]} : vector<16x128xbf16> to vector<16x32xbf16>
    %cst_15 = arith.constant dense<0.000000e+00> : vector<8x16xf32>
    %26 = tpu.matmul %23, %24, %cst_15 {dimension_numbers = #tpu.dot_dimension_numbers<[1], [1], [0], [0], [0, 0, 1, 0], [], []>} : vector<8x32xbf16>, vector<16x32xbf16>, vector<8x16xf32> -> vector<8x16xf32>
    %27 = vector.broadcast %19 : vector<1x16xf32> to vector<8x16xf32>
    %28 = arith.addf %26, %27 : vector<8x16xf32>
    %cst_16 = arith.constant dense<0xFF800000> : vector<8xf32>
    %29 = vector.multi_reduction <maximumf>, %28, %cst_16 [1] : vector<8x16xf32> to vector<8xf32>
    %30 = vector.shape_cast %29 : vector<8xf32> to vector<8x1xf32>
    %31 = vector.broadcast %30 : vector<8x1xf32> to vector<8x16xf32>
    %32 = arith.subf %28, %31 : vector<8x16xf32>
    %33 = math.exp %32 : vector<8x16xf32>
    %cst_17 = arith.constant dense<0.000000e+00> : vector<8xf32>
    %34 = vector.multi_reduction <add>, %33, %cst_17 [1] : vector<8x16xf32> to vector<8xf32>
    %35 = vector.shape_cast %34 : vector<8xf32> to vector<8x1xf32>
    %36 = tpu.reciprocal %35 {approx = true} : vector<8x1xf32> -> vector<8x1xf32>
    %37 = arith.truncf %33 : vector<8x16xf32> to vector<8x16xbf16>
    %cst_18 = arith.constant dense<0.000000e+00> : vector<8x32xf32>
    %38 = tpu.matmul %37, %25, %cst_18 {dimension_numbers = #tpu.dot_dimension_numbers<[1], [0], [0], [1], [0, 0, 1, 1], [], []>} : vector<8x16xbf16>, vector<16x32xbf16>, vector<8x32xf32> -> vector<8x32xf32>
    %39 = vector.broadcast %36 : vector<8x1xf32> to vector<8x32xf32>
    %40 = arith.mulf %38, %39 : vector<8x32xf32>
    %41 = arith.truncf %40 : vector<8x32xf32> to vector<8x32xbf16>
    %c0_19 = arith.constant 0 : index
    %c0_20 = arith.constant 0 : index
    %42 = vector.load %arg23[%c0_19, %c0_20] : memref<8x128xbf16, #tpu.memory_space<vmem>>, vector<8x32xbf16>
    tpu.vector_store %arg23[%c0_19, %c0_20], %41 {strides = array<i32>} : memref<8x128xbf16, #tpu.memory_space<vmem>>, vector<8x32xbf16>,
    %43 = vector.extract_strided_slice %15 {offsets = [0, 32], sizes = [8, 32], strides = [1, 1]} : vector<8x128xf32> to vector<8x32xf32>
    %44 = arith.truncf %43 : vector<8x32xf32> to vector<8x32xbf16>
    %45 = vector.extract_strided_slice %20 {offsets = [0, 32], sizes = [16, 32], strides = [1, 1]} : vector<16x128xbf16> to vector<16x32xbf16>
    %46 = vector.extract_strided_slice %21 {offsets = [0, 32], sizes = [16, 32], strides = [1, 1]} : vector<16x128xbf16> to vector<16x32xbf16>
    %cst_21 = arith.constant dense<0.000000e+00> : vector<8x16xf32>
    %47 = tpu.matmul %44, %45, %cst_21 {dimension_numbers = #tpu.dot_dimension_numbers<[1], [1], [0], [0], [0, 0, 1, 0], [], []>} : vector<8x32xbf16>, vector<16x32xbf16>, vector<8x16xf32> -> vector<8x16xf32>
    %48 = vector.broadcast %19 : vector<1x16xf32> to vector<8x16xf32>
    %49 = arith.addf %47, %48 : vector<8x16xf32>
    %cst_22 = arith.constant dense<0xFF800000> : vector<8xf32>
    %50 = vector.multi_reduction <maximumf>, %49, %cst_22 [1] : vector<8x16xf32> to vector<8xf32>
    %51 = vector.shape_cast %50 : vector<8xf32> to vector<8x1xf32>
    %52 = vector.broadcast %51 : vector<8x1xf32> to vector<8x16xf32>
    %53 = arith.subf %49, %52 : vector<8x16xf32>
    %54 = math.exp %53 : vector<8x16xf32>
    %cst_23 = arith.constant dense<0.000000e+00> : vector<8xf32>
    %55 = vector.multi_reduction <add>, %54, %cst_23 [1] : vector<8x16xf32> to vector<8xf32>
    %56 = vector.shape_cast %55 : vector<8xf32> to vector<8x1xf32>
    %57 = tpu.reciprocal %56 {approx = true} : vector<8x1xf32> -> vector<8x1xf32>
    %58 = arith.truncf %54 : vector<8x16xf32> to vector<8x16xbf16>
    %cst_24 = arith.constant dense<0.000000e+00> : vector<8x32xf32>
    %59 = tpu.matmul %58, %46, %cst_24 {dimension_numbers = #tpu.dot_dimension_numbers<[1], [0], [0], [1], [0, 0, 1, 1], [], []>} : vector<8x16xbf16>, vector<16x32xbf16>, vector<8x32xf32> -> vector<8x32xf32>
    %60 = vector.broadcast %57 : vector<8x1xf32> to vector<8x32xf32>
    %61 = arith.mulf %59, %60 : vector<8x32xf32>
    %62 = arith.truncf %61 : vector<8x32xf32> to vector<8x32xbf16>
    %c0_25 = arith.constant 0 : index
    %c32 = arith.constant 32 : index
    %63 = vector.load %arg23[%c0_25, %c32] : memref<8x128xbf16, #tpu.memory_space<vmem>>, vector<8x32xbf16>
    tpu.vector_store %arg23[%c0_25, %c32], %62 {strides = array<i32>} : memref<8x128xbf16, #tpu.memory_space<vmem>>, vector<8x32xbf16>,
    %64 = vector.extract_strided_slice %15 {offsets = [0, 64], sizes = [8, 32], strides = [1, 1]} : vector<8x128xf32> to vector<8x32xf32>
    %65 = arith.truncf %64 : vector<8x32xf32> to vector<8x32xbf16>
    %66 = vector.extract_strided_slice %20 {offsets = [0, 64], sizes = [16, 32], strides = [1, 1]} : vector<16x128xbf16> to vector<16x32xbf16>
    %67 = vector.extract_strided_slice %21 {offsets = [0, 64], sizes = [16, 32], strides = [1, 1]} : vector<16x128xbf16> to vector<16x32xbf16>
    %cst_26 = arith.constant dense<0.000000e+00> : vector<8x16xf32>
    %68 = tpu.matmul %65, %66, %cst_26 {dimension_numbers = #tpu.dot_dimension_numbers<[1], [1], [0], [0], [0, 0, 1, 0], [], []>} : vector<8x32xbf16>, vector<16x32xbf16>, vector<8x16xf32> -> vector<8x16xf32>
    %69 = vector.broadcast %19 : vector<1x16xf32> to vector<8x16xf32>
    %70 = arith.addf %68, %69 : vector<8x16xf32>
    %cst_27 = arith.constant dense<0xFF800000> : vector<8xf32>
    %71 = vector.multi_reduction <maximumf>, %70, %cst_27 [1] : vector<8x16xf32> to vector<8xf32>
    %72 = vector.shape_cast %71 : vector<8xf32> to vector<8x1xf32>
    %73 = vector.broadcast %72 : vector<8x1xf32> to vector<8x16xf32>
    %74 = arith.subf %70, %73 : vector<8x16xf32>
    %75 = math.exp %74 : vector<8x16xf32>
    %cst_28 = arith.constant dense<0.000000e+00> : vector<8xf32>
    %76 = vector.multi_reduction <add>, %75, %cst_28 [1] : vector<8x16xf32> to vector<8xf32>
    %77 = vector.shape_cast %76 : vector<8xf32> to vector<8x1xf32>
    %78 = tpu.reciprocal %77 {approx = true} : vector<8x1xf32> -> vector<8x1xf32>
    %79 = arith.truncf %75 : vector<8x16xf32> to vector<8x16xbf16>
    %cst_29 = arith.constant dense<0.000000e+00> : vector<8x32xf32>
    %80 = tpu.matmul %79, %67, %cst_29 {dimension_numbers = #tpu.dot_dimension_numbers<[1], [0], [0], [1], [0, 0, 1, 1], [], []>} : vector<8x16xbf16>, vector<16x32xbf16>, vector<8x32xf32> -> vector<8x32xf32>
    %81 = vector.broadcast %78 : vector<8x1xf32> to vector<8x32xf32>
    %82 = arith.mulf %80, %81 : vector<8x32xf32>
    %83 = arith.truncf %82 : vector<8x32xf32> to vector<8x32xbf16>
    %c0_30 = arith.constant 0 : index
    %c64 = arith.constant 64 : index
    %84 = vector.load %arg23[%c0_30, %c64] : memref<8x128xbf16, #tpu.memory_space<vmem>>, vector<8x32xbf16>
    tpu.vector_store %arg23[%c0_30, %c64], %83 {strides = array<i32>} : memref<8x128xbf16, #tpu.memory_space<vmem>>, vector<8x32xbf16>,
    %85 = vector.extract_strided_slice %15 {offsets = [0, 96], sizes = [8, 32], strides = [1, 1]} : vector<8x128xf32> to vector<8x32xf32>
    %86 = arith.truncf %85 : vector<8x32xf32> to vector<8x32xbf16>
    %87 = vector.extract_strided_slice %20 {offsets = [0, 96], sizes = [16, 32], strides = [1, 1]} : vector<16x128xbf16> to vector<16x32xbf16>
    %88 = vector.extract_strided_slice %21 {offsets = [0, 96], sizes = [16, 32], strides = [1, 1]} : vector<16x128xbf16> to vector<16x32xbf16>
    %cst_31 = arith.constant dense<0.000000e+00> : vector<8x16xf32>
    %89 = tpu.matmul %86, %87, %cst_31 {dimension_numbers = #tpu.dot_dimension_numbers<[1], [1], [0], [0], [0, 0, 1, 0], [], []>} : vector<8x32xbf16>, vector<16x32xbf16>, vector<8x16xf32> -> vector<8x16xf32>
    %90 = vector.broadcast %19 : vector<1x16xf32> to vector<8x16xf32>
    %91 = arith.addf %89, %90 : vector<8x16xf32>
    %cst_32 = arith.constant dense<0xFF800000> : vector<8xf32>
    %92 = vector.multi_reduction <maximumf>, %91, %cst_32 [1] : vector<8x16xf32> to vector<8xf32>
    %93 = vector.shape_cast %92 : vector<8xf32> to vector<8x1xf32>
    %94 = vector.broadcast %93 : vector<8x1xf32> to vector<8x16xf32>
    %95 = arith.subf %91, %94 : vector<8x16xf32>
    %96 = math.exp %95 : vector<8x16xf32>
    %cst_33 = arith.constant dense<0.000000e+00> : vector<8xf32>
    %97 = vector.multi_reduction <add>, %96, %cst_33 [1] : vector<8x16xf32> to vector<8xf32>
    %98 = vector.shape_cast %97 : vector<8xf32> to vector<8x1xf32>
    %99 = tpu.reciprocal %98 {approx = true} : vector<8x1xf32> -> vector<8x1xf32>
    %100 = arith.truncf %96 : vector<8x16xf32> to vector<8x16xbf16>
    %cst_34 = arith.constant dense<0.000000e+00> : vector<8x32xf32>
    %101 = tpu.matmul %100, %88, %cst_34 {dimension_numbers = #tpu.dot_dimension_numbers<[1], [0], [0], [1], [0, 0, 1, 1], [], []>} : vector<8x16xbf16>, vector<16x32xbf16>, vector<8x32xf32> -> vector<8x32xf32>
    %102 = vector.broadcast %99 : vector<8x1xf32> to vector<8x32xf32>
    %103 = arith.mulf %101, %102 : vector<8x32xf32>
    %104 = arith.truncf %103 : vector<8x32xf32> to vector<8x32xbf16>
    %c0_35 = arith.constant 0 : index
    %c96 = arith.constant 96 : index
    %105 = vector.load %arg23[%c0_35, %c96] : memref<8x128xbf16, #tpu.memory_space<vmem>>, vector<8x32xbf16>
    tpu.vector_store %arg23[%c0_35, %c96], %104 {strides = array<i32>} : memref<8x128xbf16, #tpu.memory_space<vmem>>, vector<8x32xbf16>,
    %c0_36 = arith.constant 0 : index
    %c0_37 = arith.constant 0 : index
    %106 = vector.load %arg23[%c0_36, %c0_37] : memref<8x128xbf16, #tpu.memory_space<vmem>>, vector<8x128xbf16>
    %c0_38 = arith.constant 0 : index
    %c0_39 = arith.constant 0 : index
    %107 = vector.load %arg10[%c0_38, %c0_39] : memref<128x128xbf16, #tpu.memory_space<vmem>>, vector<128x128xbf16>
    %cst_40 = arith.constant dense<0.000000e+00> : vector<8x128xf32>
    %108 = tpu.matmul %106, %107, %cst_40 {dimension_numbers = #tpu.dot_dimension_numbers<[1], [0], [0], [1], [0, 0, 1, 1], [], []>} : vector<8x128xbf16>, vector<128x128xbf16>, vector<8x128xf32> -> vector<8x128xf32>
    %c0_41 = arith.constant 0 : index
    %c0_42 = arith.constant 0 : index
    %109 = vector.load %arg11[%c0_41, %c0_42] : memref<1x128xf32, #tpu.memory_space<vmem>>, vector<1x128xf32>
    %110 = vector.broadcast %109 : vector<1x128xf32> to vector<8x128xf32>
    %111 = arith.addf %108, %110 : vector<8x128xf32>
    %112 = arith.addf %7, %111 : vector<8x128xf32>
    %c0_43 = arith.constant 0 : index
    %c0_44 = arith.constant 0 : index
    %113 = vector.load %arg12[%c0_43, %c0_44] : memref<1x128xf32, #tpu.memory_space<vmem>>, vector<1x128xf32>
    %c0_45 = arith.constant 0 : index
    %c0_46 = arith.constant 0 : index
    %114 = vector.load %arg13[%c0_45, %c0_46] : memref<1x128xf32, #tpu.memory_space<vmem>>, vector<1x128xf32>
    %cst_47 = arith.constant dense<0.000000e+00> : vector<8xf32>
    %115 = vector.multi_reduction <add>, %112, %cst_47 [1] : vector<8x128xf32> to vector<8xf32>
    %116 = vector.shape_cast %115 : vector<8xf32> to vector<8x1xf32>
    %cst_48 = arith.constant 1.280000e+02 : f32
    %117 = vector.broadcast %cst_48 : f32 to vector<8x1xf32>
    %118 = arith.divf %116, %117 : vector<8x1xf32>
    %119 = vector.broadcast %118 : vector<8x1xf32> to vector<8x128xf32>
    %120 = arith.subf %112, %119 : vector<8x128xf32>
    %121 = arith.mulf %120, %120 : vector<8x128xf32>
    %cst_49 = arith.constant dense<0.000000e+00> : vector<8xf32>
    %122 = vector.multi_reduction <add>, %121, %cst_49 [1] : vector<8x128xf32> to vector<8xf32>
    %123 = vector.shape_cast %122 : vector<8xf32> to vector<8x1xf32>
    %cst_50 = arith.constant 1.280000e+02 : f32
    %124 = vector.broadcast %cst_50 : f32 to vector<8x1xf32>
    %125 = arith.divf %123, %124 : vector<8x1xf32>
    %126 = vector.broadcast %118 : vector<8x1xf32> to vector<8x128xf32>
    %127 = arith.subf %112, %126 : vector<8x128xf32>
    %cst_51 = arith.constant 9.99999974E-6 : f32
    %128 = vector.broadcast %cst_51 : f32 to vector<8x1xf32>
    %129 = arith.addf %125, %128 : vector<8x1xf32>
    %130 = math.rsqrt %129 : vector<8x1xf32>
    %131 = vector.broadcast %130 : vector<8x1xf32> to vector<8x128xf32>
    %132 = arith.mulf %127, %131 : vector<8x128xf32>
    %133 = vector.broadcast %113 : vector<1x128xf32> to vector<8x128xf32>
    %134 = arith.mulf %132, %133 : vector<8x128xf32>
    %135 = vector.broadcast %114 : vector<1x128xf32> to vector<8x128xf32>
    %136 = arith.addf %134, %135 : vector<8x128xf32>
    %137 = arith.truncf %136 : vector<8x128xf32> to vector<8x128xbf16>
    %c0_52 = arith.constant 0 : index
    %c0_53 = arith.constant 0 : index
    %138 = vector.load %arg14[%c0_52, %c0_53] : memref<128x256xbf16, #tpu.memory_space<vmem>>, vector<128x256xbf16>
    %cst_54 = arith.constant dense<0.000000e+00> : vector<8x256xf32>
    %139 = tpu.matmul %137, %138, %cst_54 {dimension_numbers = #tpu.dot_dimension_numbers<[1], [0], [0], [1], [0, 0, 1, 1], [], []>} : vector<8x128xbf16>, vector<128x256xbf16>, vector<8x256xf32> -> vector<8x256xf32>
    %c0_55 = arith.constant 0 : index
    %c0_56 = arith.constant 0 : index
    %140 = vector.load %arg15[%c0_55, %c0_56] : memref<1x256xf32, #tpu.memory_space<vmem>>, vector<1x256xf32>
    %141 = vector.broadcast %140 : vector<1x256xf32> to vector<8x256xf32>
    %142 = arith.addf %139, %141 : vector<8x256xf32>
    %cst_57 = arith.constant 0.000000e+00 : f32
    %143 = vector.broadcast %cst_57 : f32 to vector<8x256xf32>
    %144 = arith.cmpf ogt, %142, %143 : vector<8x256xf32>
    %cst_58 = arith.constant 2.000000e-01 : f32
    %145 = vector.broadcast %cst_58 : f32 to vector<8x256xf32>
    %146 = arith.mulf %145, %142 : vector<8x256xf32>
    %147 = arith.select %144, %142, %146 : vector<8x256xi1>, vector<8x256xf32>
    %148 = arith.truncf %147 : vector<8x256xf32> to vector<8x256xbf16>
    %c0_59 = arith.constant 0 : index
    %c0_60 = arith.constant 0 : index
    %149 = vector.load %arg16[%c0_59, %c0_60] : memref<256x128xbf16, #tpu.memory_space<vmem>>, vector<256x128xbf16>
    %cst_61 = arith.constant dense<0.000000e+00> : vector<8x128xf32>
    %150 = tpu.matmul %148, %149, %cst_61 {dimension_numbers = #tpu.dot_dimension_numbers<[1], [0], [0], [1], [0, 0, 1, 1], [], []>} : vector<8x256xbf16>, vector<256x128xbf16>, vector<8x128xf32> -> vector<8x128xf32>
    %c0_62 = arith.constant 0 : index
    %c0_63 = arith.constant 0 : index
    %151 = vector.load %arg17[%c0_62, %c0_63] : memref<1x128xf32, #tpu.memory_space<vmem>>, vector<1x128xf32>
    %152 = vector.broadcast %151 : vector<1x128xf32> to vector<8x128xf32>
    %153 = arith.addf %150, %152 : vector<8x128xf32>
    %154 = arith.addf %136, %153 : vector<8x128xf32>
    %c0_64 = arith.constant 0 : index
    %c0_65 = arith.constant 0 : index
    %155 = vector.load %arg18[%c0_64, %c0_65] : memref<1x128xf32, #tpu.memory_space<vmem>>, vector<1x128xf32>
    %c0_66 = arith.constant 0 : index
    %c0_67 = arith.constant 0 : index
    %156 = vector.load %arg19[%c0_66, %c0_67] : memref<1x128xf32, #tpu.memory_space<vmem>>, vector<1x128xf32>
    %cst_68 = arith.constant dense<0.000000e+00> : vector<8xf32>
    %157 = vector.multi_reduction <add>, %154, %cst_68 [1] : vector<8x128xf32> to vector<8xf32>
    %158 = vector.shape_cast %157 : vector<8xf32> to vector<8x1xf32>
    %cst_69 = arith.constant 1.280000e+02 : f32
    %159 = vector.broadcast %cst_69 : f32 to vector<8x1xf32>
    %160 = arith.divf %158, %159 : vector<8x1xf32>
    %161 = vector.broadcast %160 : vector<8x1xf32> to vector<8x128xf32>
    %162 = arith.subf %154, %161 : vector<8x128xf32>
    %163 = arith.mulf %162, %162 : vector<8x128xf32>
    %cst_70 = arith.constant dense<0.000000e+00> : vector<8xf32>
    %164 = vector.multi_reduction <add>, %163, %cst_70 [1] : vector<8x128xf32> to vector<8xf32>
    %165 = vector.shape_cast %164 : vector<8xf32> to vector<8x1xf32>
    %cst_71 = arith.constant 1.280000e+02 : f32
    %166 = vector.broadcast %cst_71 : f32 to vector<8x1xf32>
    %167 = arith.divf %165, %166 : vector<8x1xf32>
    %168 = vector.broadcast %160 : vector<8x1xf32> to vector<8x128xf32>
    %169 = arith.subf %154, %168 : vector<8x128xf32>
    %cst_72 = arith.constant 9.99999974E-6 : f32
    %170 = vector.broadcast %cst_72 : f32 to vector<8x1xf32>
    %171 = arith.addf %167, %170 : vector<8x1xf32>
    %172 = math.rsqrt %171 : vector<8x1xf32>
    %173 = vector.broadcast %172 : vector<8x1xf32> to vector<8x128xf32>
    %174 = arith.mulf %169, %173 : vector<8x128xf32>
    %175 = vector.broadcast %155 : vector<1x128xf32> to vector<8x128xf32>
    %176 = arith.mulf %174, %175 : vector<8x128xf32>
    %177 = vector.broadcast %156 : vector<1x128xf32> to vector<8x128xf32>
    %178 = arith.addf %176, %177 : vector<8x128xf32>
    %c0_73 = arith.constant 0 : index
    %c0_74 = arith.constant 0 : index
    %c0_75 = arith.constant 0 : index
    %179 = vector.load %arg20[%c0_73, %c0_74, %c0_75] : memref<1x8x128xf32, #tpu.memory_space<vmem>>, vector<1x8x128xf32>
    %180 = vector.shape_cast %179 : vector<1x8x128xf32> to vector<8x128xf32>
    %181 = vector.shape_cast %178 : vector<8x128xf32> to vector<1x8x128xf32>
    tpu.vector_store %arg20[%c0_73, %c0_74, %c0_75], %181 {strides = array<i32>} : memref<1x8x128xf32, #tpu.memory_space<vmem>>, vector<1x8x128xf32>,
    return
  }
  func.func @transform_0(%arg0: i32, %arg1: i32) -> (i32, i32, i32) {
    %c0_i32 = arith.constant 0 : i32
    %c0_i32_0 = arith.constant 0 : i32
    %c0_i32_1 = arith.constant 0 : i32
    return %arg0, %c0_i32, %c0_i32_0 : i32, i32, i32
  }
  func.func @transform_1(%arg0: i32, %arg1: i32) -> (i32, i32, i32) {
    %c0_i32 = arith.constant 0 : i32
    %c0_i32_0 = arith.constant 0 : i32
    %c0_i32_1 = arith.constant 0 : i32
    return %arg0, %c0_i32, %c0_i32_0 : i32, i32, i32
  }
  func.func @transform_2(%arg0: i32, %arg1: i32) -> (i32, i32) {
    %c0_i32 = arith.constant 0 : i32
    %c0_i32_0 = arith.constant 0 : i32
    %c0_i32_1 = arith.constant 0 : i32
    return %c0_i32, %c0_i32_0 : i32, i32
  }
  func.func @transform_3(%arg0: i32, %arg1: i32) -> (i32, i32) {
    %c0_i32 = arith.constant 0 : i32
    %c0_i32_0 = arith.constant 0 : i32
    %c0_i32_1 = arith.constant 0 : i32
    return %c0_i32, %c0_i32_0 : i32, i32
  }
  func.func @transform_4(%arg0: i32, %arg1: i32) -> (i32, i32) {
    %c0_i32 = arith.constant 0 : i32
    %c0_i32_0 = arith.constant 0 : i32
    %c0_i32_1 = arith.constant 0 : i32
    return %c0_i32, %c0_i32_0 : i32, i32
  }
  func.func @transform_5(%arg0: i32, %arg1: i32) -> (i32, i32) {
    %c0_i32 = arith.constant 0 : i32
    %c0_i32_0 = arith.constant 0 : i32
    %c0_i32_1 = arith.constant 0 : i32
    return %c0_i32, %c0_i32_0 : i32, i32
  }
  func.func @transform_6(%arg0: i32, %arg1: i32) -> (i32, i32) {
    %c0_i32 = arith.constant 0 : i32
    %c0_i32_0 = arith.constant 0 : i32
    %c0_i32_1 = arith.constant 0 : i32
    return %c0_i32, %c0_i32_0 : i32, i32
  }
  func.func @transform_7(%arg0: i32, %arg1: i32) -> (i32, i32) {
    %c0_i32 = arith.constant 0 : i32
    %c0_i32_0 = arith.constant 0 : i32
    %c0_i32_1 = arith.constant 0 : i32
    return %c0_i32, %c0_i32_0 : i32, i32
  }
  func.func @transform_8(%arg0: i32, %arg1: i32) -> (i32, i32) {
    %c0_i32 = arith.constant 0 : i32
    %c0_i32_0 = arith.constant 0 : i32
    %c0_i32_1 = arith.constant 0 : i32
    return %c0_i32, %c0_i32_0 : i32, i32
  }
  func.func @transform_9(%arg0: i32, %arg1: i32) -> (i32, i32) {
    %c0_i32 = arith.constant 0 : i32
    %c0_i32_0 = arith.constant 0 : i32
    %c0_i32_1 = arith.constant 0 : i32
    return %c0_i32, %c0_i32_0 : i32, i32
  }
  func.func @transform_10(%arg0: i32, %arg1: i32) -> (i32, i32) {
    %c0_i32 = arith.constant 0 : i32
    %c0_i32_0 = arith.constant 0 : i32
    %c0_i32_1 = arith.constant 0 : i32
    return %c0_i32, %c0_i32_0 : i32, i32
  }
  func.func @transform_11(%arg0: i32, %arg1: i32) -> (i32, i32) {
    %c0_i32 = arith.constant 0 : i32
    %c0_i32_0 = arith.constant 0 : i32
    %c0_i32_1 = arith.constant 0 : i32
    return %c0_i32, %c0_i32_0 : i32, i32
  }
  func.func @transform_12(%arg0: i32, %arg1: i32) -> (i32, i32) {
    %c0_i32 = arith.constant 0 : i32
    %c0_i32_0 = arith.constant 0 : i32
    %c0_i32_1 = arith.constant 0 : i32
    return %c0_i32, %c0_i32_0 : i32, i32
  }
  func.func @transform_13(%arg0: i32, %arg1: i32) -> (i32, i32) {
    %c0_i32 = arith.constant 0 : i32
    %c0_i32_0 = arith.constant 0 : i32
    %c0_i32_1 = arith.constant 0 : i32
    return %c0_i32, %c0_i32_0 : i32, i32
  }
  func.func @transform_14(%arg0: i32, %arg1: i32) -> (i32, i32) {
    %c0_i32 = arith.constant 0 : i32
    %c0_i32_0 = arith.constant 0 : i32
    %c0_i32_1 = arith.constant 0 : i32
    return %c0_i32, %c0_i32_0 : i32, i32
  }
  func.func @transform_15(%arg0: i32, %arg1: i32) -> (i32, i32) {
    %c0_i32 = arith.constant 0 : i32
    %c0_i32_0 = arith.constant 0 : i32
    %c0_i32_1 = arith.constant 0 : i32
    return %c0_i32, %c0_i32_0 : i32, i32
  }
  func.func @transform_16(%arg0: i32, %arg1: i32) -> (i32, i32) {
    %c0_i32 = arith.constant 0 : i32
    %c0_i32_0 = arith.constant 0 : i32
    %c0_i32_1 = arith.constant 0 : i32
    return %c0_i32, %c0_i32_0 : i32, i32
  }
  func.func @transform_17(%arg0: i32, %arg1: i32) -> (i32, i32) {
    %c0_i32 = arith.constant 0 : i32
    %c0_i32_0 = arith.constant 0 : i32
    %c0_i32_1 = arith.constant 0 : i32
    return %c0_i32, %c0_i32_0 : i32, i32
  }
  func.func @transform_18(%arg0: i32, %arg1: i32) -> (i32, i32, i32) {
    %c0_i32 = arith.constant 0 : i32
    %c0_i32_0 = arith.constant 0 : i32
    return %arg0, %arg1, %c0_i32 : i32, i32, i32
  }
}

</mosaic_0001>

<bundles_post_ra>
// kernel: tpu_custom_call.1
= control target key start
LH: loop header
LB: loop body
LE: loop exit
PB: predicated region body
PF: predicated region fallthrough
CT: control target
= control target key end

     0   :  { %s3840_s0 = inlined_call_operand.hbm [shape: f32[2,16,128], index: 0, kind: input, shape index: {}]   ;;  %s3841_s1 = inlined_call_operand.hbm [shape: f32[2,1,16], index: 1, kind: input, shape index: {}]   ;;  %s3842_s2 = inlined_call_operand.hbm [shape: bf16[128,128], index: 2, kind: input, shape index: {}]   ;;  %s3843_s3 = inlined_call_operand.vmem [shape: f32[1,128], index: 3, kind: input, shape index: {}]   ;;  %s3844_s4 = inlined_call_operand.hbm [shape: bf16[128,128], index: 4, kind: input, shape index: {}]   ;;  %s3845_s5 = inlined_call_operand.vmem [shape: f32[1,128], index: 5, kind: input, shape index: {}]   ;;  %s3846_s6 = inlined_call_operand.hbm [shape: bf16[128,128], index: 6, kind: input, shape index: {}]   ;;  %s3847_s7 = inlined_call_operand.vmem [shape: f32[1,128], index: 7, kind: input, shape index: {}]   ;;  %s3848_s8 = inlined_call_operand.hbm [shape: bf16[128,128], index: 8, kind: input, shape index: {}]   ;;  %s3849_s9 = inlined_call_operand.vmem [shape: f32[1,128], index: 9, kind: input, shape index: {}]   ;;  %s3850_s10 = inlined_call_operand.vmem [shape: f32[1,128], index: 10, kind: input, shape index: {}]   ;;  %s3851_s11 = inlined_call_operand.vmem [shape: f32[1,128], index: 11, kind: input, shape index: {}]   ;;  %s3852_s12 = inlined_call_operand.hbm [shape: bf16[128,256], index: 12, kind: input, shape index: {}]   ;;  %s3853_s13 = inlined_call_operand.vmem [shape: f32[1,256], index: 13, kind: input, shape index: {}]   ;;  %s3854_s14 = inlined_call_operand.hbm [shape: bf16[256,128], index: 14, kind: input, shape index: {}]   ;;  %s3855_s15 = inlined_call_operand.vmem [shape: f32[1,128], index: 15, kind: input, shape index: {}]   ;;  %s3856_s16 = inlined_call_operand.vmem [shape: f32[1,128], index: 16, kind: input, shape index: {}]   ;;  %s3857_s17 = inlined_call_operand.vmem [shape: f32[1,128], index: 17, kind: input, shape index: {}]   ;;  %s3858_s18 = inlined_call_operand.hbm [shape: f32[2,16,128], index: 18, kind: output, shape index: {}]  }
   0x1   :  { %3870 = sst [smem:[#allocation37_spill]] %s3840_s0 }
   0x2   :  { %3871 = sst [smem:[#allocation38_spill]] %s3841_s1 }
   0x3   :  { %3872 = sst [smem:[#allocation39_spill]] %s3842_s2 }
   0x4   :  { %3873 = sst [smem:[#allocation40_spill]] %s3843_s3 }
   0x5   :  { %3874 = sst [smem:[#allocation41_spill]] %s3844_s4 }
   0x6   :  { %3875 = sst [smem:[#allocation42_spill]] %s3846_s6 }
   0x7   :  { %3876 = sst [smem:[#allocation43_spill]] %s3848_s8 }
   0x8   :  { %3877 = sst [smem:[#allocation44_spill]] %s3849_s9 }
   0x9   :  { %3878 = sst [smem:[#allocation45_spill]] %s3850_s10 }
   0xa   :  { %3879 = sst [smem:[#allocation46_spill]] %s3851_s11 }
   0xb   :  { %3880 = sst [smem:[#allocation47_spill]] %s3852_s12 }
   0xc   :  { %3881 = sst [smem:[#allocation48_spill]] %s3853_s13 }
   0xd   :  { %3882 = sst [smem:[#allocation49_spill]] %s3854_s14 }
   0xe   :  { %3883 = sst [smem:[#allocation50_spill]] %s3855_s15 }
   0xf   :  { %3884 = sst [smem:[#allocation51_spill]] %s3856_s16 }
  0x10   :  { %3885 = sst [smem:[#allocation52_spill]] %s3857_s17 }
  0x11   :  { %3886 = sst [smem:[#allocation53_spill]] %s3858_s18 }
  0x12   :  { %23 = vsyncpa [#allocation6], 0 }
  0x13   :  { %25 = vsyncpa [#allocation6 + $0x1], 0 }
  0x14   :  { %26 = vsyncpa [#allocation9], 0 }
  0x15   :  { %28 = vsyncpa [#allocation9 + $0x1], 0 }
  0x16   :  { %29 = vsyncpa [#allocation12], 0 }
  0x17   :  { %30 = vsyncpa [#allocation15], 0 }
  0x18   :  { %31 = vsyncpa [#allocation18], 0 }
  0x19   :  { %32 = vsyncpa [#allocation7], 0 }
  0x1a   :  { %34 = vsyncpa [#allocation7 + $0x1], 0  ;;  %s3344_s27 = smov 0   ;;  %s3346_s28 = smov 0  }
  0x1b   :  { %s3348_s29 = smov 0   ;;  %s3350_s30 = smov 0  }
  0x1c   :  { %s3352_s0 = smov 0   ;;  %s3354_s19 = smov 0  }
  0x1d   :  { %s3356_s1 = smov 0   ;;  %s3358_s20 = smov 0  }
  0x1e   :  { %s3360_s21 = smov 0   ;;  %s3362_s22 = smov 0  }
  0x1f   :  { %s3364_s2 = smov 0  }
  0x20 LB: > { %3887 = sst [smem:[#allocation27_spill]] %s3186_s27  ;;  %s3400_s23 = sadd.s32 4294967295, %s3226_s2   ;;  %s3226_s2 = sphi %s3364_s2, %s40_s2   ;;  %s3222_s22 = sphi %s3362_s22, %s3941_s22   ;;  %s3218_s21 = sphi %s3360_s21, %s3934_s21   ;;  %s3214_s20 = sphi %s3358_s20, %s3940_s20   ;;  %s3210_s1 = sphi %s3356_s1, %s3933_s1   ;;  %s3206_s19 = sphi %s3354_s19, %s3932_s19   ;;  %s3202_s0 = sphi %s3352_s0, %s3939_s0   ;;  %s3198_s30 = sphi %s3350_s30, %s3938_s30   ;;  %s3194_s29 = sphi %s3348_s29, %s3930_s29   ;;  %s3190_s28 = sphi %s3346_s28, %s3937_s28   ;;  %s3186_s27 = sphi %s3344_s27, %s3936_s27  }
  0x21   : > { %3888 = sst [smem:[#allocation28_spill]] %s3194_s29  ;;  %p2262_p0 = scmp.ge.s32.totalorder %s3226_s2, 1 }
  0x22   : > { %3889 = sst [smem:[#allocation29_spill]] %s3206_s19  ;;  %p73_p1 = scmp.eq.s32.totalorder %s3400_s23, 0 }
  0x23   : > { %3890 = sst [smem:[#allocation30_spill]] %s3214_s20  ;;  %p473_p3 = scmp.lt.s32.totalorder %s3226_s2, 5 }
  0x24   : > { %3891 = sst [smem:[#allocation31_spill]] %s3218_s21  ;;  %s3228_s25 = smov [#allocation10]  }
  0x25   : > { %p3406_p4 = pnand %p2262_p0, %p473_p3  ;;  %s485_s26 = sshll.u32 %s3228_s25, 4  ;;  %s486_s26 = int_to_ptr.vmem [resolvable:$true] %s485_s26 }
  0x26   : > { %s3229_s17 = smov [#allocation11]   ;;  %s3230_s20 = smov [#allocation14]  }
  0x27   : > { %p2630_p5 = pneg %p3406_p4  ;;  %s501_s16 = sshll.u32 %s3229_s17, 4  ;;  %s3418_s16 = int_to_ptr.vmem [resolvable:$true] %s501_s16 }
  0x28   : > { %s533_s15 = sshll.u32 %s3230_s20, 4  ;;  %s2885_s13 = scalar_lea.vmem %s486_s26, 1024  ;;  %s3420_s15 = int_to_ptr.vmem [resolvable:$true] %s533_s15 }
  0x29   : > { %p3414_p6 = pnand %p2630_p5, %p73_p1  ;;  %p2886_p8 = scmp.ne.s32.totalorder %s486_s26, %s2885_s13 }
  0x2a   : > { %p2893_p11 = scmp.lt.s32.totalorder %s486_s26, %s486_s26  ;;  %p2894_p12 = scmp.lt.s32.totalorder %s2885_s13, %s2885_s13 }
  0x2b   : > { %p3424_p7 = pneg %p3414_p6 }
  0x2c   : > { %p2895_p13 = por %p2894_p12, %p2893_p11 }
  0x2d   : > { %p2888_p9 = pnand %p2886_p8, %p3424_p7 }
  0x2f   : > { %p2889_p10 = pneg %p2888_p9 }
  0x31   : > { %p2896_p0 = pnand %p2895_p13, %p2889_p10 }
  0x33   : > { %2899 = shalt.err (!%p2896_p0)
}
  0x34   : > { %s3860_s17 = smov 64   ;;  %s3232_s20 = smov 4  }
  0x35   : > { %s3895_s9 = sld [smem:[#allocation39_spill]]  ;;  %s2911_s3 = scalar_lea.vmem %s3418_s16, 1024 }
  0x36   : > { %p2912_p3 = scmp.ne.s32.totalorder %s3418_s16, %s2911_s3  ;;  %p2919_p9 = scmp.lt.s32.totalorder %s3418_s16, %s3418_s16 }
  0x37   : > { %p2920_p10 = scmp.lt.s32.totalorder %s2911_s3, %s2911_s3 }
  0x38   : > { %p2914_p5 = pnand %p2912_p3, %p3424_p7 }
  0x39   : > { %p2921_p11 = por %p2920_p10, %p2919_p9 }
  0x3a   : > { %p2915_p8 = pneg %p2914_p5 }
  0x3b   : > { %2633 = dma.hbm_to_vmem [thread:$0]  (!%p3414_p6), %s3895_s9, 1024, %s486_s26, [#allocation9], %s3860_s17, %s3860_s17, %s3232_s20  }
  0x3c   : > { %p2922_p12 = pnand %p2921_p11, %p2915_p8 }
  0x3e   : > { %2925 = shalt.err (!%p2922_p12)
}
  0x3f   : > { %s3896_s4 = sld [smem:[#allocation41_spill]]  ;;  %s2937_s9 = scalar_lea.vmem %s3420_s15, 1024 }
  0x40   : > { %p2938_p13 = scmp.ne.s32.totalorder %s3420_s15, %s2937_s9  ;;  %p2945_p5 = scmp.lt.s32.totalorder %s3420_s15, %s3420_s15 }
  0x41   : > { %p2946_p8 = scmp.lt.s32.totalorder %s2937_s9, %s2937_s9 }
  0x42   : > { %p2940_p0 = pnand %p2938_p13, %p3424_p7 }
  0x43   : > { %p2947_p9 = por %p2946_p8, %p2945_p5 }
  0x44   : > { %p2941_p3 = pneg %p2940_p0 }
  0x45   : > { %2636 = dma.hbm_to_vmem [thread:$0]  (!%p3414_p6), %s3896_s4, 1024, %s3418_s16, [#allocation12], %s3860_s17, %s3860_s17, %s3232_s20  }
  0x46   : > { %p2948_p10 = pnand %p2947_p9, %p2941_p3 }
  0x48   : > { %2951 = shalt.err (!%p2948_p10)
}
  0x49   : > { %s3897_s8 = sld [smem:[#allocation43_spill]]  ;;  %s3233_s16 = smov [#allocation13]  }
  0x4a   : > { %s517_s26 = sshll.u32 %s3233_s16, 4  ;;  %s3234_s13 = smov [#allocation16]   ;;  %s518_s26 = int_to_ptr.vmem [resolvable:$true] %s517_s26 }
  0x4b   : > { %s555_s10 = sshll.u32 %s3234_s13, 4  ;;  %s2963_s9 = scalar_lea.vmem %s518_s26, 1024  ;;  %s556_s10 = int_to_ptr.vmem [resolvable:$true] %s555_s10 }
  0x4c   : > { %p2964_p11 = scmp.ne.s32.totalorder %s518_s26, %s2963_s9  ;;  %p2971_p0 = scmp.lt.s32.totalorder %s518_s26, %s518_s26 }
  0x4d   : > { %p2972_p3 = scmp.lt.s32.totalorder %s2963_s9, %s2963_s9 }
  0x4e   : > { %p2966_p12 = pnand %p2964_p11, %p3424_p7 }
  0x4f   : > { %2642 = dma.hbm_to_vmem [thread:$0]  (!%p3414_p6), %s3897_s8, 1024, %s3420_s15, [#allocation15], %s3860_s17, %s3860_s17, %s3232_s20  }
  0x50   : > { %p2967_p13 = pneg %p2966_p12  ;;  %p2973_p5 = por %p2972_p3, %p2971_p0 }
  0x52   : > { %p2974_p8 = pnand %p2973_p5, %p2967_p13 }
  0x54   : > { %2977 = shalt.err (!%p2974_p8)
}
  0x55   : > { %s3898_s6 = sld [smem:[#allocation42_spill]]  ;;  %s2989_s11 = scalar_lea.vmem %s556_s10, 2048 }
  0x56   : > { %p2990_p9 = scmp.ne.s32.totalorder %s556_s10, %s2989_s11  ;;  %p2997_p12 = scmp.lt.s32.totalorder %s556_s10, %s556_s10 }
  0x57   : > { %p2998_p2 = scmp.lt.s32.totalorder %s2989_s11, %s2989_s11 }
  0x58   : > { %p2992_p10 = pnand %p2990_p9, %p3424_p7 }
  0x59   : > { %p2999_p0 = por %p2998_p2, %p2997_p12 }
  0x5a   : > { %p2993_p11 = pneg %p2992_p10 }
  0x5b   : > { %2639 = dma.hbm_to_vmem [thread:$0]  (!%p3414_p6), %s3898_s6, 1024, %s518_s26, [#allocation12], %s3860_s17, %s3860_s17, %s3232_s20  }
  0x5c   : > { %p3000_p13 = pnand %p2999_p0, %p2993_p11 }
  0x5e   : > { %3003 = shalt.err (!%p3000_p13)
}
  0x5f   : > { %s3861_s16 = smov 128   ;;  %s3862_s13 = smov 8  }
  0x60   : > { %s3899_s12 = sld [smem:[#allocation47_spill]]  ;;  %s3237_s15 = smov [#allocation17]  }
  0x61   : > { %s571_s3 = sshll.u32 %s3237_s15, 4  ;;  %s572_s3 = int_to_ptr.vmem [resolvable:$true] %s571_s3 }
  0x62   : > { %s3015_s17 = scalar_lea.vmem %s572_s3, 2048  ;;  %p3023_p8 = scmp.lt.s32.totalorder %s572_s3, %s572_s3 }
  0x63   : > { %p3016_p3 = scmp.ne.s32.totalorder %s572_s3, %s3015_s17  ;;  %p3024_p9 = scmp.lt.s32.totalorder %s3015_s17, %s3015_s17 }
  0x65   : > { %p3018_p2 = pnand %p3016_p3, %p3424_p7  ;;  %p3025_p10 = por %p3024_p9, %p3023_p8 }
  0x66   : > { %2645 = dma.hbm_to_vmem [thread:$0]  (!%p3414_p6), %s3899_s12, 2048, %s556_s10, [#allocation15], %s3861_s16, %s3861_s16, %s3862_s13  }
  0x67   : > { %p3019_p5 = pneg %p3018_p2 }
  0x69   : > { %p3026_p11 = pnand %p3025_p10, %p3019_p5 }
  0x6b   : > { %3029 = shalt.err (!%p3026_p11)
}
  0x6c   : > { %s3900_s11 = smov 64   ;;  %s3901_s14 = sld [smem:[#allocation49_spill]] }
  0x6d   : > { %s2261_s18 = sadd.s32 4294967294, %s3226_s2   ;;  %s49_s25 = sadd.s32 1, %s3218_s21 }
  0x6e   : > { %s52_s17 = sadd.s32 1, %s3222_s22  ;;  %p50_p7 = scmp.ge.s32.totalorder %s49_s25, 2 }
  0x6f   : > { %s59_s26 = sadd.s32 1, %s3206_s19  ;;  %p66_p12 = scmp.ne.s32.totalorder %s3206_s19, %s3202_s0 }
  0x70   : > { %p67_p0 = scmp.eq.s32.totalorder %s3226_s2, 0  ;;  %s3943_s25 = smov (%p50_p7, %s49_s25), 0 }
  0x71   : > { %3902 = sst [smem:[#allocation32_spill]] %s3943_s25  ;;  %s3945_s17 = smov (!%p50_p7, %s52_s17), %s3222_s22 }
  0x72   : > { %2648 = dma.hbm_to_vmem [thread:$0]  (!%p3414_p6), %s3901_s14, 2048, %s572_s3, [#allocation18], %s3900_s11, %s3900_s11, %s3232_s20  }
  0x73   : > { %p3508_p13 = por %p67_p0, %p66_p12  ;;  %p72_p6 = scmp.ne.s32.totalorder %s3202_s0, %s3198_s30 }
  0x74   : > { %p54_p3 = scmp.ge.s32.totalorder %s3945_s17, 2  ;;  %s445_s15 = ssub.s32 %s3218_s21, %s3943_s25 }
  0x75   : > { %p3518_p2 = por %p73_p1, %p72_p6  ;;  %s449_s11 = sadd.s32 1, %s3194_s29 }
  0x76   : > { %s3947_s17 = smov (%p54_p3, %s3945_s17), 0  ;;  %p459_p5 = scmp.ne.s32.totalorder %s3194_s29, %s3190_s28 }
  0x77   : > { %3905 = sst [smem:[#allocation33_spill]] %s3947_s17  ;;  %p465_p8 = scmp.ne.s32.totalorder %s3190_s28, %s3186_s27 }
  0x78   : > { %s56_s9 = ssub.s32 %s3222_s22, %s3947_s17  ;;  %p466_p9 = scmp.eq.s32.totalorder %s2261_s18, 3 }
  0x79   : > { %p57_p10 = scmp.eq.s32.totalorder %s56_s9, 0  ;;  %s446_s30 = sor.u32 %s445_s15, %s56_s9 }
  0x7a   : > { %p447_p11 = scmp.eq.s32.totalorder %s446_s30, 0  ;;  %p3906_p7 = scmp.eq.s32.totalorder %s3400_s23, 3 }
  0x7b   : > { %s3538_s16 = scalar_select %p57_p10, %s3206_s19, %s59_s26  }
  0x7c   : > { %p3533_p12 = por %p3906_p7, %p459_p5  ;;  %p3543_p0 = por %p466_p9, %p465_p8 }
  0x7d   : > { %3908 = sst [smem:[#allocation34_spill]] %s3538_s16  ;;  %p2666_p6 = scmp.lt.s32.totalorder %s3226_s2, 4 }
  0x7e   : > { %s3541_s13 = scalar_select %p447_p11, %s3194_s29, %s449_s11  }
  0x7f   : > { %s3910_s4 = scalar_select %p3543_p0, 1, 0 }
  0x80   : > { %3909 = sst [smem:[#allocation35_spill]] %s3541_s13  ;;  %s3549_s6 = sand.u32 1, %s3206_s19  }
  0x81   : > { %3911 = sst [smem:[#allocation36_spill]] %s3910_s4  ;;  %s2380_s18 = sshll.u32 %s3222_s22, 8 }
  0x82   : > { %s2270_s15 = sshll.u32 %s3549_s6, 4  ;;  %s3912_s8 = sld [smem:[#allocation37_spill]] }
  0x83   : > { %s598_s14 = scalar_lea.vmem [#allocation5], %s2270_s15  ;;  %p3558_p3 = pnand %p2666_p6, %p3508_p13 }
  0x84   : > { %s605_s26 = sshll.u32 %s598_s14, 4  ;;  %s615_s17 = sand.u32 1, %s3226_s2   ;;  %s606_s26 = int_to_ptr.vmem [resolvable:$true] %s605_s26 }
  0x85   : > { %s595_s25 = scalar_lea.sflag [#allocation6], %s3549_s6  ;;  %p3032_p5 = pneg %p3558_p3 }
  0x86   : > { %s3043_s21 = scalar_lea.vmem %s606_s26, 256 }
  0x87   : > { %p3044_p8 = scmp.ne.s32.totalorder %s606_s26, %s3043_s21 }
  0x88   : > { %s604_s12 = scalar_lea.hbm %s3912_s8, %s2380_s18  ;;  %s3238_s8 = smov [#allocation5]  }
  0x89   : > { %p3046_p9 = pnand %p3044_p8, %p3032_p5  ;;  %s3048_s14 = sshll.u32 %s3238_s8, 4  ;;  %s3049_s14 = int_to_ptr.vmem [resolvable:$false] %s3048_s14 }
  0x8a   : > { %s3050_s20 = scalar_lea.vmem %s3049_s14, 512  ;;  %p3051_p13 = scmp.lt.s32.totalorder %s606_s26, %s3049_s14 }
  0x8b   : > { %p3047_p10 = pneg %p3046_p9  ;;  %p3052_p11 = scmp.lt.s32.totalorder %s3050_s20, %s3043_s21 }
  0x8d   : > { %p3053_p7 = por %p3052_p11, %p3051_p13 }
  0x8f   : > { %p3054_p6 = pnand %p3053_p7, %p3047_p10 }
  0x91   : > { %3057 = shalt.err (!%p3054_p6)
}
  0x92   : > { %s3914_s18 = smov 8   ;;  %s3915_s15 = smov 128  }
  0x93   : > { %2652 = dma.hbm_to_vmem [thread:$0]  (!%p3558_p3), %s604_s12, 256, %s606_s26, %s595_s25, %s3915_s15, %s3915_s15, %s3914_s18  }
  0x94   : > { %s2273_s9 = sshll.u32 %s3222_s22, 4  ;;  %s3916_s8 = sld [smem:[#allocation38_spill]] }
  0x95   : > { %s618_s13 = scalar_lea.vmem [#allocation8], %s3549_s6  ;;  %s616_s21 = scalar_lea.sflag [#allocation9], %s615_s17 }
  0x96   : > { %s625_s14 = sshll.u32 %s618_s13, 4  ;;  %s3239_s29 = smov [#allocation8]   ;;  %s626_s14 = int_to_ptr.vmem [resolvable:$true] %s625_s14 }
  0x97   : > { %s3071_s20 = scalar_lea.vmem %s626_s14, 16  ;;  %s3076_s4 = sshll.u32 %s3239_s29, 4  ;;  %s3077_s4 = int_to_ptr.vmem [resolvable:$false] %s3076_s4 }
  0x98   : > { %p3072_p8 = scmp.ne.s32.totalorder %s626_s14, %s3071_s20  ;;  %s3078_s27 = scalar_lea.vmem %s3077_s4, 32 }
  0x99   : > { %p3079_p13 = scmp.lt.s32.totalorder %s626_s14, %s3077_s4  ;;  %p3080_p11 = scmp.lt.s32.totalorder %s3078_s27, %s3071_s20 }
  0x9a   : > { %s623_s19 = scalar_lea.hbm %s3916_s8, %s2273_s9  ;;  %p3074_p9 = pnand %p3072_p8, %p3032_p5 }
  0x9b   : > { %p3081_p7 = por %p3080_p11, %p3079_p13 }
  0x9c   : > { %p3075_p10 = pneg %p3074_p9 }
  0x9e   : > { %p3082_p6 = pnand %p3081_p7, %p3075_p10 }
  0xa0   : > { %3085 = shalt.err (!%p3082_p6)
}
  0xa1   : > { %2655 = dma.hbm_to_vmem [thread:$0]  (!%p3558_p3), %s623_s19, 16, %s626_s14, %s616_s21  }
  0xa2   : > { %634 = sbr.rel (%p3406_p4) target bundleno = 3642 (0xe3a), region = 92  ;;  %s3587_s6 = sand.u32 (!%p3406_p4), 1, %s3202_s0  }
  0xa3   : > { %s2275_s12 = sshll.u32 (!%p3406_p4), %s3587_s6, 4  ;;  %s637_s29 = scalar_lea.sflag (!%p3406_p4), [#allocation6], %s3587_s6 }
  0xa4   : > { %s3591_s16 = scalar_lea.vmem (!%p3406_p4), [#allocation5], %s2275_s12 }
  0xa7   : > { %3157 = dma.done.wait (%p3518_p2), %s637_s29, 256  }
  0xa8   : > { %3159 = vsyncadd (%p3518_p2), %s637_s29, 4294967040  ;;  %s645_s4 = sand.u32 1, %s3400_s23   ;;  %s648_s19 = scalar_lea.vmem [#allocation8], %s3587_s6 }
  0xa9   : > { %s646_s27 = scalar_lea.sflag [#allocation9], %s645_s4 }
  0xaa   : > { %3161 = dma.done.wait (%p3518_p2), %s646_s27, 16  }
  0xab   : > { %3163 = vsyncadd (%p3518_p2), %s646_s27, 4294967280 }
  0xac   : > { %3165 = dma.done.wait (%p73_p1), [#allocation9], 1024  }
  0xad   : > { %3167 = vsyncadd (%p73_p1), [#allocation9], 4294966272 }
  0xae   : > { %3169 = dma.done.wait (%p73_p1), [#allocation12], 2048  }
  0xaf   : > { %3171 = vsyncadd (%p73_p1), [#allocation12], 4294965248 }
  0xb0   : > { %3173 = dma.done.wait (%p73_p1), [#allocation15], 3072  }
  0xb1   : > { %3175 = vsyncadd (%p73_p1), [#allocation15], 4294964224 }
  0xb2   : > { %3177 = dma.done.wait (%p73_p1), [#allocation18], 2048  }
  0xb3   : > { %3179 = vsyncadd (%p73_p1), [#allocation18], 4294965248  ;;  %s726_s24 = sand.u32 1, %s3190_s28   ;;  %p2283_p4 = scmp.ne.s32.totalorder %s3210_s1, 0 }
  0xb4   : > { %s3622_s13 = sshll.u32 %s726_s24, 3 }
  0xb5   : > { %s728_s25 = scalar_lea.vmem [#allocation19], %s3622_s13  ;;  %733 = sbr.rel (%p2283_p4) target bundleno = 422 (0x1a6), region = 128 }
  0xba   : > { %v2780_v0 = vld [vmem:[#allocation11 + $0x38] sm:$0xff]   ;;  %v3240_v1 = vmov 0.0   ;;  %v2782_v3 = vld [vmem:[#allocation11 + $0x30] sm:$0xff]   ;;  %vm3241_vm0 = vmmov 0   ;;  %v2784_v5 = vld [vmem:[#allocation11 + $0x28] sm:$0xff]  }
  0xbb   : > { %2472 = vmatprep.subr.bf16.mxu0 %v3240_v1  ;;  %2492 = vmatprep.subr.bf16.mxu1 %v3240_v1  ;;  %v2781_v2 = vld [vmem:[#allocation13 + $0x38] sm:$0xff]   ;;  %v2783_v4 = vld [vmem:[#allocation13 + $0x30] sm:$0xff]   ;;  %v2785_v6 = vld [vmem:[#allocation13 + $0x28] sm:$0xff]  }
  0xbc   : > { %2473 = vmatpush3.bf16.msra.mxu0 %v2780_v0  ;;  %2488 = vmatprep.mubr.msk.bf16.mxu0 %vm3241_vm0, %v3240_v1  ;;  %v2786_v7 = vld [vmem:[#allocation11 + $0x20] sm:$0xff]   ;;  %v2788_v9 = vld [vmem:[#allocation11 + $0x18] sm:$0xff]   ;;  %v2790_v11 = vld [vmem:[#allocation11 + $0x10] sm:$0xff]  }
  0xbd   : > { %2493 = vmatpush3.bf16.msra.mxu1 %v2781_v2  ;;  %2474 = vmatprep.subr.bf16.mxu0 %v3240_v1  ;;  %v2787_v8 = vld [vmem:[#allocation13 + $0x20] sm:$0xff]   ;;  %v2789_v10 = vld [vmem:[#allocation13 + $0x18] sm:$0xff]   ;;  %v2791_v12 = vld [vmem:[#allocation13 + $0x10] sm:$0xff]  }
  0xbe   : > { %2494 = vmatprep.subr.bf16.mxu1 %v3240_v1  ;;  %2508 = vmatprep.mubr.msk.bf16.mxu1 %vm3241_vm0, %v3240_v1  ;;  %v2792_v13 = vld [vmem:[#allocation11 + $0x8] sm:$0xff]   ;;  %v2794_v15 = vld [vmem:[#allocation11] sm:$0xff]  }
  0xbf   : > { %v2793_v14 = vld [vmem:[#allocation13 + $0x8] sm:$0xff]   ;;  %v2795_v18 = vld [vmem:[#allocation13] sm:$0xff]  }
  0xc0   : > { %2475 = vmatpush3.bf16.msra.mxu0 %v2782_v3  ;;  %v734_v16 = vld [vmem:[%s3591_s16] sm:$0xff]  ;;  %v735_v17 = vld [vmem:[%s3591_s16 + $0x8] sm:$0xff] }
  0xc1   : > { %2495 = vmatpush3.bf16.msra.mxu1 %v2783_v4  ;;  %2476 = vmatprep.subr.bf16.mxu0 %v3240_v1  ;;  %v736_v19 = vpack.c.bf16 %v735_v17, %v734_v16  ;;  %v2284_v22 = vld [vmem:[%s3845_s5] ss:$0 sm:$0xff] }
  0xc2   : > { %2496 = vmatprep.subr.bf16.mxu1 %v3240_v1  ;;  %v2293_v24 = vld [vmem:[%s3847_s7] ss:$0 sm:$0xff] }
  0xc4   : > { %2477 = vmatpush3.bf16.msra.mxu0 %v2784_v5 }
  0xc5   : > { %2497 = vmatpush3.bf16.msra.mxu1 %v2785_v6  ;;  %2478 = vmatprep.subr.bf16.mxu0 %v3240_v1 }
  0xc6   : > { %2498 = vmatprep.subr.bf16.mxu1 %v3240_v1 }
  0xc8   : > { %2479 = vmatpush3.bf16.msra.mxu0 %v2786_v7 }
  0xc9   : > { %2499 = vmatpush3.bf16.msra.mxu1 %v2787_v8  ;;  %2480 = vmatprep.subr.bf16.mxu0 %v3240_v1 }
  0xca   : > { %2500 = vmatprep.subr.bf16.mxu1 %v3240_v1 }
  0xcc   : > { %2481 = vmatpush3.bf16.msra.mxu0 %v2788_v9 }
  0xcd   : > { %2501 = vmatpush3.bf16.msra.mxu1 %v2789_v10  ;;  %2482 = vmatprep.subr.bf16.mxu0 %v3240_v1 }
  0xce   : > { %2502 = vmatprep.subr.bf16.mxu1 %v3240_v1 }
  0xd0   : > { %2483 = vmatpush3.bf16.msra.mxu0 %v2790_v11 }
  0xd1   : > { %2503 = vmatpush3.bf16.msra.mxu1 %v2791_v12  ;;  %2484 = vmatprep.subr.bf16.mxu0 %v3240_v1 }
  0xd2   : > { %2504 = vmatprep.subr.bf16.mxu1 %v3240_v1 }
  0xd4   : > { %2485 = vmatpush3.bf16.msra.mxu0 %v2792_v13 }
  0xd5   : > { %2505 = vmatpush3.bf16.msra.mxu1 %v2793_v14  ;;  %2486 = vmatprep.subr.bf16.mxu0 %v3240_v1 }
  0xd6   : > { %2506 = vmatprep.subr.bf16.mxu1 %v3240_v1 }
  0xd8   : > { %2487 = vmatpush3.bf16.msra.mxu0 %v2794_v15 }
  0xd9   : > { %2507 = vmatpush3.bf16.msra.mxu1 %v2795_v18 }
  0xdb   : > { %2489 = vmatmul.mubr.bf16.vlgmr.msra.gmra.mxu0 %v736_v19 }
  0xdc   : > { %2509 = vmatmul.mubr.bf16.vlgmr.msra.gmra.mxu1 %v736_v19 }
 0x19b   : > { %v842_v20 = vpop.f32.mrf.mxu0 }
 0x19c   : > { %v954_v21 = vpop.f32.mrf.mxu1  ;;  %v843_v27 = vadd.f32 %v2284_v22, %v842_v20 }
 0x19d   : > { %v2490_v23 = vpop.f32.mrf.mxu0  ;;  %v955_v30 = vadd.f32 %v2293_v24, %v954_v21 }
 0x19e   : > { %v2510_v25 = vpop.f32.mrf.mxu1 }
 0x19f   : > { %v845_v26 = vpop.f32.mrf.mxu0 }
 0x1a0   : > { %v846_v28 = vadd.f32 %v2284_v22, %v845_v26  ;;  %v957_v29 = vpop.f32.mrf.mxu1 }
 0x1a1   : > { %v958_v31 = vadd.f32 %v2293_v24, %v957_v29  ;;  %v2491_v32 = vpop.f32.mrf.mxu0 }
 0x1a2   : > { %v2391_v33 = vpack.c.bf16 %v846_v28, %v843_v27  ;;  %v2511_v34 = vpop.f32.mrf.mxu1 }
 0x1a3   : > { %v2396_v35 = vpack.c.bf16 %v958_v31, %v955_v30 }
 0x1a4   : > { %2392 = vst [vmem:[#allocation2] sm:$0xff] %v2391_v33  }
 0x1a5   : > { %2397 = vst [vmem:[#allocation3] sm:$0xff] %v2396_v35  }
 0x1a6 PF: > { %v2796_v36 = vld [vmem:[#allocation10 + $0x38] sm:$0xff]   ;;  %v3242_v37 = vmov 0.0   ;;  %v2797_v38 = vld [vmem:[#allocation10 + $0x30] sm:$0xff]   ;;  %vm3243_vm1 = vmmov 0   ;;  %v2798_v39 = vld [vmem:[#allocation10 + $0x28] sm:$0xff]   ;;  %s2306_s11 = sshll.u32 %s3210_s1, 3  ;;  %v1105_v58 = vlaneseq }
 0x1a7   : > { %2512 = vmatprep.subr.bf16.mxu0 %v3242_v37  ;;  %2532 = vmatprep.subr.bf16.mxu1 %v3242_v37  ;;  %v2799_v40 = vld [vmem:[#allocation10 + $0x20] sm:$0xff]   ;;  %v2800_v41 = vld [vmem:[#allocation10 + $0x18] sm:$0xff]   ;;  %v2801_v42 = vld [vmem:[#allocation10 + $0x10] sm:$0xff]   ;;  %s982_s18 = scalar_lea.vmem %s3591_s16, %s2306_s11 [#allocation5]  ;;  %vm1115_vm2 = vcmask 261120   ;;  %s3917_s30 = sld [smem:[#allocation40_spill]]  ;;  %vm1162_vm3 = vcmask 130048  }
 0x1a8   : > { %2513 = vmatpush3.bf16.msra.mxu0 %v2796_v36  ;;  %2528 = vmatprep.mubr.msk.bf16.mxu0 %vm3243_vm1, %v3242_v37  ;;  %v2802_v43 = vld [vmem:[#allocation10 + $0x8] sm:$0xff]   ;;  %v2803_v44 = vld [vmem:[#allocation10] sm:$0xff]   ;;  %s3244_s8 = smov 96   ;;  %v3672_v59 = vshrl.u32 %v1105_v58, 7  ;;  %s3245_s14 = smov 64   ;;  %vm1225_vm4 = vcmask 257024  }
 0x1a9   : > { %2514 = vmatprep.subr.bf16.mxu0 %v3242_v37  ;;  %2534 = vmatprep.mubr.msk.bf16.mxu1 %vm3243_vm1, %v3242_v37  ;;  %v3648_v45 = vld [vmem:[%s982_s18] sm:$0xff]  ;;  %s3246_s21 = smov 32   ;;  %vm1343_vm5 = vcmask 519424   ;;  %vm1460_vm6 = vcmask 781824   ;;  %vm1577_vm7 = vcmask 1044224   ;;  %s3918_s12 = sld [smem:[#allocation44_spill]] }
 0x1aa   : > { %v984_v46 = vpack.c.bf16 %v3648_v45, %v3648_v45  ;;  %v1097_v60 = vld [vmem:[%s648_s19] sm:$0x1]  ;;  %v1107_v62 = vsub.s32 0, %v3672_v59  ;;  %s3919_s4 = sld [smem:[#allocation45_spill]] }
 0x1ab   : > { %v3656_v47 = vld [vmem:[#allocation2] sm:$0xff]   ;;  %v1098_v61 = vmul.f32 -1e+09, %v1097_v60  ;;  %s3920_s23 = sld [smem:[#allocation46_spill]] }
 0x1ac   : > { %2515 = vmatpush3.bf16.msra.mxu0 %v2797_v38  ;;  %v1120_v48 = vsel %vm1115_vm2, %v3656_v47, 0  ;;  %v3668_v57 = vld [vmem:[#allocation3] sm:$0xff]   ;;  %s3921_s26 = sld [smem:[#allocation48_spill]] }
 0x1ad   : > { %2516 = vmatprep.subr.bf16.mxu0 %v3242_v37  ;;  %2533 = vmatpush3.bf16.xpose.msra.mxu1 %v1120_v48  ;;  %v2307_v49 = vld [vmem:[%s3917_s30] ss:$0 sm:$0xff]  ;;  %v3679_v63 = vrot.slane %v1098_v61, %v1107_v62  ;;  %s3922_s15 = sld [smem:[#allocation50_spill]] }
 0x1ae   : > { %2538 = vmatprep.subr.bf16.mxu1 %v3242_v37  ;;  %s3923_s9 = sld [smem:[#allocation30_spill]] }
 0x1af   : > { %s3924_s20 = sld [smem:[#allocation51_spill]] }
 0x1b0   : > { %2517 = vmatpush3.bf16.msra.mxu0 %v2798_v39  ;;  %s3925_s29 = sld [smem:[#allocation52_spill]] }
 0x1b1   : > { %2518 = vmatprep.subr.bf16.mxu0 %v3242_v37 }
 0x1b4   : > { %2519 = vmatpush3.bf16.msra.mxu0 %v2799_v40  ;;  %s2376_s30 = sshll.u32 %s3923_s9, 1 }
 0x1b5   : > { %2520 = vmatprep.subr.bf16.mxu0 %v3242_v37 }
 0x1b8   : > { %2521 = vmatpush3.bf16.msra.mxu0 %v2800_v41 }
 0x1b9   : > { %2522 = vmatprep.subr.bf16.mxu0 %v3242_v37 }
 0x1bc   : > { %2523 = vmatpush3.bf16.msra.mxu0 %v2801_v42 }
 0x1bd   : > { %2524 = vmatprep.subr.bf16.mxu0 %v3242_v37 }
 0x1c0   : > { %2525 = vmatpush3.bf16.msra.mxu0 %v2802_v43 }
 0x1c1   : > { %2526 = vmatprep.subr.bf16.mxu0 %v3242_v37 }
 0x1c4   : > { %2527 = vmatpush3.bf16.msra.mxu0 %v2803_v44 }
 0x1c5   : > { %2580 = vmatprep.subr.bf16.mxu0 %v3242_v37 }
 0x1c7   : > { %2529 = vmatmul.mubr.bf16.vlgmr.msra.gmra.mxu0 %v984_v46 }
 0x1c8   : > { %2596 = vmatprep.mubr.msk.bf16.mxu0 %vm3243_vm1, %v3242_v37 }
 0x287   : > { %v1090_v50 = vpop.f32.mrf.mxu0 }
 0x288   : > { %v1091_v51 = vadd.f32 %v2307_v49, %v1090_v50 }
 0x289   : > { %v2530_v52 = vpop.f32.mrf.mxu0 }
 0x28a   : > { %v1096_v53 = vmul.f32 0.17677669, %v1091_v51 }
 0x28b   : > { %v1093_v54 = vpop.f32.mrf.mxu0 }
 0x28c   : > { %v1103_v55 = vpack.c.bf16 %v1096_v53, %v1096_v53 }
 0x28d   : > { %v2531_v56 = vpop.f32.mrf.mxu0 }
 0x28e   : > { %1228 = vrot.lane.b32.xlu1 %v1103_v55, %s3244_s8  ;;  %2535 = vmatmul.mubr.msk.bf16.vlgmr.msra.gmra.mxu1 %vm1115_vm2, %v1103_v55 }
 0x28f   : > { %2540 = vmatprep.mubr.msk.bf16.mxu1 %vm3243_vm1, %v3242_v37  ;;  %2539 = vmatpush3.bf16.msra.mxu1 %v3668_v57 }
 0x290   : > { %2544 = vmatprep.subr.bf16.mxu1 %v3242_v37 }
 0x300   : > { %v1229_v13 = vpop.permute.xlu1 %1228 }
 0x34e   : > { %v1156_v0 = vpop.f32.mrf.mxu1 }
 0x34f   : > { %v1157_v1 = vadd.f32 %v1156_v0, %v3679_v63 }
 0x350   : > { %v2536_v2 = vpop.f32.mrf.mxu1 }
 0x351   : > { %v1163_v3 = vsel %vm1162_vm3, %v1157_v1, -inf }
 0x352   : > { %1164 = vmax.xlane.f32.xlu0 %v1163_v3  ;;  %v1159_v4 = vpop.f32.mrf.mxu1 }
 0x354   : > { %v2537_v5 = vpop.f32.mrf.mxu1 }
 0x368   : > { %1230 = vrot.lane.b32.xlu0 %v3656_v47, %s3244_s8 }
 0x36c   : > { %1289 = vrot.lane.b32.xlu0 %v3668_v57, %s3244_s8 }
 0x370   : > { %1347 = vrot.lane.b32.xlu0 %v3656_v47, %s3245_s14 }
 0x374   : > { %1345 = vrot.lane.b32.xlu0 %v1103_v55, %s3245_s14 }
 0x3db   : > { %v1165_v6 = vpop.xlane.xlu0 %1164 }
 0x3dc   : > { %v1166_v7 = vsub.f32 %v1157_v1, %v1165_v6 }
 0x3de   : > { %v1167_v8 = vmul.f32 1.442695, %v1166_v7 }
 0x3df   : > { %v1231_v10 = vpop.permute.xlu0 %1230 }
 0x3e0   : > { %2854 = vpow2.f32 %v1167_v8  ;;  %v1236_v11 = vsel %vm1115_vm2, %v1231_v10, 0 }
 0x3e3   : > { %v1290_v14 = vpop.permute.xlu0 %1289 }
 0x3e7   : > { %v1348_v29 = vpop.permute.xlu0 %1347 }
 0x3e8   : > { %v1353_v30 = vsel %vm1115_vm2, %v1348_v29, 0 }
 0x3eb   : > { %v1346_v32 = vpop.permute.xlu0 %1345 }
 0x3ed   : > { %v3690_v9 = vpop.eup %2854 }
 0x3ee   : > { %v1173_v12 = vpack.c.bf16 %v3690_v9, %v3690_v9 }
 0x3f0   : > { %2541 = vmatmul.mubr.msk.bf16.vlgmr.msra.gmra.mxu1 %vm1162_vm3, %v1173_v12 }
 0x3f1   : > { %2545 = vmatpush3.bf16.xpose.msra.mxu1 %v1236_v11  ;;  %2546 = vmatprep.mubr.msk.bf16.mxu1 %vm3243_vm1, %v3242_v37 }
 0x3f2   : > { %2550 = vmatprep.subr.bf16.mxu1 %v3242_v37 }
 0x3f8   : > { %2547 = vmatmul.mubr.msk.bf16.vlgmr.msra.gmra.mxu1 %vm1115_vm2, %v1229_v13 }
 0x3f9   : > { %2551 = vmatpush3.bf16.msra.mxu1 %v1290_v14  ;;  %2552 = vmatprep.mubr.msk.bf16.mxu1 %vm3243_vm1, %v3242_v37 }
 0x3fa   : > { %2556 = vmatprep.subr.bf16.mxu1 %v3242_v37 }
 0x4b0   : > { %v3703_v15 = vpop.f32.mrf.mxu1 }
 0x4b2   : > { %v2542_v16 = vpop.f32.mrf.mxu1 }
 0x4b4   : > { %v1220_v17 = vpop.f32.mrf.mxu1 }
 0x4b6   : > { %v2543_v18 = vpop.f32.mrf.mxu1 }
 0x4b7   : > { %v1169_v18 = vsel %vm1162_vm3, %v3690_v9, 0.0  ;;  %v2809_v9 = vld [vmem:[#allocation14 + $0x20] sm:$0xff]  }
 0x4b8   : > { %v1272_v19 = vpop.f32.mrf.mxu1 }
 0x4b9   : > { %v1273_v20 = vadd.f32 %v1272_v19, %v3679_v63 }
 0x4ba   : > { %v2548_v21 = vpop.f32.mrf.mxu1 }
 0x4bb   : > { %v1278_v22 = vsel %vm1162_vm3, %v1273_v20, -inf }
 0x4bc   : > { %1279 = vmax.xlane.f32.xlu1 %v1278_v22  ;;  %v1275_v23 = vpop.f32.mrf.mxu1  ;;  %v2806_v22 = vld [vmem:[#allocation14 + $0x38] sm:$0xff]  }
 0x4bd   : > { %2581 = vmatpush3.bf16.msra.mxu0 %v2806_v22  ;;  %v2807_v23 = vld [vmem:[#allocation14 + $0x30] sm:$0xff]  }
 0x4be   : > { %v2549_v24 = vpop.f32.mrf.mxu1  ;;  %2582 = vmatprep.subr.bf16.mxu0 %v3242_v37  ;;  %v2848_v22 = vld [vmem:[#allocation17 + $0x50] sm:$0xff]  }
 0x4bf   : > { %v2808_v24 = vld [vmem:[#allocation14 + $0x28] sm:$0xff]  }
 0x4c1   : > { %2583 = vmatpush3.bf16.msra.mxu0 %v2807_v23 }
 0x4c2   : > { %2584 = vmatprep.subr.bf16.mxu0 %v3242_v37 }
 0x4c5   : > { %2585 = vmatpush3.bf16.msra.mxu0 %v2808_v24 }
 0x4c6   : > { %2586 = vmatprep.subr.bf16.mxu0 %v3242_v37 }
 0x4c9   : > { %2587 = vmatpush3.bf16.msra.mxu0 %v2809_v9 }
 0x4ca   : > { %2588 = vmatprep.subr.bf16.mxu0 %v3242_v37 }
 0x4cd   : > { %1406 = vrot.lane.b32.xlu1 %v3668_v57, %s3245_s14 }
 0x4d1   : > { %1464 = vrot.lane.b32.xlu1 %v3656_v47, %s3246_s21 }
 0x4d5   : > { %1462 = vrot.lane.b32.xlu1 %v1103_v55, %s3246_s21 }
 0x545   : > { %v1280_v25 = vpop.xlane.xlu1 %1279 }
 0x546   : > { %v1281_v26 = vsub.f32 %v1273_v20, %v1280_v25  ;;  %v2810_v25 = vld [vmem:[#allocation14 + $0x18] sm:$0xff]  }
 0x547   : > { %2589 = vmatpush3.bf16.msra.mxu0 %v2810_v25 }
 0x548   : > { %v1282_v27 = vmul.f32 1.442695, %v1281_v26  ;;  %v2811_v26 = vld [vmem:[#allocation14 + $0x10] sm:$0xff]   ;;  %2590 = vmatprep.subr.bf16.mxu0 %v3242_v37 }
 0x549   : > { %v1407_v33 = vpop.permute.xlu1 %1406 }
 0x54a   : > { %2856 = vpow2.f32 %v1282_v27 }
 0x54b   : > { %2591 = vmatpush3.bf16.msra.mxu0 %v2811_v26  ;;  %v2338_v26 = vld [vmem:[%s3919_s4] ss:$0 sm:$0xff]  ;;  %s2098_s4 = sshll.u32 %s728_s25, 4  ;;  %s2099_s4 = int_to_ptr.vmem [resolvable:$true] %s2098_s4 }
 0x54c   : > { %2592 = vmatprep.subr.bf16.mxu0 %v3242_v37  ;;  %s3086_s3 = scalar_lea.vmem %s2099_s4, 128 }
 0x54d   : > { %v1465_v51 = vpop.permute.xlu1 %1464  ;;  %p3087_p1 = scmp.ne.s32.totalorder %s2099_s4, %s3086_s3 }
 0x54e   : > { %v1470_v52 = vsel %vm1115_vm2, %v1465_v51, 0 }
 0x54f   : > { %p3088_p2 = pnand %p3087_p1, %p3533_p12 }
 0x551   : > { %v1463_v54 = vpop.permute.xlu1 %1462  ;;  %p3089_p3 = pneg %p3088_p2 }
 0x557   : > { %v2857_v28 = vpop.eup %2856 }
 0x558   : > { %v1288_v31 = vpack.c.bf16 %v2857_v28, %v2857_v28  ;;  %v1284_v46 = vsel %vm1162_vm3, %v2857_v28, 0.0 }
 0x55a   : > { %2553 = vmatmul.mubr.msk.bf16.vlgmr.msra.gmra.mxu1 %vm1162_vm3, %v1288_v31 }
 0x55b   : > { %2557 = vmatpush3.bf16.xpose.msra.mxu1 %v1353_v30  ;;  %2558 = vmatprep.mubr.msk.bf16.mxu1 %vm3243_vm1, %v3242_v37 }
 0x55c   : > { %2562 = vmatprep.subr.bf16.mxu1 %v3242_v37 }
 0x562   : > { %2559 = vmatmul.mubr.msk.bf16.vlgmr.msra.gmra.mxu1 %vm1115_vm2, %v1346_v32 }
 0x563   : > { %2563 = vmatpush3.bf16.msra.mxu1 %v1407_v33  ;;  %2564 = vmatprep.mubr.msk.bf16.mxu1 %vm3243_vm1, %v3242_v37 }
 0x564   : > { %2568 = vmatprep.subr.bf16.mxu1 %v3242_v37 }
 0x61a   : > { %v3721_v34 = vpop.f32.mrf.mxu1 }
 0x61c   : > { %v2554_v35 = vpop.f32.mrf.mxu1 }
 0x61d   : > { %v2813_v35 = vld [vmem:[#allocation14] sm:$0xff]  }
 0x61e   : > { %v1332_v36 = vpop.f32.mrf.mxu1 }
 0x620   : > { %v2555_v38 = vpop.f32.mrf.mxu1 }
 0x622   : > { %v1389_v39 = vpop.f32.mrf.mxu1 }
 0x623   : > { %v1390_v40 = vadd.f32 %v1389_v39, %v3679_v63 }
 0x624   : > { %v2560_v41 = vpop.f32.mrf.mxu1 }
 0x625   : > { %v1395_v42 = vsel %vm1162_vm3, %v1390_v40, -inf }
 0x626   : > { %1396 = vmax.xlane.f32.xlu0 %v1395_v42  ;;  %v1392_v43 = vpop.f32.mrf.mxu1 }
 0x628   : > { %v2561_v44 = vpop.f32.mrf.mxu1 }
 0x63c   : > { %1523 = vrot.lane.b32.xlu0 %v3668_v57, %s3246_s21 }
 0x65b   : > { %1285 = vadd.xlane.f32.xlu0 %v1284_v46  ;;  %v2329_v46 = vld [vmem:[%s3918_s12] ss:$0 sm:$0xff] }
 0x6af   : > { %v1397_v47 = vpop.xlane.xlu0 %1396 }
 0x6b0   : > { %v1398_v48 = vsub.f32 %v1390_v40, %v1397_v47 }
 0x6b2   : > { %v1399_v49 = vmul.f32 1.442695, %v1398_v48 }
 0x6b3   : > { %v1524_v55 = vpop.permute.xlu0 %1523 }
 0x6b4   : > { %2858 = vpow2.f32 %v1399_v49 }
 0x6c1   : > { %v2859_v50 = vpop.eup %2858 }
 0x6c2   : > { %v1405_v53 = vpack.c.bf16 %v2859_v50, %v2859_v50  ;;  %v1401_v5 = vsel %vm1162_vm3, %v2859_v50, 0.0 }
 0x6c4   : > { %2565 = vmatmul.mubr.msk.bf16.vlgmr.msra.gmra.mxu1 %vm1162_vm3, %v1405_v53  ;;  %v2816_v53 = vld [vmem:[#allocation16 + $0x74] ss:$8 sps:$4 sm:$0xff]  }
 0x6c5   : > { %2569 = vmatpush3.bf16.xpose.msra.mxu1 %v1470_v52  ;;  %2570 = vmatprep.mubr.msk.bf16.mxu1 %vm3243_vm1, %v3242_v37  ;;  %v2814_v52 = vld [vmem:[#allocation16 + $0x70] ss:$8 sps:$4 sm:$0xff]  }
 0x6c6   : > { %2574 = vmatprep.subr.bf16.mxu1 %v3242_v37 }
 0x6cc   : > { %2571 = vmatmul.mubr.msk.bf16.vlgmr.msra.gmra.mxu1 %vm1115_vm2, %v1463_v54  ;;  %v2819_v54 = vld [vmem:[#allocation16 + $0x64] ss:$8 sps:$4 sm:$0xff]  }
 0x6cd   : > { %2575 = vmatpush3.bf16.msra.mxu1 %v1524_v55  ;;  %2576 = vmatprep.mubr.msk.bf16.mxu1 %vm3243_vm1, %v3242_v37  ;;  %v2817_v55 = vld [vmem:[#allocation16 + $0x60] ss:$8 sps:$4 sm:$0xff]  }
 0x6ce   : > { %1829 = vmatprep.subr.bf16.mxu1 %v2816_v53 }
 0x6e4   : > { %v1286_v11 = vpop.xlane.xlu0 %1285 }
 0x784   : > { %v1446_v56 = vpop.f32.mrf.mxu1 }
 0x786   : > { %v2566_v57 = vpop.f32.mrf.mxu1 }
 0x788   : > { %v1449_v58 = vpop.f32.mrf.mxu1 }
 0x78a   : > { %v2567_v60 = vpop.f32.mrf.mxu1 }
 0x78c   : > { %v1506_v61 = vpop.f32.mrf.mxu1 }
 0x78d   : > { %v1507_v0 = vadd.f32 %v1506_v61, %v3679_v63  ;;  %v2822_v61 = vld [vmem:[#allocation16 + $0x54] ss:$8 sps:$4 sm:$0xff]  }
 0x78e   : > { %v2572_v1 = vpop.f32.mrf.mxu1 }
 0x78f   : > { %v1512_v2 = vsel %vm1162_vm3, %v1507_v0, -inf  ;;  %v2825_v1 = vld [vmem:[#allocation16 + $0x44] ss:$8 sps:$4 sm:$0xff]  }
 0x790   : > { %1513 = vmax.xlane.f32.xlu1 %v1512_v2  ;;  %v1509_v3 = vpop.f32.mrf.mxu1  ;;  %v2828_v2 = vld [vmem:[#allocation16 + $0x34] ss:$8 sps:$4 sm:$0xff]  }
 0x791   : > { %v2826_v3 = vld [vmem:[#allocation16 + $0x30] ss:$8 sps:$4 sm:$0xff]  }
 0x792   : > { %v2573_v4 = vpop.f32.mrf.mxu1 }
 0x793   : > { %v3247_v4 = vmov 0  }
 0x794   : > { %1402 = vadd.xlane.f32.xlu1 %v1401_v5  ;;  %v2831_v5 = vld [vmem:[#allocation16 + $0x24] ss:$8 sps:$4 sm:$0xff]  }
 0x819   : > { %v1514_v6 = vpop.xlane.xlu1 %1513 }
 0x81a   : > { %v1515_v7 = vsub.f32 %v1507_v0, %v1514_v6  ;;  %v2820_v0 = vld [vmem:[#allocation16 + $0x50] ss:$8 sps:$4 sm:$0xff]   ;;  %v2829_v6 = vld [vmem:[#allocation16 + $0x20] ss:$8 sps:$4 sm:$0xff]  }
 0x81c   : > { %v1516_v8 = vmul.f32 1.442695, %v1515_v7  ;;  %v2834_v7 = vld [vmem:[#allocation16 + $0x14] ss:$8 sps:$4 sm:$0xff]  }
 0x81d   : > { %v1403_v10 = vpop.xlane.xlu1 %1402 }
 0x81e   : > { %2860 = vpow2.f32 %v1516_v8  ;;  %v2832_v8 = vld [vmem:[#allocation16 + $0x10] ss:$8 sps:$4 sm:$0xff]  }
 0x81f   : > { %2862 = vrcp.f32 %v1403_v10  ;;  %v2837_v10 = vld [vmem:[#allocation16 + $0x4] ss:$8 sps:$4 sm:$0xff]  }
 0x820   : > { %2864 = vrcp.f32 %v1286_v11  ;;  %v2835_v11 = vld [vmem:[#allocation16] ss:$8 sps:$4 sm:$0xff]  }
 0x82b   : > { %v2861_v12 = vpop.eup %2860 }
 0x82c   : > { %v2863_v13 = vpop.eup %2862  ;;  %v1518_v63 = vsel %vm1162_vm3, %v2861_v12, 0.0  ;;  %v1522_v14 = vpack.c.bf16 %v2861_v12, %v2861_v12  ;;  %v2838_v12 = vld [vmem:[#allocation17 + $0x78] sm:$0xff]  }
 0x82d   : > { %1519 = vadd.xlane.f32.xlu1 %v1518_v63  ;;  %v1452_v16 = vmul.f32 %v2863_v13, %v1446_v56  ;;  %v2865_v19 = vpop.eup %2864  ;;  %v2839_v13 = vld [vmem:[#allocation17 + $0x38] sm:$0xff]   ;;  %v2840_v63 = vld [vmem:[#allocation17 + $0x70] sm:$0xff]  }
 0x82e   : > { %2577 = vmatmul.mubr.msk.bf16.vlgmr.msra.gmra.mxu1 %vm1162_vm3, %v1522_v14  ;;  %v1335_v20 = vmul.f32 %v2865_v19, %v3721_v34  ;;  %v2812_v34 = vld [vmem:[#allocation14 + $0x8] sm:$0xff]   ;;  %v2841_v14 = vld [vmem:[#allocation17 + $0x30] sm:$0xff]   ;;  %v2845_v19 = vld [vmem:[#allocation17 + $0x20] sm:$0xff]  }
 0x82f   : > { %v2386_v17 = vpack.c.bf16 %v1452_v16, %v1452_v16  ;;  %2593 = vmatpush3.bf16.msra.mxu0 %v2812_v34  ;;  %1830 = vmatpush1.bf16.msra.mxu1 %v2814_v52  ;;  %v2842_v16 = vld [vmem:[#allocation17 + $0x68] sm:$0xff]  }
 0x830   : > { %v2385_v21 = vpack.c.bf16 %v1335_v20, %v1335_v20  ;;  %2594 = vmatprep.subr.bf16.mxu0 %v3242_v37  ;;  %1831 = vmatprep.subr.bf16.mxu1 %v2819_v54  ;;  %v2846_v20 = vld [vmem:[#allocation17 + $0x58] sm:$0xff]   ;;  %v2851_v34 = vld [vmem:[#allocation17 + $0x8] sm:$0xff]  }
 0x831   : > { %1457 = vrot.lane.b32.xlu0 %v2386_v17, %s3245_s14  ;;  %1170 = vadd.xlane.f32.xlu1 %v1169_v18  ;;  %v2843_v17 = vld [vmem:[#allocation17 + $0x28] sm:$0xff]   ;;  %v2844_v18 = vld [vmem:[#allocation17 + $0x60] sm:$0xff]  }
 0x832   : > { %1861 = vmatprep.mubr.bf16.mxu1 %v3247_v4 }
 0x833   : > { %2595 = vmatpush3.bf16.msra.mxu0 %v2813_v35  ;;  %1832 = vmatpush1.bf16.msra.mxu1 %v2817_v55  ;;  %v2852_v35 = vld [vmem:[#allocation17 + $0x40] sm:$0xff]  }
 0x834   : > { %1833 = vmatprep.subr.bf16.mxu1 %v2822_v61  ;;  %2450 = vmatprep.subr.bf16.mxu0 %v2838_v12 }
 0x837   : > { %1834 = vmatpush1.bf16.msra.mxu1 %v2820_v0 }
 0x838   : > { %1835 = vmatprep.subr.bf16.mxu1 %v2825_v1 }
 0x842   : > { %1340 = vrot.lane.b32.xlu1 %v2385_v21, %s3246_s21  ;;  %v2847_v21 = vld [vmem:[#allocation17 + $0x18] sm:$0xff]  }
 0x8a3   : > { %v1458_v33 = vpop.permute.xlu0 %1457 }
 0x8b6   : > { %v1520_v27 = vpop.xlane.xlu1 %1519 }
 0x8ba   : > { %v1171_v28 = vpop.xlane.xlu1 %1170 }
 0x8bb   : > { %2866 = vrcp.f32 %v1171_v28  ;;  %v2339_v28 = vld [vmem:[%s3920_s23] ss:$0 sm:$0xff]  ;;  %s3926_s23 = sld [smem:[#allocation53_spill]] }
 0x8bc   : > { %2868 = vrcp.f32 %v1520_v27 }
 0x8be   : > { %v1341_v32 = vpop.permute.xlu1 %1340 }
 0x8c8   : > { %v2867_v29 = vpop.eup %2866 }
 0x8c9   : > { %v1223_v30 = vmul.f32 %v2867_v29, %v3703_v15  ;;  %v2869_v36 = vpop.eup %2868 }
 0x8cb   : > { %v1224_v31 = vpack.c.bf16 %v1223_v30, %v1223_v30 }
 0x8cd   : > { %1226 = vst.msk [vmem:[#allocation4] sm:$0xf] %vm1225_vm4, %v1224_v31 }
 0x8ce   : > { %1344 = vst.msk [vmem:[#allocation4] sm:$0xf] %vm1343_vm5, %v1341_v32  ;;  %v2849_v32 = vld [vmem:[#allocation17 + $0x10] sm:$0xff]  }
 0x8cf   : > { %1461 = vst.msk [vmem:[#allocation4] sm:$0xf] %vm1460_vm6, %v1458_v33  ;;  %v2850_v33 = vld [vmem:[#allocation17 + $0x48] sm:$0xff]  }
 0x8ee   : > { %v1563_v38 = vpop.f32.mrf.mxu1 }
 0x8ef   : > { %v1569_v39 = vmul.f32 %v2869_v36, %v1563_v38  ;;  %v2853_v36 = vld [vmem:[#allocation17] sm:$0xff]   ;;  %v1737_v38 = vld [vmem:[%s3921_s26] sm:$0x3]  ;;  %s3248_s26 = smov [#allocation19]  }
 0x8f0   : > { %v2578_v15 = vpop.f32.mrf.mxu1  ;;  %s3090_s11 = sshll.u32 %s3248_s26, 4  ;;  %s3091_s11 = int_to_ptr.vmem [resolvable:$false] %s3090_s11 }
 0x8f1   : > { %v2387_v40 = vpack.c.bf16 %v1569_v39, %v1569_v39  ;;  %v1745_v39 = vsub.s32 1, %v3672_v59  ;;  %v1742_v15 = vrot.slane %v1737_v38, %v1107_v62  ;;  %v2356_v59 = vld [vmem:[%s3922_s15] ss:$0 sm:$0xff]  ;;  %s3092_s18 = scalar_lea.vmem %s3091_s11, 256  ;;  %p3093_p5 = scmp.lt.s32.totalorder %s2099_s4, %s3091_s11 }
 0x8f2   : > { %v1566_v41 = vpop.f32.mrf.mxu1  ;;  %p3094_p8 = scmp.lt.s32.totalorder %s3092_s18, %s3086_s3 }
 0x8f3   : > { %1574 = vrot.lane.b32.xlu1 %v2387_v40, %s3244_s8  ;;  %v1746_v40 = vrot.slane %v1737_v38, %v1745_v39  ;;  %s2094_s8 = sadd.s32 %s3210_s1, %s2376_s30  ;;  %s2083_s1 = scalar_lea.sflag [#allocation7], %s726_s24 }
 0x8f4   : > { %v2579_v42 = vpop.f32.mrf.mxu1  ;;  %s2377_s16 = sshll.u32 %s2094_s8, 7  ;;  %p3095_p9 = por %p3094_p8, %p3093_p5 }
 0x8f5   : > { %s2096_s17 = scalar_lea.hbm %s3926_s23, %s2377_s16 }
 0x8f6   : > { %p3096_p10 = pnand %p3095_p9, %p3089_p3 }
 0x965   : > { %v1575_v43 = vpop.permute.xlu1 %1574 }
 0x966   : > { %1578 = vst.msk [vmem:[#allocation4] sm:$0xf] %vm1577_vm7, %v1575_v43 }
 0x96d   : > { %v1579_v44 = vld [vmem:[#allocation4] sm:$0xf] }
 0x96e   : > { %2597 = vmatmul.mubr.bf16.vlgmr.msra.gmra.mxu0 %v1579_v44 }
 0x96f   : > { %2451 = vmatpush3.bf16.msra.mxu0 %v2839_v13 }
 0x970   : > { %2452 = vmatprep.subr.bf16.mxu0 %v2840_v63 }
 0x973   : > { %2453 = vmatpush3.bf16.msra.mxu0 %v2841_v14 }
 0x974   : > { %2454 = vmatprep.subr.bf16.mxu0 %v2842_v16 }
 0x977   : > { %2455 = vmatpush3.bf16.msra.mxu0 %v2843_v17 }
 0x978   : > { %2456 = vmatprep.subr.bf16.mxu0 %v2844_v18 }
 0x97b   : > { %2457 = vmatpush3.bf16.msra.mxu0 %v2845_v19 }
 0x97c   : > { %2458 = vmatprep.subr.bf16.mxu0 %v2846_v20 }
 0x97f   : > { %2459 = vmatpush3.bf16.msra.mxu0 %v2847_v21 }
 0x980   : > { %2460 = vmatprep.subr.bf16.mxu0 %v2848_v22 }
 0x983   : > { %2461 = vmatpush3.bf16.msra.mxu0 %v2849_v32 }
 0x984   : > { %2462 = vmatprep.subr.bf16.mxu0 %v2850_v33 }
 0x987   : > { %2463 = vmatpush3.bf16.msra.mxu0 %v2851_v34 }
 0x988   : > { %2464 = vmatprep.subr.bf16.mxu0 %v2852_v35 }
 0x98b   : > { %2465 = vmatpush3.bf16.msra.mxu0 %v2853_v36 }
 0xa2e   : > { %v1685_v37 = vpop.f32.mrf.mxu0 }
 0xa2f   : > { %v1686_v47 = vadd.f32 %v2329_v46, %v1685_v37 }
 0xa30   : > { %v2598_v48 = vpop.f32.mrf.mxu0 }
 0xa31   : > { %v1691_v49 = vadd.f32 %v1686_v47, %v3648_v45  ;;  %v2823_v45 = vld [vmem:[#allocation16 + $0x40] ss:$8 sps:$4 sm:$0xff]  }
 0xa32   : > { %v1688_v50 = vpop.f32.mrf.mxu0  ;;  %1836 = vmatpush1.bf16.msra.mxu1 %v2823_v45 }
 0xa33   : > { %1694 = vadd.xlane.f32.xlu1 %v1691_v49  ;;  %1837 = vmatprep.subr.bf16.mxu1 %v2828_v2 }
 0xa34   : > { %v2599_v51 = vpop.f32.mrf.mxu0 }
 0xa36   : > { %1838 = vmatpush1.bf16.msra.mxu1 %v2826_v3 }
 0xa37   : > { %1839 = vmatprep.subr.bf16.mxu1 %v2831_v5  ;;  %v2373_v5 = vld [vmem:[%s3924_s20] ss:$0 sm:$0xff] }
 0xa3a   : > { %1840 = vmatpush1.bf16.msra.mxu1 %v2829_v6 }
 0xa3b   : > { %1841 = vmatprep.subr.bf16.mxu1 %v2834_v7  ;;  %v2374_v7 = vld [vmem:[%s3925_s29] ss:$0 sm:$0xff] }
 0xa3e   : > { %1842 = vmatpush1.bf16.msra.mxu1 %v2832_v8 }
 0xa3f   : > { %1843 = vmatprep.subr.bf16.mxu1 %v2837_v10 }
 0xa42   : > { %1844 = vmatpush1.bf16.msra.mxu1 %v2835_v11 }
 0xabc   : > { %v1695_v56 = vpop.xlane.xlu1 %1694 }
 0xabd   : > { %v1697_v57 = vmul.f32 0.0078125, %v1695_v56 }
 0xabf   : > { %v1698_v58 = vsub.f32 %v1691_v49, %v1697_v57 }
 0xac1   : > { %v1699_v60 = vmul.f32 %v1698_v58, %v1698_v58 }
 0xac3   : > { %1700 = vadd.xlane.f32.xlu0 %v1699_v60 }
 0xb4c   : > { %v1701_v23 = vpop.xlane.xlu0 %1700 }
 0xb4d   : > { %v1702_v24 = vmul.f32 0.0078125, %v1701_v23 }
 0xb4f   : > { %v1703_v9 = vadd.f32 1e-05, %v1702_v24 }
 0xb51   : > { %2870 = vrsqrt.f32 %v1703_v9 }
 0xb5e   : > { %v2871_v25 = vpop.eup %2870 }
 0xb5f   : > { %v1705_v27 = vmul.f32 %v2871_v25, %v1698_v58 }
 0xb61   : > { %v1712_v29 = vmul.f32 %v2338_v26, %v1705_v27 }
 0xb63   : > { %v1719_v30 = vadd.f32 %v2339_v28, %v1712_v29 }
 0xb65   : > { %v1720_v31 = vpack.c.bf16 %v1719_v30, %v1719_v30 }
 0xb67   : > { %1862 = vmatmul.mubr.bf16.vlgmr.msra.gmra.mxu1 %v1720_v31 }
 0xc27   : > { %v1863_v41 = vpop.f32.mrf.mxu1 }
 0xc28   : > { %v1864_v42 = vadd.f32 %v1863_v41, %v1742_v15 }
 0xc29   : > { %v1865_v43 = vpop.f32.mrf.mxu1 }
 0xc2a   : > { %vm1870_vm8 = vcmp.gt.f32.partialorder %v1864_v42, 0.0  ;;  %v1872_v44 = vmul.f32 0.2, %v1864_v42  ;;  %v1866_v46 = vadd.f32 %v1865_v43, %v1746_v40 }
 0xc2b   : > { %v1867_v37 = vpop.f32.mrf.mxu1 }
 0xc2c   : > { %vm1871_vm9 = vcmp.gt.f32.partialorder %v1866_v46, 0.0  ;;  %v1873_v47 = vmul.f32 0.2, %v1866_v46  ;;  %v1874_v48 = vsel %vm1870_vm8, %v1864_v42, %v1872_v44 }
 0xc2d   : > { %v1868_v49 = vpop.f32.mrf.mxu1  ;;  %v1876_v52 = vpack.c.bf16 %v1874_v48, %v1874_v48 }
 0xc2e   : > { %v1875_v50 = vsel %vm1871_vm9, %v1866_v46, %v1873_v47 }
 0xc2f   : > { %v1877_v51 = vpack.c.bf16 %v1875_v50, %v1875_v50 }
 0xc31   : > { %2045 = vmatprep.mubr.bf16.mxu0 %v1877_v51 }
 0xc32   : > { %2046 = vmatmul.mubr.bf16.vlgmr.msra.gmra.mxu0 %v1876_v52 }
 0xcf2   : > { %v2466_v53 = vpop.f32.mrf.mxu0 }
 0xcf4   : > { %v2467_v62 = vpop.f32.mrf.mxu0 }
 0xcf5   : > { %v2468_v54 = vadd.f32 %v2467_v62, %v2466_v53 }
 0xcf6   : > { %v2469_v55 = vpop.f32.mrf.mxu0 }
 0xcf7   : > { %v2048_v56 = vadd.f32 %v2468_v54, %v2356_v59 }
 0xcf8   : > { %v2470_v57 = vpop.f32.mrf.mxu0 }
 0xcf9   : > { %v2053_v58 = vadd.f32 %v2048_v56, %v1719_v30 }
 0xcfb   : > { %2056 = vadd.xlane.f32.xlu1 %v2053_v58 }
 0xd84   : > { %v2057_v60 = vpop.xlane.xlu1 %2056 }
 0xd85   : > { %v2058_v61 = vmul.f32 0.0078125, %v2057_v60 }
 0xd87   : > { %v2059_v0 = vsub.f32 %v2053_v58, %v2058_v61 }
 0xd89   : > { %v2060_v45 = vmul.f32 %v2059_v0, %v2059_v0 }
 0xd8b   : > { %2061 = vadd.xlane.f32.xlu1 %v2060_v45 }
 0xe14   : > { %v2062_v1 = vpop.xlane.xlu1 %2061 }
 0xe15   : > { %v2063_v2 = vmul.f32 0.0078125, %v2062_v1 }
 0xe17   : > { %v2064_v3 = vadd.f32 1e-05, %v2063_v2 }
 0xe19   : > { %2872 = vrsqrt.f32 %v2064_v3 }
 0xe26   : > { %v2873_v4 = vpop.eup %2872 }
 0xe27   : > { %v2066_v6 = vmul.f32 %v2873_v4, %v2059_v0 }
 0xe29   : > { %v2073_v8 = vmul.f32 %v2373_v5, %v2066_v6 }
 0xe2b   : > { %v2080_v10 = vadd.f32 %v2374_v7, %v2073_v8 }
 0xe2d   : > { %2081 = vst [vmem:[%s728_s25] sm:$0xff] %v2080_v10 }
 0xe2e   : > { %3099 = shalt.err (!%p3096_p10)
}
 0xe2f   : > { %s3100_s15 = scalar_lea.hbm %s2096_s17, 128  ;;  %s3104_s25 = scalar_lea.hbm %s3926_s23, 512 }
 0xe30   : > { %p3101_p13 = scmp.ne.s32.totalorder %s2096_s17, %s3100_s15  ;;  %p3105_p6 = scmp.lt.s32.totalorder %s2096_s17, %s3926_s23 }
 0xe31   : > { %p3106_p4 = scmp.lt.s32.totalorder %s3104_s25, %s3100_s15 }
 0xe32   : > { %p3102_p11 = pnand %p3101_p13, %p3533_p12 }
 0xe33   : > { %p3107_p1 = por %p3106_p4, %p3105_p6 }
 0xe34   : > { %p3103_p7 = pneg %p3102_p11 }
 0xe36   : > { %p3108_p2 = pnand %p3107_p1, %p3103_p7 }
 0xe38   : > { %3111 = shalt.err (!%p3108_p2)
}
 0xe39   : > { %2628 = dma.vmem_to_hbm [thread:$0]  (%p3533_p12), %s2099_s4, 128, %s2096_s17, %s2083_s1  }
 0xe3a PF: > { %s3927_s8 = sld [smem:[#allocation27_spill]]  ;;  %p2673_p3 = scmp.ge.s32.totalorder %s3226_s2, 2 }
 0xe3c   : > { %p2657_p5 = pnand %p2673_p3, %p3543_p0 }
 0xe3e   : > { %p2658_p8 = pneg %p2657_p5 }
 0xe40   : > { %s2110_s21 = sand.u32 1, %s3927_s8  }
 0xe41   : > { %s2111_s20 = scalar_lea.sflag [#allocation7], %s2110_s21 }
 0xe42   : > { %3181 = dma.done.wait (%p2658_p8), %s2111_s20, 128  }
 0xe43   : > { %3183 = vsyncadd (%p2658_p8), %s2111_s20, 4294967168  ;;  %s40_s2 = sadd.s32 1, %s3226_s2   ;;  %s3929_s6 = sld [smem:[#allocation28_spill]] }
 0xe44   : > { %p37_p9 = scmp.ge.s32.totalorder %s40_s2, 6   ;;  %s3930_s29 = sld [smem:[#allocation35_spill]] }
 0xe45   : > { %s3931_s10 = sld [smem:[#allocation29_spill]]  ;;  %s3936_s27 = smov %s3190_s28 }
 0xe46   : > { %s3932_s19 = sld [smem:[#allocation34_spill]]  ;;  %s3938_s30 = smov %s3202_s0 }
 0xe47   : > { %s3933_s1 = sld [smem:[#allocation31_spill]]  ;;  %s3940_s20 = smov %s3222_s22 }
 0xe48   : > { %s3934_s21 = sld [smem:[#allocation32_spill]] }
 0xe49   : > { %s3935_s12 = sld [smem:[#allocation33_spill]]  ;;  %s3937_s28 = smov %s3929_s6 }
 0xe4b   : > { %s3939_s0 = smov %s3931_s10  ;;  %39 = sbr.rel (!%p37_p9) target bundleno = 32 (0x20), region = 179 }
 0xe4f   : > { %s3941_s22 = smov %s3935_s12 }
 0xe50   :  { %2116 = vsyncpa [#allocation6], 1 }
 0xe51   :  { %2118 = vsyncpa [#allocation6 + $0x1], 1 }
 0xe52   :  { %2119 = vsyncpa [#allocation9], 1 }
 0xe53   :  { %2121 = vsyncpa [#allocation9 + $0x1], 1 }
 0xe54   :  { %2122 = vsyncpa [#allocation12], 1 }
 0xe55   :  { %2123 = vsyncpa [#allocation15], 1 }
 0xe56   :  { %2124 = vsyncpa [#allocation18], 1 }
 0xe57   :  { %2125 = vsyncpa [#allocation7], 1 }
 0xe58   :  { %2127 = vsyncpa [#allocation7 + $0x1], 1 }

// kernel: tpu_custom_call.1
= control target key start
LH: loop header
LB: loop body
LE: loop exit
PB: predicated region body
PF: predicated region fallthrough
CT: control target
= control target key end

     0   :  { %s3840_s0 = inlined_call_operand.hbm [shape: f32[2,16,128], index: 0, kind: input, shape index: {}]   ;;  %s3841_s1 = inlined_call_operand.hbm [shape: f32[2,1,16], index: 1, kind: input, shape index: {}]   ;;  %s3842_s2 = inlined_call_operand.hbm [shape: bf16[128,128], index: 2, kind: input, shape index: {}]   ;;  %s3843_s3 = inlined_call_operand.vmem [shape: f32[1,128], index: 3, kind: input, shape index: {}]   ;;  %s3844_s4 = inlined_call_operand.hbm [shape: bf16[128,128], index: 4, kind: input, shape index: {}]   ;;  %s3845_s5 = inlined_call_operand.vmem [shape: f32[1,128], index: 5, kind: input, shape index: {}]   ;;  %s3846_s6 = inlined_call_operand.hbm [shape: bf16[128,128], index: 6, kind: input, shape index: {}]   ;;  %s3847_s7 = inlined_call_operand.vmem [shape: f32[1,128], index: 7, kind: input, shape index: {}]   ;;  %s3848_s8 = inlined_call_operand.hbm [shape: bf16[128,128], index: 8, kind: input, shape index: {}]   ;;  %s3849_s9 = inlined_call_operand.vmem [shape: f32[1,128], index: 9, kind: input, shape index: {}]   ;;  %s3850_s10 = inlined_call_operand.vmem [shape: f32[1,128], index: 10, kind: input, shape index: {}]   ;;  %s3851_s11 = inlined_call_operand.vmem [shape: f32[1,128], index: 11, kind: input, shape index: {}]   ;;  %s3852_s12 = inlined_call_operand.hbm [shape: bf16[128,256], index: 12, kind: input, shape index: {}]   ;;  %s3853_s13 = inlined_call_operand.vmem [shape: f32[1,256], index: 13, kind: input, shape index: {}]   ;;  %s3854_s14 = inlined_call_operand.hbm [shape: bf16[256,128], index: 14, kind: input, shape index: {}]   ;;  %s3855_s15 = inlined_call_operand.vmem [shape: f32[1,128], index: 15, kind: input, shape index: {}]   ;;  %s3856_s16 = inlined_call_operand.vmem [shape: f32[1,128], index: 16, kind: input, shape index: {}]   ;;  %s3857_s17 = inlined_call_operand.vmem [shape: f32[1,128], index: 17, kind: input, shape index: {}]   ;;  %s3858_s18 = inlined_call_operand.hbm [shape: f32[2,16,128], index: 18, kind: output, shape index: {}]  }
   0x1   :  { %3870 = sst [smem:[#allocation37_spill]] %s3840_s0 }
   0x2   :  { %3871 = sst [smem:[#allocation38_spill]] %s3841_s1 }
   0x3   :  { %3872 = sst [smem:[#allocation39_spill]] %s3842_s2 }
   0x4   :  { %3873 = sst [smem:[#allocation40_spill]] %s3843_s3 }
   0x5   :  { %3874 = sst [smem:[#allocation41_spill]] %s3844_s4 }
   0x6   :  { %3875 = sst [smem:[#allocation42_spill]] %s3846_s6 }
   0x7   :  { %3876 = sst [smem:[#allocation43_spill]] %s3848_s8 }
   0x8   :  { %3877 = sst [smem:[#allocation44_spill]] %s3849_s9 }
   0x9   :  { %3878 = sst [smem:[#allocation45_spill]] %s3850_s10 }
   0xa   :  { %3879 = sst [smem:[#allocation46_spill]] %s3851_s11 }
   0xb   :  { %3880 = sst [smem:[#allocation47_spill]] %s3852_s12 }
   0xc   :  { %3881 = sst [smem:[#allocation48_spill]] %s3853_s13 }
   0xd   :  { %3882 = sst [smem:[#allocation49_spill]] %s3854_s14 }
   0xe   :  { %3883 = sst [smem:[#allocation50_spill]] %s3855_s15 }
   0xf   :  { %3884 = sst [smem:[#allocation51_spill]] %s3856_s16 }
  0x10   :  { %3885 = sst [smem:[#allocation52_spill]] %s3857_s17 }
  0x11   :  { %3886 = sst [smem:[#allocation53_spill]] %s3858_s18 }
  0x12   :  { %23 = vsyncpa [#allocation6], 0 }
  0x13   :  { %25 = vsyncpa [#allocation6 + $0x1], 0 }
  0x14   :  { %26 = vsyncpa [#allocation9], 0 }
  0x15   :  { %28 = vsyncpa [#allocation9 + $0x1], 0 }
  0x16   :  { %29 = vsyncpa [#allocation12], 0 }
  0x17   :  { %30 = vsyncpa [#allocation15], 0 }
  0x18   :  { %31 = vsyncpa [#allocation18], 0 }
  0x19   :  { %32 = vsyncpa [#allocation7], 0 }
  0x1a   :  { %34 = vsyncpa [#allocation7 + $0x1], 0  ;;  %s3344_s27 = smov 0   ;;  %s3346_s28 = smov 0  }
  0x1b   :  { %s3348_s29 = smov 0   ;;  %s3350_s30 = smov 0  }
  0x1c   :  { %s3352_s0 = smov 0   ;;  %s3354_s19 = smov 0  }
  0x1d   :  { %s3356_s1 = smov 0   ;;  %s3358_s20 = smov 0  }
  0x1e   :  { %s3360_s21 = smov 0   ;;  %s3362_s22 = smov 0  }
  0x1f   :  { %s3364_s2 = smov 0  }
  0x20 LB: > { %3887 = sst [smem:[#allocation27_spill]] %s3186_s27  ;;  %s3400_s23 = sadd.s32 4294967295, %s3226_s2   ;;  %s3226_s2 = sphi %s3364_s2, %s40_s2   ;;  %s3222_s22 = sphi %s3362_s22, %s3941_s22   ;;  %s3218_s21 = sphi %s3360_s21, %s3934_s21   ;;  %s3214_s20 = sphi %s3358_s20, %s3940_s20   ;;  %s3210_s1 = sphi %s3356_s1, %s3933_s1   ;;  %s3206_s19 = sphi %s3354_s19, %s3932_s19   ;;  %s3202_s0 = sphi %s3352_s0, %s3939_s0   ;;  %s3198_s30 = sphi %s3350_s30, %s3938_s30   ;;  %s3194_s29 = sphi %s3348_s29, %s3930_s29   ;;  %s3190_s28 = sphi %s3346_s28, %s3937_s28   ;;  %s3186_s27 = sphi %s3344_s27, %s3936_s27  }
  0x21   : > { %3888 = sst [smem:[#allocation28_spill]] %s3194_s29  ;;  %p2262_p0 = scmp.ge.s32.totalorder %s3226_s2, 1 }
  0x22   : > { %3889 = sst [smem:[#allocation29_spill]] %s3206_s19  ;;  %p73_p1 = scmp.eq.s32.totalorder %s3400_s23, 0 }
  0x23   : > { %3890 = sst [smem:[#allocation30_spill]] %s3214_s20  ;;  %p473_p3 = scmp.lt.s32.totalorder %s3226_s2, 5 }
  0x24   : > { %3891 = sst [smem:[#allocation31_spill]] %s3218_s21  ;;  %s3228_s25 = smov [#allocation10]  }
  0x25   : > { %p3406_p4 = pnand %p2262_p0, %p473_p3  ;;  %s485_s26 = sshll.u32 %s3228_s25, 4  ;;  %s486_s26 = int_to_ptr.vmem [resolvable:$true] %s485_s26 }
  0x26   : > { %s3229_s17 = smov [#allocation11]   ;;  %s3230_s20 = smov [#allocation14]  }
  0x27   : > { %p2630_p5 = pneg %p3406_p4  ;;  %s501_s16 = sshll.u32 %s3229_s17, 4  ;;  %s3418_s16 = int_to_ptr.vmem [resolvable:$true] %s501_s16 }
  0x28   : > { %s533_s15 = sshll.u32 %s3230_s20, 4  ;;  %s2885_s13 = scalar_lea.vmem %s486_s26, 1024  ;;  %s3420_s15 = int_to_ptr.vmem [resolvable:$true] %s533_s15 }
  0x29   : > { %p3414_p6 = pnand %p2630_p5, %p73_p1  ;;  %p2886_p8 = scmp.ne.s32.totalorder %s486_s26, %s2885_s13 }
  0x2a   : > { %p2893_p11 = scmp.lt.s32.totalorder %s486_s26, %s486_s26  ;;  %p2894_p12 = scmp.lt.s32.totalorder %s2885_s13, %s2885_s13 }
  0x2b   : > { %p3424_p7 = pneg %p3414_p6 }
  0x2c   : > { %p2895_p13 = por %p2894_p12, %p2893_p11 }
  0x2d   : > { %p2888_p9 = pnand %p2886_p8, %p3424_p7 }
  0x2f   : > { %p2889_p10 = pneg %p2888_p9 }
  0x31   : > { %p2896_p0 = pnand %p2895_p13, %p2889_p10 }
  0x33   : > { %2899 = shalt.err (!%p2896_p0)
}
  0x34   : > { %s3860_s17 = smov 64   ;;  %s3232_s20 = smov 4  }
  0x35   : > { %s3895_s9 = sld [smem:[#allocation39_spill]]  ;;  %s2911_s3 = scalar_lea.vmem %s3418_s16, 1024 }
  0x36   : > { %p2912_p3 = scmp.ne.s32.totalorder %s3418_s16, %s2911_s3  ;;  %p2919_p9 = scmp.lt.s32.totalorder %s3418_s16, %s3418_s16 }
  0x37   : > { %p2920_p10 = scmp.lt.s32.totalorder %s2911_s3, %s2911_s3 }
  0x38   : > { %p2914_p5 = pnand %p2912_p3, %p3424_p7 }
  0x39   : > { %p2921_p11 = por %p2920_p10, %p2919_p9 }
  0x3a   : > { %p2915_p8 = pneg %p2914_p5 }
  0x3b   : > { %2633 = dma.hbm_to_vmem [thread:$0]  (!%p3414_p6), %s3895_s9, 1024, %s486_s26, [#allocation9], %s3860_s17, %s3860_s17, %s3232_s20  }
  0x3c   : > { %p2922_p12 = pnand %p2921_p11, %p2915_p8 }
  0x3e   : > { %2925 = shalt.err (!%p2922_p12)
}
  0x3f   : > { %s3896_s4 = sld [smem:[#allocation41_spill]]  ;;  %s2937_s9 = scalar_lea.vmem %s3420_s15, 1024 }
  0x40   : > { %p2938_p13 = scmp.ne.s32.totalorder %s3420_s15, %s2937_s9  ;;  %p2945_p5 = scmp.lt.s32.totalorder %s3420_s15, %s3420_s15 }
  0x41   : > { %p2946_p8 = scmp.lt.s32.totalorder %s2937_s9, %s2937_s9 }
  0x42   : > { %p2940_p0 = pnand %p2938_p13, %p3424_p7 }
  0x43   : > { %p2947_p9 = por %p2946_p8, %p2945_p5 }
  0x44   : > { %p2941_p3 = pneg %p2940_p0 }
  0x45   : > { %2636 = dma.hbm_to_vmem [thread:$0]  (!%p3414_p6), %s3896_s4, 1024, %s3418_s16, [#allocation12], %s3860_s17, %s3860_s17, %s3232_s20  }
  0x46   : > { %p2948_p10 = pnand %p2947_p9, %p2941_p3 }
  0x48   : > { %2951 = shalt.err (!%p2948_p10)
}
  0x49   : > { %s3897_s8 = sld [smem:[#allocation43_spill]]  ;;  %s3233_s16 = smov [#allocation13]  }
  0x4a   : > { %s517_s26 = sshll.u32 %s3233_s16, 4  ;;  %s3234_s13 = smov [#allocation16]   ;;  %s518_s26 = int_to_ptr.vmem [resolvable:$true] %s517_s26 }
  0x4b   : > { %s555_s10 = sshll.u32 %s3234_s13, 4  ;;  %s2963_s9 = scalar_lea.vmem %s518_s26, 1024  ;;  %s556_s10 = int_to_ptr.vmem [resolvable:$true] %s555_s10 }
  0x4c   : > { %p2964_p11 = scmp.ne.s32.totalorder %s518_s26, %s2963_s9  ;;  %p2971_p0 = scmp.lt.s32.totalorder %s518_s26, %s518_s26 }
  0x4d   : > { %p2972_p3 = scmp.lt.s32.totalorder %s2963_s9, %s2963_s9 }
  0x4e   : > { %p2966_p12 = pnand %p2964_p11, %p3424_p7 }
  0x4f   : > { %2642 = dma.hbm_to_vmem [thread:$0]  (!%p3414_p6), %s3897_s8, 1024, %s3420_s15, [#allocation15], %s3860_s17, %s3860_s17, %s3232_s20  }
  0x50   : > { %p2967_p13 = pneg %p2966_p12  ;;  %p2973_p5 = por %p2972_p3, %p2971_p0 }
  0x52   : > { %p2974_p8 = pnand %p2973_p5, %p2967_p13 }
  0x54   : > { %2977 = shalt.err (!%p2974_p8)
}
  0x55   : > { %s3898_s6 = sld [smem:[#allocation42_spill]]  ;;  %s2989_s11 = scalar_lea.vmem %s556_s10, 2048 }
  0x56   : > { %p2990_p9 = scmp.ne.s32.totalorder %s556_s10, %s2989_s11  ;;  %p2997_p12 = scmp.lt.s32.totalorder %s556_s10, %s556_s10 }
  0x57   : > { %p2998_p2 = scmp.lt.s32.totalorder %s2989_s11, %s2989_s11 }
  0x58   : > { %p2992_p10 = pnand %p2990_p9, %p3424_p7 }
  0x59   : > { %p2999_p0 = por %p2998_p2, %p2997_p12 }
  0x5a   : > { %p2993_p11 = pneg %p2992_p10 }
  0x5b   : > { %2639 = dma.hbm_to_vmem [thread:$0]  (!%p3414_p6), %s3898_s6, 1024, %s518_s26, [#allocation12], %s3860_s17, %s3860_s17, %s3232_s20  }
  0x5c   : > { %p3000_p13 = pnand %p2999_p0, %p2993_p11 }
  0x5e   : > { %3003 = shalt.err (!%p3000_p13)
}
  0x5f   : > { %s3861_s16 = smov 128   ;;  %s3862_s13 = smov 8  }
  0x60   : > { %s3899_s12 = sld [smem:[#allocation47_spill]]  ;;  %s3237_s15 = smov [#allocation17]  }
  0x61   : > { %s571_s3 = sshll.u32 %s3237_s15, 4  ;;  %s572_s3 = int_to_ptr.vmem [resolvable:$true] %s571_s3 }
  0x62   : > { %s3015_s17 = scalar_lea.vmem %s572_s3, 2048  ;;  %p3023_p8 = scmp.lt.s32.totalorder %s572_s3, %s572_s3 }
  0x63   : > { %p3016_p3 = scmp.ne.s32.totalorder %s572_s3, %s3015_s17  ;;  %p3024_p9 = scmp.lt.s32.totalorder %s3015_s17, %s3015_s17 }
  0x65   : > { %p3018_p2 = pnand %p3016_p3, %p3424_p7  ;;  %p3025_p10 = por %p3024_p9, %p3023_p8 }
  0x66   : > { %2645 = dma.hbm_to_vmem [thread:$0]  (!%p3414_p6), %s3899_s12, 2048, %s556_s10, [#allocation15], %s3861_s16, %s3861_s16, %s3862_s13  }
  0x67   : > { %p3019_p5 = pneg %p3018_p2 }
  0x69   : > { %p3026_p11 = pnand %p3025_p10, %p3019_p5 }
  0x6b   : > { %3029 = shalt.err (!%p3026_p11)
}
  0x6c   : > { %s3900_s11 = smov 64   ;;  %s3901_s14 = sld [smem:[#allocation49_spill]] }
  0x6d   : > { %s2261_s18 = sadd.s32 4294967294, %s3226_s2   ;;  %s49_s25 = sadd.s32 1, %s3218_s21 }
  0x6e   : > { %s52_s17 = sadd.s32 1, %s3222_s22  ;;  %p50_p7 = scmp.ge.s32.totalorder %s49_s25, 2 }
  0x6f   : > { %s59_s26 = sadd.s32 1, %s3206_s19  ;;  %p66_p12 = scmp.ne.s32.totalorder %s3206_s19, %s3202_s0 }
  0x70   : > { %p67_p0 = scmp.eq.s32.totalorder %s3226_s2, 0  ;;  %s3943_s25 = smov (%p50_p7, %s49_s25), 0 }
  0x71   : > { %3902 = sst [smem:[#allocation32_spill]] %s3943_s25  ;;  %s3945_s17 = smov (!%p50_p7, %s52_s17), %s3222_s22 }
  0x72   : > { %2648 = dma.hbm_to_vmem [thread:$0]  (!%p3414_p6), %s3901_s14, 2048, %s572_s3, [#allocation18], %s3900_s11, %s3900_s11, %s3232_s20  }
  0x73   : > { %p3508_p13 = por %p67_p0, %p66_p12  ;;  %p72_p6 = scmp.ne.s32.totalorder %s3202_s0, %s3198_s30 }
  0x74   : > { %p54_p3 = scmp.ge.s32.totalorder %s3945_s17, 2  ;;  %s445_s15 = ssub.s32 %s3218_s21, %s3943_s25 }
  0x75   : > { %p3518_p2 = por %p73_p1, %p72_p6  ;;  %s449_s11 = sadd.s32 1, %s3194_s29 }
  0x76   : > { %s3947_s17 = smov (%p54_p3, %s3945_s17), 0  ;;  %p459_p5 = scmp.ne.s32.totalorder %s3194_s29, %s3190_s28 }
  0x77   : > { %3905 = sst [smem:[#allocation33_spill]] %s3947_s17  ;;  %p465_p8 = scmp.ne.s32.totalorder %s3190_s28, %s3186_s27 }
  0x78   : > { %s56_s9 = ssub.s32 %s3222_s22, %s3947_s17  ;;  %p466_p9 = scmp.eq.s32.totalorder %s2261_s18, 3 }
  0x79   : > { %p57_p10 = scmp.eq.s32.totalorder %s56_s9, 0  ;;  %s446_s30 = sor.u32 %s445_s15, %s56_s9 }
  0x7a   : > { %p447_p11 = scmp.eq.s32.totalorder %s446_s30, 0  ;;  %p3906_p7 = scmp.eq.s32.totalorder %s3400_s23, 3 }
  0x7b   : > { %s3538_s16 = scalar_select %p57_p10, %s3206_s19, %s59_s26  }
  0x7c   : > { %p3533_p12 = por %p3906_p7, %p459_p5  ;;  %p3543_p0 = por %p466_p9, %p465_p8 }
  0x7d   : > { %3908 = sst [smem:[#allocation34_spill]] %s3538_s16  ;;  %p2666_p6 = scmp.lt.s32.totalorder %s3226_s2, 4 }
  0x7e   : > { %s3541_s13 = scalar_select %p447_p11, %s3194_s29, %s449_s11  }
  0x7f   : > { %s3910_s4 = scalar_select %p3543_p0, 1, 0 }
  0x80   : > { %3909 = sst [smem:[#allocation35_spill]] %s3541_s13  ;;  %s3549_s6 = sand.u32 1, %s3206_s19  }
  0x81   : > { %3911 = sst [smem:[#allocation36_spill]] %s3910_s4  ;;  %s2380_s18 = sshll.u32 %s3222_s22, 8 }
  0x82   : > { %s2270_s15 = sshll.u32 %s3549_s6, 4  ;;  %s3912_s8 = sld [smem:[#allocation37_spill]] }
  0x83   : > { %s598_s14 = scalar_lea.vmem [#allocation5], %s2270_s15  ;;  %p3558_p3 = pnand %p2666_p6, %p3508_p13 }
  0x84   : > { %s605_s26 = sshll.u32 %s598_s14, 4  ;;  %s615_s17 = sand.u32 1, %s3226_s2   ;;  %s606_s26 = int_to_ptr.vmem [resolvable:$true] %s605_s26 }
  0x85   : > { %s595_s25 = scalar_lea.sflag [#allocation6], %s3549_s6  ;;  %p3032_p5 = pneg %p3558_p3 }
  0x86   : > { %s3043_s21 = scalar_lea.vmem %s606_s26, 256 }
  0x87   : > { %p3044_p8 = scmp.ne.s32.totalorder %s606_s26, %s3043_s21 }
  0x88   : > { %s604_s12 = scalar_lea.hbm %s3912_s8, %s2380_s18  ;;  %s3238_s8 = smov [#allocation5]  }
  0x89   : > { %p3046_p9 = pnand %p3044_p8, %p3032_p5  ;;  %s3048_s14 = sshll.u32 %s3238_s8, 4  ;;  %s3049_s14 = int_to_ptr.vmem [resolvable:$false] %s3048_s14 }
  0x8a   : > { %s3050_s20 = scalar_lea.vmem %s3049_s14, 512  ;;  %p3051_p13 = scmp.lt.s32.totalorder %s606_s26, %s3049_s14 }
  0x8b   : > { %p3047_p10 = pneg %p3046_p9  ;;  %p3052_p11 = scmp.lt.s32.totalorder %s3050_s20, %s3043_s21 }
  0x8d   : > { %p3053_p7 = por %p3052_p11, %p3051_p13 }
  0x8f   : > { %p3054_p6 = pnand %p3053_p7, %p3047_p10 }
  0x91   : > { %3057 = shalt.err (!%p3054_p6)
}
  0x92   : > { %s3914_s18 = smov 8   ;;  %s3915_s15 = smov 128  }
  0x93   : > { %2652 = dma.hbm_to_vmem [thread:$0]  (!%p3558_p3), %s604_s12, 256, %s606_s26, %s595_s25, %s3915_s15, %s3915_s15, %s3914_s18  }
  0x94   : > { %s2273_s9 = sshll.u32 %s3222_s22, 4  ;;  %s3916_s8 = sld [smem:[#allocation38_spill]] }
  0x95   : > { %s618_s13 = scalar_lea.vmem [#allocation8], %s3549_s6  ;;  %s616_s21 = scalar_lea.sflag [#allocation9], %s615_s17 }
  0x96   : > { %s625_s14 = sshll.u32 %s618_s13, 4  ;;  %s3239_s29 = smov [#allocation8]   ;;  %s626_s14 = int_to_ptr.vmem [resolvable:$true] %s625_s14 }
  0x97   : > { %s3071_s20 = scalar_lea.vmem %s626_s14, 16  ;;  %s3076_s4 = sshll.u32 %s3239_s29, 4  ;;  %s3077_s4 = int_to_ptr.vmem [resolvable:$false] %s3076_s4 }
  0x98   : > { %p3072_p8 = scmp.ne.s32.totalorder %s626_s14, %s3071_s20  ;;  %s3078_s27 = scalar_lea.vmem %s3077_s4, 32 }
  0x99   : > { %p3079_p13 = scmp.lt.s32.totalorder %s626_s14, %s3077_s4  ;;  %p3080_p11 = scmp.lt.s32.totalorder %s3078_s27, %s3071_s20 }
  0x9a   : > { %s623_s19 = scalar_lea.hbm %s3916_s8, %s2273_s9  ;;  %p3074_p9 = pnand %p3072_p8, %p3032_p5 }
  0x9b   : > { %p3081_p7 = por %p3080_p11, %p3079_p13 }
  0x9c   : > { %p3075_p10 = pneg %p3074_p9 }
  0x9e   : > { %p3082_p6 = pnand %p3081_p7, %p3075_p10 }
  0xa0   : > { %3085 = shalt.err (!%p3082_p6)
}
  0xa1   : > { %2655 = dma.hbm_to_vmem [thread:$0]  (!%p3558_p3), %s623_s19, 16, %s626_s14, %s616_s21  }
  0xa2   : > { %634 = sbr.rel (%p3406_p4) target bundleno = 3642 (0xe3a), region = 92  ;;  %s3587_s6 = sand.u32 (!%p3406_p4), 1, %s3202_s0  }
  0xa3   : > { %s2275_s12 = sshll.u32 (!%p3406_p4), %s3587_s6, 4  ;;  %s637_s29 = scalar_lea.sflag (!%p3406_p4), [#allocation6], %s3587_s6 }
  0xa4   : > { %s3591_s16 = scalar_lea.vmem (!%p3406_p4), [#allocation5], %s2275_s12 }
  0xa7   : > { %3157 = dma.done.wait (%p3518_p2), %s637_s29, 256  }
  0xa8   : > { %3159 = vsyncadd (%p3518_p2), %s637_s29, 4294967040  ;;  %s645_s4 = sand.u32 1, %s3400_s23   ;;  %s648_s19 = scalar_lea.vmem [#allocation8], %s3587_s6 }
  0xa9   : > { %s646_s27 = scalar_lea.sflag [#allocation9], %s645_s4 }
  0xaa   : > { %3161 = dma.done.wait (%p3518_p2), %s646_s27, 16  }
  0xab   : > { %3163 = vsyncadd (%p3518_p2), %s646_s27, 4294967280 }
  0xac   : > { %3165 = dma.done.wait (%p73_p1), [#allocation9], 1024  }
  0xad   : > { %3167 = vsyncadd (%p73_p1), [#allocation9], 4294966272 }
  0xae   : > { %3169 = dma.done.wait (%p73_p1), [#allocation12], 2048  }
  0xaf   : > { %3171 = vsyncadd (%p73_p1), [#allocation12], 4294965248 }
  0xb0   : > { %3173 = dma.done.wait (%p73_p1), [#allocation15], 3072  }
  0xb1   : > { %3175 = vsyncadd (%p73_p1), [#allocation15], 4294964224 }
  0xb2   : > { %3177 = dma.done.wait (%p73_p1), [#allocation18], 2048  }
  0xb3   : > { %3179 = vsyncadd (%p73_p1), [#allocation18], 4294965248  ;;  %s726_s24 = sand.u32 1, %s3190_s28   ;;  %p2283_p4 = scmp.ne.s32.totalorder %s3210_s1, 0 }
  0xb4   : > { %s3622_s13 = sshll.u32 %s726_s24, 3 }
  0xb5   : > { %s728_s25 = scalar_lea.vmem [#allocation19], %s3622_s13  ;;  %733 = sbr.rel (%p2283_p4) target bundleno = 422 (0x1a6), region = 128 }
  0xba   : > { %v2780_v0 = vld [vmem:[#allocation11 + $0x38] sm:$0xff]   ;;  %v3240_v1 = vmov 0.0   ;;  %v2782_v3 = vld [vmem:[#allocation11 + $0x30] sm:$0xff]   ;;  %vm3241_vm0 = vmmov 0   ;;  %v2784_v5 = vld [vmem:[#allocation11 + $0x28] sm:$0xff]  }
  0xbb   : > { %2472 = vmatprep.subr.bf16.mxu0 %v3240_v1  ;;  %2492 = vmatprep.subr.bf16.mxu1 %v3240_v1  ;;  %v2781_v2 = vld [vmem:[#allocation13 + $0x38] sm:$0xff]   ;;  %v2783_v4 = vld [vmem:[#allocation13 + $0x30] sm:$0xff]   ;;  %v2785_v6 = vld [vmem:[#allocation13 + $0x28] sm:$0xff]  }
  0xbc   : > { %2473 = vmatpush3.bf16.msra.mxu0 %v2780_v0  ;;  %2488 = vmatprep.mubr.msk.bf16.mxu0 %vm3241_vm0, %v3240_v1  ;;  %v2786_v7 = vld [vmem:[#allocation11 + $0x20] sm:$0xff]   ;;  %v2788_v9 = vld [vmem:[#allocation11 + $0x18] sm:$0xff]   ;;  %v2790_v11 = vld [vmem:[#allocation11 + $0x10] sm:$0xff]  }
  0xbd   : > { %2493 = vmatpush3.bf16.msra.mxu1 %v2781_v2  ;;  %2474 = vmatprep.subr.bf16.mxu0 %v3240_v1  ;;  %v2787_v8 = vld [vmem:[#allocation13 + $0x20] sm:$0xff]   ;;  %v2789_v10 = vld [vmem:[#allocation13 + $0x18] sm:$0xff]   ;;  %v2791_v12 = vld [vmem:[#allocation13 + $0x10] sm:$0xff]  }
  0xbe   : > { %2494 = vmatprep.subr.bf16.mxu1 %v3240_v1  ;;  %2508 = vmatprep.mubr.msk.bf16.mxu1 %vm3241_vm0, %v3240_v1  ;;  %v2792_v13 = vld [vmem:[#allocation11 + $0x8] sm:$0xff]   ;;  %v2794_v15 = vld [vmem:[#allocation11] sm:$0xff]  }
  0xbf   : > { %v2793_v14 = vld [vmem:[#allocation13 + $0x8] sm:$0xff]   ;;  %v2795_v18 = vld [vmem:[#allocation13] sm:$0xff]  }
  0xc0   : > { %2475 = vmatpush3.bf16.msra.mxu0 %v2782_v3  ;;  %v734_v16 = vld [vmem:[%s3591_s16] sm:$0xff]  ;;  %v735_v17 = vld [vmem:[%s3591_s16 + $0x8] sm:$0xff] }
  0xc1   : > { %2495 = vmatpush3.bf16.msra.mxu1 %v2783_v4  ;;  %2476 = vmatprep.subr.bf16.mxu0 %v3240_v1  ;;  %v736_v19 = vpack.c.bf16 %v735_v17, %v734_v16  ;;  %v2284_v22 = vld [vmem:[%s3845_s5] ss:$0 sm:$0xff] }
  0xc2   : > { %2496 = vmatprep.subr.bf16.mxu1 %v3240_v1  ;;  %v2293_v24 = vld [vmem:[%s3847_s7] ss:$0 sm:$0xff] }
  0xc4   : > { %2477 = vmatpush3.bf16.msra.mxu0 %v2784_v5 }
  0xc5   : > { %2497 = vmatpush3.bf16.msra.mxu1 %v2785_v6  ;;  %2478 = vmatprep.subr.bf16.mxu0 %v3240_v1 }
  0xc6   : > { %2498 = vmatprep.subr.bf16.mxu1 %v3240_v1 }
  0xc8   : > { %2479 = vmatpush3.bf16.msra.mxu0 %v2786_v7 }
  0xc9   : > { %2499 = vmatpush3.bf16.msra.mxu1 %v2787_v8  ;;  %2480 = vmatprep.subr.bf16.mxu0 %v3240_v1 }
  0xca   : > { %2500 = vmatprep.subr.bf16.mxu1 %v3240_v1 }
  0xcc   : > { %2481 = vmatpush3.bf16.msra.mxu0 %v2788_v9 }
  0xcd   : > { %2501 = vmatpush3.bf16.msra.mxu1 %v2789_v10  ;;  %2482 = vmatprep.subr.bf16.mxu0 %v3240_v1 }
  0xce   : > { %2502 = vmatprep.subr.bf16.mxu1 %v3240_v1 }
  0xd0   : > { %2483 = vmatpush3.bf16.msra.mxu0 %v2790_v11 }
  0xd1   : > { %2503 = vmatpush3.bf16.msra.mxu1 %v2791_v12  ;;  %2484 = vmatprep.subr.bf16.mxu0 %v3240_v1 }
  0xd2   : > { %2504 = vmatprep.subr.bf16.mxu1 %v3240_v1 }
  0xd4   : > { %2485 = vmatpush3.bf16.msra.mxu0 %v2792_v13 }
  0xd5   : > { %2505 = vmatpush3.bf16.msra.mxu1 %v2793_v14  ;;  %2486 = vmatprep.subr.bf16.mxu0 %v3240_v1 }
  0xd6   : > { %2506 = vmatprep.subr.bf16.mxu1 %v3240_v1 }
  0xd8   : > { %2487 = vmatpush3.bf16.msra.mxu0 %v2794_v15 }
  0xd9   : > { %2507 = vmatpush3.bf16.msra.mxu1 %v2795_v18 }
  0xdb   : > { %2489 = vmatmul.mubr.bf16.vlgmr.msra.gmra.mxu0 %v736_v19 }
  0xdc   : > { %2509 = vmatmul.mubr.bf16.vlgmr.msra.gmra.mxu1 %v736_v19 }
 0x19b   : > { %v842_v20 = vpop.f32.mrf.mxu0 }
 0x19c   : > { %v954_v21 = vpop.f32.mrf.mxu1  ;;  %v843_v27 = vadd.f32 %v2284_v22, %v842_v20 }
 0x19d   : > { %v2490_v23 = vpop.f32.mrf.mxu0  ;;  %v955_v30 = vadd.f32 %v2293_v24, %v954_v21 }
 0x19e   : > { %v2510_v25 = vpop.f32.mrf.mxu1 }
 0x19f   : > { %v845_v26 = vpop.f32.mrf.mxu0 }
 0x1a0   : > { %v846_v28 = vadd.f32 %v2284_v22, %v845_v26  ;;  %v957_v29 = vpop.f32.mrf.mxu1 }
 0x1a1   : > { %v958_v31 = vadd.f32 %v2293_v24, %v957_v29  ;;  %v2491_v32 = vpop.f32.mrf.mxu0 }
 0x1a2   : > { %v2391_v33 = vpack.c.bf16 %v846_v28, %v843_v27  ;;  %v2511_v34 = vpop.f32.mrf.mxu1 }
 0x1a3   : > { %v2396_v35 = vpack.c.bf16 %v958_v31, %v955_v30 }
 0x1a4   : > { %2392 = vst [vmem:[#allocation2] sm:$0xff] %v2391_v33  }
 0x1a5   : > { %2397 = vst [vmem:[#allocation3] sm:$0xff] %v2396_v35  }
 0x1a6 PF: > { %v2796_v36 = vld [vmem:[#allocation10 + $0x38] sm:$0xff]   ;;  %v3242_v37 = vmov 0.0   ;;  %v2797_v38 = vld [vmem:[#allocation10 + $0x30] sm:$0xff]   ;;  %vm3243_vm1 = vmmov 0   ;;  %v2798_v39 = vld [vmem:[#allocation10 + $0x28] sm:$0xff]   ;;  %s2306_s11 = sshll.u32 %s3210_s1, 3  ;;  %v1105_v58 = vlaneseq }
 0x1a7   : > { %2512 = vmatprep.subr.bf16.mxu0 %v3242_v37  ;;  %2532 = vmatprep.subr.bf16.mxu1 %v3242_v37  ;;  %v2799_v40 = vld [vmem:[#allocation10 + $0x20] sm:$0xff]   ;;  %v2800_v41 = vld [vmem:[#allocation10 + $0x18] sm:$0xff]   ;;  %v2801_v42 = vld [vmem:[#allocation10 + $0x10] sm:$0xff]   ;;  %s982_s18 = scalar_lea.vmem %s3591_s16, %s2306_s11 [#allocation5]  ;;  %vm1115_vm2 = vcmask 261120   ;;  %s3917_s30 = sld [smem:[#allocation40_spill]]  ;;  %vm1162_vm3 = vcmask 130048  }
 0x1a8   : > { %2513 = vmatpush3.bf16.msra.mxu0 %v2796_v36  ;;  %2528 = vmatprep.mubr.msk.bf16.mxu0 %vm3243_vm1, %v3242_v37  ;;  %v2802_v43 = vld [vmem:[#allocation10 + $0x8] sm:$0xff]   ;;  %v2803_v44 = vld [vmem:[#allocation10] sm:$0xff]   ;;  %s3244_s8 = smov 96   ;;  %v3672_v59 = vshrl.u32 %v1105_v58, 7  ;;  %s3245_s14 = smov 64   ;;  %vm1225_vm4 = vcmask 257024  }
 0x1a9   : > { %2514 = vmatprep.subr.bf16.mxu0 %v3242_v37  ;;  %2534 = vmatprep.mubr.msk.bf16.mxu1 %vm3243_vm1, %v3242_v37  ;;  %v3648_v45 = vld [vmem:[%s982_s18] sm:$0xff]  ;;  %s3246_s21 = smov 32   ;;  %vm1343_vm5 = vcmask 519424   ;;  %vm1460_vm6 = vcmask 781824   ;;  %vm1577_vm7 = vcmask 1044224   ;;  %s3918_s12 = sld [smem:[#allocation44_spill]] }
 0x1aa   : > { %v984_v46 = vpack.c.bf16 %v3648_v45, %v3648_v45  ;;  %v1097_v60 = vld [vmem:[%s648_s19] sm:$0x1]  ;;  %v1107_v62 = vsub.s32 0, %v3672_v59  ;;  %s3919_s4 = sld [smem:[#allocation45_spill]] }
 0x1ab   : > { %v3656_v47 = vld [vmem:[#allocation2] sm:$0xff]   ;;  %v1098_v61 = vmul.f32 -1e+09, %v1097_v60  ;;  %s3920_s23 = sld [smem:[#allocation46_spill]] }
 0x1ac   : > { %2515 = vmatpush3.bf16.msra.mxu0 %v2797_v38  ;;  %v1120_v48 = vsel %vm1115_vm2, %v3656_v47, 0  ;;  %v3668_v57 = vld [vmem:[#allocation3] sm:$0xff]   ;;  %s3921_s26 = sld [smem:[#allocation48_spill]] }
 0x1ad   : > { %2516 = vmatprep.subr.bf16.mxu0 %v3242_v37  ;;  %2533 = vmatpush3.bf16.xpose.msra.mxu1 %v1120_v48  ;;  %v2307_v49 = vld [vmem:[%s3917_s30] ss:$0 sm:$0xff]  ;;  %v3679_v63 = vrot.slane %v1098_v61, %v1107_v62  ;;  %s3922_s15 = sld [smem:[#allocation50_spill]] }
 0x1ae   : > { %2538 = vmatprep.subr.bf16.mxu1 %v3242_v37  ;;  %s3923_s9 = sld [smem:[#allocation30_spill]] }
 0x1af   : > { %s3924_s20 = sld [smem:[#allocation51_spill]] }
 0x1b0   : > { %2517 = vmatpush3.bf16.msra.mxu0 %v2798_v39  ;;  %s3925_s29 = sld [smem:[#allocation52_spill]] }
 0x1b1   : > { %2518 = vmatprep.subr.bf16.mxu0 %v3242_v37 }
 0x1b4   : > { %2519 = vmatpush3.bf16.msra.mxu0 %v2799_v40  ;;  %s2376_s30 = sshll.u32 %s3923_s9, 1 }
 0x1b5   : > { %2520 = vmatprep.subr.bf16.mxu0 %v3242_v37 }
 0x1b8   : > { %2521 = vmatpush3.bf16.msra.mxu0 %v2800_v41 }
 0x1b9   : > { %2522 = vmatprep.subr.bf16.mxu0 %v3242_v37 }
 0x1bc   : > { %2523 = vmatpush3.bf16.msra.mxu0 %v2801_v42 }
 0x1bd   : > { %2524 = vmatprep.subr.bf16.mxu0 %v3242_v37 }
 0x1c0   : > { %2525 = vmatpush3.bf16.msra.mxu0 %v2802_v43 }
 0x1c1   : > { %2526 = vmatprep.subr.bf16.mxu0 %v3242_v37 }
 0x1c4   : > { %2527 = vmatpush3.bf16.msra.mxu0 %v2803_v44 }
 0x1c5   : > { %2580 = vmatprep.subr.bf16.mxu0 %v3242_v37 }
 0x1c7   : > { %2529 = vmatmul.mubr.bf16.vlgmr.msra.gmra.mxu0 %v984_v46 }
 0x1c8   : > { %2596 = vmatprep.mubr.msk.bf16.mxu0 %vm3243_vm1, %v3242_v37 }
 0x287   : > { %v1090_v50 = vpop.f32.mrf.mxu0 }
 0x288   : > { %v1091_v51 = vadd.f32 %v2307_v49, %v1090_v50 }
 0x289   : > { %v2530_v52 = vpop.f32.mrf.mxu0 }
 0x28a   : > { %v1096_v53 = vmul.f32 0.17677669, %v1091_v51 }
 0x28b   : > { %v1093_v54 = vpop.f32.mrf.mxu0 }
 0x28c   : > { %v1103_v55 = vpack.c.bf16 %v1096_v53, %v1096_v53 }
 0x28d   : > { %v2531_v56 = vpop.f32.mrf.mxu0 }
 0x28e   : > { %1228 = vrot.lane.b32.xlu1 %v1103_v55, %s3244_s8  ;;  %2535 = vmatmul.mubr.msk.bf16.vlgmr.msra.gmra.mxu1 %vm1115_vm2, %v1103_v55 }
 0x28f   : > { %2540 = vmatprep.mubr.msk.bf16.mxu1 %vm3243_vm1, %v3242_v37  ;;  %2539 = vmatpush3.bf16.msra.mxu1 %v3668_v57 }
 0x290   : > { %2544 = vmatprep.subr.bf16.mxu1 %v3242_v37 }
 0x300   : > { %v1229_v13 = vpop.permute.xlu1 %1228 }
 0x34e   : > { %v1156_v0 = vpop.f32.mrf.mxu1 }
 0x34f   : > { %v1157_v1 = vadd.f32 %v1156_v0, %v3679_v63 }
 0x350   : > { %v2536_v2 = vpop.f32.mrf.mxu1 }
 0x351   : > { %v1163_v3 = vsel %vm1162_vm3, %v1157_v1, -inf }
 0x352   : > { %1164 = vmax.xlane.f32.xlu0 %v1163_v3  ;;  %v1159_v4 = vpop.f32.mrf.mxu1 }
 0x354   : > { %v2537_v5 = vpop.f32.mrf.mxu1 }
 0x368   : > { %1230 = vrot.lane.b32.xlu0 %v3656_v47, %s3244_s8 }
 0x36c   : > { %1289 = vrot.lane.b32.xlu0 %v3668_v57, %s3244_s8 }
 0x370   : > { %1347 = vrot.lane.b32.xlu0 %v3656_v47, %s3245_s14 }
 0x374   : > { %1345 = vrot.lane.b32.xlu0 %v1103_v55, %s3245_s14 }
 0x3db   : > { %v1165_v6 = vpop.xlane.xlu0 %1164 }
 0x3dc   : > { %v1166_v7 = vsub.f32 %v1157_v1, %v1165_v6 }
 0x3de   : > { %v1167_v8 = vmul.f32 1.442695, %v1166_v7 }
 0x3df   : > { %v1231_v10 = vpop.permute.xlu0 %1230 }
 0x3e0   : > { %2854 = vpow2.f32 %v1167_v8  ;;  %v1236_v11 = vsel %vm1115_vm2, %v1231_v10, 0 }
 0x3e3   : > { %v1290_v14 = vpop.permute.xlu0 %1289 }
 0x3e7   : > { %v1348_v29 = vpop.permute.xlu0 %1347 }
 0x3e8   : > { %v1353_v30 = vsel %vm1115_vm2, %v1348_v29, 0 }
 0x3eb   : > { %v1346_v32 = vpop.permute.xlu0 %1345 }
 0x3ed   : > { %v3690_v9 = vpop.eup %2854 }
 0x3ee   : > { %v1173_v12 = vpack.c.bf16 %v3690_v9, %v3690_v9 }
 0x3f0   : > { %2541 = vmatmul.mubr.msk.bf16.vlgmr.msra.gmra.mxu1 %vm1162_vm3, %v1173_v12 }
 0x3f1   : > { %2545 = vmatpush3.bf16.xpose.msra.mxu1 %v1236_v11  ;;  %2546 = vmatprep.mubr.msk.bf16.mxu1 %vm3243_vm1, %v3242_v37 }
 0x3f2   : > { %2550 = vmatprep.subr.bf16.mxu1 %v3242_v37 }
 0x3f8   : > { %2547 = vmatmul.mubr.msk.bf16.vlgmr.msra.gmra.mxu1 %vm1115_vm2, %v1229_v13 }
 0x3f9   : > { %2551 = vmatpush3.bf16.msra.mxu1 %v1290_v14  ;;  %2552 = vmatprep.mubr.msk.bf16.mxu1 %vm3243_vm1, %v3242_v37 }
 0x3fa   : > { %2556 = vmatprep.subr.bf16.mxu1 %v3242_v37 }
 0x4b0   : > { %v3703_v15 = vpop.f32.mrf.mxu1 }
 0x4b2   : > { %v2542_v16 = vpop.f32.mrf.mxu1 }
 0x4b4   : > { %v1220_v17 = vpop.f32.mrf.mxu1 }
 0x4b6   : > { %v2543_v18 = vpop.f32.mrf.mxu1 }
 0x4b7   : > { %v1169_v18 = vsel %vm1162_vm3, %v3690_v9, 0.0  ;;  %v2809_v9 = vld [vmem:[#allocation14 + $0x20] sm:$0xff]  }
 0x4b8   : > { %v1272_v19 = vpop.f32.mrf.mxu1 }
 0x4b9   : > { %v1273_v20 = vadd.f32 %v1272_v19, %v3679_v63 }
 0x4ba   : > { %v2548_v21 = vpop.f32.mrf.mxu1 }
 0x4bb   : > { %v1278_v22 = vsel %vm1162_vm3, %v1273_v20, -inf }
 0x4bc   : > { %1279 = vmax.xlane.f32.xlu1 %v1278_v22  ;;  %v1275_v23 = vpop.f32.mrf.mxu1  ;;  %v2806_v22 = vld [vmem:[#allocation14 + $0x38] sm:$0xff]  }
 0x4bd   : > { %2581 = vmatpush3.bf16.msra.mxu0 %v2806_v22  ;;  %v2807_v23 = vld [vmem:[#allocation14 + $0x30] sm:$0xff]  }
 0x4be   : > { %v2549_v24 = vpop.f32.mrf.mxu1  ;;  %2582 = vmatprep.subr.bf16.mxu0 %v3242_v37  ;;  %v2848_v22 = vld [vmem:[#allocation17 + $0x50] sm:$0xff]  }
 0x4bf   : > { %v2808_v24 = vld [vmem:[#allocation14 + $0x28] sm:$0xff]  }
 0x4c1   : > { %2583 = vmatpush3.bf16.msra.mxu0 %v2807_v23 }
 0x4c2   : > { %2584 = vmatprep.subr.bf16.mxu0 %v3242_v37 }
 0x4c5   : > { %2585 = vmatpush3.bf16.msra.mxu0 %v2808_v24 }
 0x4c6   : > { %2586 = vmatprep.subr.bf16.mxu0 %v3242_v37 }
 0x4c9   : > { %2587 = vmatpush3.bf16.msra.mxu0 %v2809_v9 }
 0x4ca   : > { %2588 = vmatprep.subr.bf16.mxu0 %v3242_v37 }
 0x4cd   : > { %1406 = vrot.lane.b32.xlu1 %v3668_v57, %s3245_s14 }
 0x4d1   : > { %1464 = vrot.lane.b32.xlu1 %v3656_v47, %s3246_s21 }
 0x4d5   : > { %1462 = vrot.lane.b32.xlu1 %v1103_v55, %s3246_s21 }
 0x545   : > { %v1280_v25 = vpop.xlane.xlu1 %1279 }
 0x546   : > { %v1281_v26 = vsub.f32 %v1273_v20, %v1280_v25  ;;  %v2810_v25 = vld [vmem:[#allocation14 + $0x18] sm:$0xff]  }
 0x547   : > { %2589 = vmatpush3.bf16.msra.mxu0 %v2810_v25 }
 0x548   : > { %v1282_v27 = vmul.f32 1.442695, %v1281_v26  ;;  %v2811_v26 = vld [vmem:[#allocation14 + $0x10] sm:$0xff]   ;;  %2590 = vmatprep.subr.bf16.mxu0 %v3242_v37 }
 0x549   : > { %v1407_v33 = vpop.permute.xlu1 %1406 }
 0x54a   : > { %2856 = vpow2.f32 %v1282_v27 }
 0x54b   : > { %2591 = vmatpush3.bf16.msra.mxu0 %v2811_v26  ;;  %v2338_v26 = vld [vmem:[%s3919_s4] ss:$0 sm:$0xff]  ;;  %s2098_s4 = sshll.u32 %s728_s25, 4  ;;  %s2099_s4 = int_to_ptr.vmem [resolvable:$true] %s2098_s4 }
 0x54c   : > { %2592 = vmatprep.subr.bf16.mxu0 %v3242_v37  ;;  %s3086_s3 = scalar_lea.vmem %s2099_s4, 128 }
 0x54d   : > { %v1465_v51 = vpop.permute.xlu1 %1464  ;;  %p3087_p1 = scmp.ne.s32.totalorder %s2099_s4, %s3086_s3 }
 0x54e   : > { %v1470_v52 = vsel %vm1115_vm2, %v1465_v51, 0 }
 0x54f   : > { %p3088_p2 = pnand %p3087_p1, %p3533_p12 }
 0x551   : > { %v1463_v54 = vpop.permute.xlu1 %1462  ;;  %p3089_p3 = pneg %p3088_p2 }
 0x557   : > { %v2857_v28 = vpop.eup %2856 }
 0x558   : > { %v1288_v31 = vpack.c.bf16 %v2857_v28, %v2857_v28  ;;  %v1284_v46 = vsel %vm1162_vm3, %v2857_v28, 0.0 }
 0x55a   : > { %2553 = vmatmul.mubr.msk.bf16.vlgmr.msra.gmra.mxu1 %vm1162_vm3, %v1288_v31 }
 0x55b   : > { %2557 = vmatpush3.bf16.xpose.msra.mxu1 %v1353_v30  ;;  %2558 = vmatprep.mubr.msk.bf16.mxu1 %vm3243_vm1, %v3242_v37 }
 0x55c   : > { %2562 = vmatprep.subr.bf16.mxu1 %v3242_v37 }
 0x562   : > { %2559 = vmatmul.mubr.msk.bf16.vlgmr.msra.gmra.mxu1 %vm1115_vm2, %v1346_v32 }
 0x563   : > { %2563 = vmatpush3.bf16.msra.mxu1 %v1407_v33  ;;  %2564 = vmatprep.mubr.msk.bf16.mxu1 %vm3243_vm1, %v3242_v37 }
 0x564   : > { %2568 = vmatprep.subr.bf16.mxu1 %v3242_v37 }
 0x61a   : > { %v3721_v34 = vpop.f32.mrf.mxu1 }
 0x61c   : > { %v2554_v35 = vpop.f32.mrf.mxu1 }
 0x61d   : > { %v2813_v35 = vld [vmem:[#allocation14] sm:$0xff]  }
 0x61e   : > { %v1332_v36 = vpop.f32.mrf.mxu1 }
 0x620   : > { %v2555_v38 = vpop.f32.mrf.mxu1 }
 0x622   : > { %v1389_v39 = vpop.f32.mrf.mxu1 }
 0x623   : > { %v1390_v40 = vadd.f32 %v1389_v39, %v3679_v63 }
 0x624   : > { %v2560_v41 = vpop.f32.mrf.mxu1 }
 0x625   : > { %v1395_v42 = vsel %vm1162_vm3, %v1390_v40, -inf }
 0x626   : > { %1396 = vmax.xlane.f32.xlu0 %v1395_v42  ;;  %v1392_v43 = vpop.f32.mrf.mxu1 }
 0x628   : > { %v2561_v44 = vpop.f32.mrf.mxu1 }
 0x63c   : > { %1523 = vrot.lane.b32.xlu0 %v3668_v57, %s3246_s21 }
 0x65b   : > { %1285 = vadd.xlane.f32.xlu0 %v1284_v46  ;;  %v2329_v46 = vld [vmem:[%s3918_s12] ss:$0 sm:$0xff] }
 0x6af   : > { %v1397_v47 = vpop.xlane.xlu0 %1396 }
 0x6b0   : > { %v1398_v48 = vsub.f32 %v1390_v40, %v1397_v47 }
 0x6b2   : > { %v1399_v49 = vmul.f32 1.442695, %v1398_v48 }
 0x6b3   : > { %v1524_v55 = vpop.permute.xlu0 %1523 }
 0x6b4   : > { %2858 = vpow2.f32 %v1399_v49 }
 0x6c1   : > { %v2859_v50 = vpop.eup %2858 }
 0x6c2   : > { %v1405_v53 = vpack.c.bf16 %v2859_v50, %v2859_v50  ;;  %v1401_v5 = vsel %vm1162_vm3, %v2859_v50, 0.0 }
 0x6c4   : > { %2565 = vmatmul.mubr.msk.bf16.vlgmr.msra.gmra.mxu1 %vm1162_vm3, %v1405_v53  ;;  %v2816_v53 = vld [vmem:[#allocation16 + $0x74] ss:$8 sps:$4 sm:$0xff]  }
 0x6c5   : > { %2569 = vmatpush3.bf16.xpose.msra.mxu1 %v1470_v52  ;;  %2570 = vmatprep.mubr.msk.bf16.mxu1 %vm3243_vm1, %v3242_v37  ;;  %v2814_v52 = vld [vmem:[#allocation16 + $0x70] ss:$8 sps:$4 sm:$0xff]  }
 0x6c6   : > { %2574 = vmatprep.subr.bf16.mxu1 %v3242_v37 }
 0x6cc   : > { %2571 = vmatmul.mubr.msk.bf16.vlgmr.msra.gmra.mxu1 %vm1115_vm2, %v1463_v54  ;;  %v2819_v54 = vld [vmem:[#allocation16 + $0x64] ss:$8 sps:$4 sm:$0xff]  }
 0x6cd   : > { %2575 = vmatpush3.bf16.msra.mxu1 %v1524_v55  ;;  %2576 = vmatprep.mubr.msk.bf16.mxu1 %vm3243_vm1, %v3242_v37  ;;  %v2817_v55 = vld [vmem:[#allocation16 + $0x60] ss:$8 sps:$4 sm:$0xff]  }
 0x6ce   : > { %1829 = vmatprep.subr.bf16.mxu1 %v2816_v53 }
 0x6e4   : > { %v1286_v11 = vpop.xlane.xlu0 %1285 }
 0x784   : > { %v1446_v56 = vpop.f32.mrf.mxu1 }
 0x786   : > { %v2566_v57 = vpop.f32.mrf.mxu1 }
 0x788   : > { %v1449_v58 = vpop.f32.mrf.mxu1 }
 0x78a   : > { %v2567_v60 = vpop.f32.mrf.mxu1 }
 0x78c   : > { %v1506_v61 = vpop.f32.mrf.mxu1 }
 0x78d   : > { %v1507_v0 = vadd.f32 %v1506_v61, %v3679_v63  ;;  %v2822_v61 = vld [vmem:[#allocation16 + $0x54] ss:$8 sps:$4 sm:$0xff]  }
 0x78e   : > { %v2572_v1 = vpop.f32.mrf.mxu1 }
 0x78f   : > { %v1512_v2 = vsel %vm1162_vm3, %v1507_v0, -inf  ;;  %v2825_v1 = vld [vmem:[#allocation16 + $0x44] ss:$8 sps:$4 sm:$0xff]  }
 0x790   : > { %1513 = vmax.xlane.f32.xlu1 %v1512_v2  ;;  %v1509_v3 = vpop.f32.mrf.mxu1  ;;  %v2828_v2 = vld [vmem:[#allocation16 + $0x34] ss:$8 sps:$4 sm:$0xff]  }
 0x791   : > { %v2826_v3 = vld [vmem:[#allocation16 + $0x30] ss:$8 sps:$4 sm:$0xff]  }
 0x792   : > { %v2573_v4 = vpop.f32.mrf.mxu1 }
 0x793   : > { %v3247_v4 = vmov 0  }
 0x794   : > { %1402 = vadd.xlane.f32.xlu1 %v1401_v5  ;;  %v2831_v5 = vld [vmem:[#allocation16 + $0x24] ss:$8 sps:$4 sm:$0xff]  }
 0x819   : > { %v1514_v6 = vpop.xlane.xlu1 %1513 }
 0x81a   : > { %v1515_v7 = vsub.f32 %v1507_v0, %v1514_v6  ;;  %v2820_v0 = vld [vmem:[#allocation16 + $0x50] ss:$8 sps:$4 sm:$0xff]   ;;  %v2829_v6 = vld [vmem:[#allocation16 + $0x20] ss:$8 sps:$4 sm:$0xff]  }
 0x81c   : > { %v1516_v8 = vmul.f32 1.442695, %v1515_v7  ;;  %v2834_v7 = vld [vmem:[#allocation16 + $0x14] ss:$8 sps:$4 sm:$0xff]  }
 0x81d   : > { %v1403_v10 = vpop.xlane.xlu1 %1402 }
 0x81e   : > { %2860 = vpow2.f32 %v1516_v8  ;;  %v2832_v8 = vld [vmem:[#allocation16 + $0x10] ss:$8 sps:$4 sm:$0xff]  }
 0x81f   : > { %2862 = vrcp.f32 %v1403_v10  ;;  %v2837_v10 = vld [vmem:[#allocation16 + $0x4] ss:$8 sps:$4 sm:$0xff]  }
 0x820   : > { %2864 = vrcp.f32 %v1286_v11  ;;  %v2835_v11 = vld [vmem:[#allocation16] ss:$8 sps:$4 sm:$0xff]  }
 0x82b   : > { %v2861_v12 = vpop.eup %2860 }
 0x82c   : > { %v2863_v13 = vpop.eup %2862  ;;  %v1518_v63 = vsel %vm1162_vm3, %v2861_v12, 0.0  ;;  %v1522_v14 = vpack.c.bf16 %v2861_v12, %v2861_v12  ;;  %v2838_v12 = vld [vmem:[#allocation17 + $0x78] sm:$0xff]  }
 0x82d   : > { %1519 = vadd.xlane.f32.xlu1 %v1518_v63  ;;  %v1452_v16 = vmul.f32 %v2863_v13, %v1446_v56  ;;  %v2865_v19 = vpop.eup %2864  ;;  %v2839_v13 = vld [vmem:[#allocation17 + $0x38] sm:$0xff]   ;;  %v2840_v63 = vld [vmem:[#allocation17 + $0x70] sm:$0xff]  }
 0x82e   : > { %2577 = vmatmul.mubr.msk.bf16.vlgmr.msra.gmra.mxu1 %vm1162_vm3, %v1522_v14  ;;  %v1335_v20 = vmul.f32 %v2865_v19, %v3721_v34  ;;  %v2812_v34 = vld [vmem:[#allocation14 + $0x8] sm:$0xff]   ;;  %v2841_v14 = vld [vmem:[#allocation17 + $0x30] sm:$0xff]   ;;  %v2845_v19 = vld [vmem:[#allocation17 + $0x20] sm:$0xff]  }
 0x82f   : > { %v2386_v17 = vpack.c.bf16 %v1452_v16, %v1452_v16  ;;  %2593 = vmatpush3.bf16.msra.mxu0 %v2812_v34  ;;  %1830 = vmatpush1.bf16.msra.mxu1 %v2814_v52  ;;  %v2842_v16 = vld [vmem:[#allocation17 + $0x68] sm:$0xff]  }
 0x830   : > { %v2385_v21 = vpack.c.bf16 %v1335_v20, %v1335_v20  ;;  %2594 = vmatprep.subr.bf16.mxu0 %v3242_v37  ;;  %1831 = vmatprep.subr.bf16.mxu1 %v2819_v54  ;;  %v2846_v20 = vld [vmem:[#allocation17 + $0x58] sm:$0xff]   ;;  %v2851_v34 = vld [vmem:[#allocation17 + $0x8] sm:$0xff]  }
 0x831   : > { %1457 = vrot.lane.b32.xlu0 %v2386_v17, %s3245_s14  ;;  %1170 = vadd.xlane.f32.xlu1 %v1169_v18  ;;  %v2843_v17 = vld [vmem:[#allocation17 + $0x28] sm:$0xff]   ;;  %v2844_v18 = vld [vmem:[#allocation17 + $0x60] sm:$0xff]  }
 0x832   : > { %1861 = vmatprep.mubr.bf16.mxu1 %v3247_v4 }
 0x833   : > { %2595 = vmatpush3.bf16.msra.mxu0 %v2813_v35  ;;  %1832 = vmatpush1.bf16.msra.mxu1 %v2817_v55  ;;  %v2852_v35 = vld [vmem:[#allocation17 + $0x40] sm:$0xff]  }
 0x834   : > { %1833 = vmatprep.subr.bf16.mxu1 %v2822_v61  ;;  %2450 = vmatprep.subr.bf16.mxu0 %v2838_v12 }
 0x837   : > { %1834 = vmatpush1.bf16.msra.mxu1 %v2820_v0 }
 0x838   : > { %1835 = vmatprep.subr.bf16.mxu1 %v2825_v1 }
 0x842   : > { %1340 = vrot.lane.b32.xlu1 %v2385_v21, %s3246_s21  ;;  %v2847_v21 = vld [vmem:[#allocation17 + $0x18] sm:$0xff]  }
 0x8a3   : > { %v1458_v33 = vpop.permute.xlu0 %1457 }
 0x8b6   : > { %v1520_v27 = vpop.xlane.xlu1 %1519 }
 0x8ba   : > { %v1171_v28 = vpop.xlane.xlu1 %1170 }
 0x8bb   : > { %2866 = vrcp.f32 %v1171_v28  ;;  %v2339_v28 = vld [vmem:[%s3920_s23] ss:$0 sm:$0xff]  ;;  %s3926_s23 = sld [smem:[#allocation53_spill]] }
 0x8bc   : > { %2868 = vrcp.f32 %v1520_v27 }
 0x8be   : > { %v1341_v32 = vpop.permute.xlu1 %1340 }
 0x8c8   : > { %v2867_v29 = vpop.eup %2866 }
 0x8c9   : > { %v1223_v30 = vmul.f32 %v2867_v29, %v3703_v15  ;;  %v2869_v36 = vpop.eup %2868 }
 0x8cb   : > { %v1224_v31 = vpack.c.bf16 %v1223_v30, %v1223_v30 }
 0x8cd   : > { %1226 = vst.msk [vmem:[#allocation4] sm:$0xf] %vm1225_vm4, %v1224_v31 }
 0x8ce   : > { %1344 = vst.msk [vmem:[#allocation4] sm:$0xf] %vm1343_vm5, %v1341_v32  ;;  %v2849_v32 = vld [vmem:[#allocation17 + $0x10] sm:$0xff]  }
 0x8cf   : > { %1461 = vst.msk [vmem:[#allocation4] sm:$0xf] %vm1460_vm6, %v1458_v33  ;;  %v2850_v33 = vld [vmem:[#allocation17 + $0x48] sm:$0xff]  }
 0x8ee   : > { %v1563_v38 = vpop.f32.mrf.mxu1 }
 0x8ef   : > { %v1569_v39 = vmul.f32 %v2869_v36, %v1563_v38  ;;  %v2853_v36 = vld [vmem:[#allocation17] sm:$0xff]   ;;  %v1737_v38 = vld [vmem:[%s3921_s26] sm:$0x3]  ;;  %s3248_s26 = smov [#allocation19]  }
 0x8f0   : > { %v2578_v15 = vpop.f32.mrf.mxu1  ;;  %s3090_s11 = sshll.u32 %s3248_s26, 4  ;;  %s3091_s11 = int_to_ptr.vmem [resolvable:$false] %s3090_s11 }
 0x8f1   : > { %v2387_v40 = vpack.c.bf16 %v1569_v39, %v1569_v39  ;;  %v1745_v39 = vsub.s32 1, %v3672_v59  ;;  %v1742_v15 = vrot.slane %v1737_v38, %v1107_v62  ;;  %v2356_v59 = vld [vmem:[%s3922_s15] ss:$0 sm:$0xff]  ;;  %s3092_s18 = scalar_lea.vmem %s3091_s11, 256  ;;  %p3093_p5 = scmp.lt.s32.totalorder %s2099_s4, %s3091_s11 }
 0x8f2   : > { %v1566_v41 = vpop.f32.mrf.mxu1  ;;  %p3094_p8 = scmp.lt.s32.totalorder %s3092_s18, %s3086_s3 }
 0x8f3   : > { %1574 = vrot.lane.b32.xlu1 %v2387_v40, %s3244_s8  ;;  %v1746_v40 = vrot.slane %v1737_v38, %v1745_v39  ;;  %s2094_s8 = sadd.s32 %s3210_s1, %s2376_s30  ;;  %s2083_s1 = scalar_lea.sflag [#allocation7], %s726_s24 }
 0x8f4   : > { %v2579_v42 = vpop.f32.mrf.mxu1  ;;  %s2377_s16 = sshll.u32 %s2094_s8, 7  ;;  %p3095_p9 = por %p3094_p8, %p3093_p5 }
 0x8f5   : > { %s2096_s17 = scalar_lea.hbm %s3926_s23, %s2377_s16 }
 0x8f6   : > { %p3096_p10 = pnand %p3095_p9, %p3089_p3 }
 0x965   : > { %v1575_v43 = vpop.permute.xlu1 %1574 }
 0x966   : > { %1578 = vst.msk [vmem:[#allocation4] sm:$0xf] %vm1577_vm7, %v1575_v43 }
 0x96d   : > { %v1579_v44 = vld [vmem:[#allocation4] sm:$0xf] }
 0x96e   : > { %2597 = vmatmul.mubr.bf16.vlgmr.msra.gmra.mxu0 %v1579_v44 }
 0x96f   : > { %2451 = vmatpush3.bf16.msra.mxu0 %v2839_v13 }
 0x970   : > { %2452 = vmatprep.subr.bf16.mxu0 %v2840_v63 }
 0x973   : > { %2453 = vmatpush3.bf16.msra.mxu0 %v2841_v14 }
 0x974   : > { %2454 = vmatprep.subr.bf16.mxu0 %v2842_v16 }
 0x977   : > { %2455 = vmatpush3.bf16.msra.mxu0 %v2843_v17 }
 0x978   : > { %2456 = vmatprep.subr.bf16.mxu0 %v2844_v18 }
 0x97b   : > { %2457 = vmatpush3.bf16.msra.mxu0 %v2845_v19 }
 0x97c   : > { %2458 = vmatprep.subr.bf16.mxu0 %v2846_v20 }
 0x97f   : > { %2459 = vmatpush3.bf16.msra.mxu0 %v2847_v21 }
 0x980   : > { %2460 = vmatprep.subr.bf16.mxu0 %v2848_v22 }
 0x983   : > { %2461 = vmatpush3.bf16.msra.mxu0 %v2849_v32 }
 0x984   : > { %2462 = vmatprep.subr.bf16.mxu0 %v2850_v33 }
 0x987   : > { %2463 = vmatpush3.bf16.msra.mxu0 %v2851_v34 }
 0x988   : > { %2464 = vmatprep.subr.bf16.mxu0 %v2852_v35 }
 0x98b   : > { %2465 = vmatpush3.bf16.msra.mxu0 %v2853_v36 }
 0xa2e   : > { %v1685_v37 = vpop.f32.mrf.mxu0 }
 0xa2f   : > { %v1686_v47 = vadd.f32 %v2329_v46, %v1685_v37 }
 0xa30   : > { %v2598_v48 = vpop.f32.mrf.mxu0 }
 0xa31   : > { %v1691_v49 = vadd.f32 %v1686_v47, %v3648_v45  ;;  %v2823_v45 = vld [vmem:[#allocation16 + $0x40] ss:$8 sps:$4 sm:$0xff]  }
 0xa32   : > { %v1688_v50 = vpop.f32.mrf.mxu0  ;;  %1836 = vmatpush1.bf16.msra.mxu1 %v2823_v45 }
 0xa33   : > { %1694 = vadd.xlane.f32.xlu1 %v1691_v49  ;;  %1837 = vmatprep.subr.bf16.mxu1 %v2828_v2 }
 0xa34   : > { %v2599_v51 = vpop.f32.mrf.mxu0 }
 0xa36   : > { %1838 = vmatpush1.bf16.msra.mxu1 %v2826_v3 }
 0xa37   : > { %1839 = vmatprep.subr.bf16.mxu1 %v2831_v5  ;;  %v2373_v5 = vld [vmem:[%s3924_s20] ss:$0 sm:$0xff] }
 0xa3a   : > { %1840 = vmatpush1.bf16.msra.mxu1 %v2829_v6 }
 0xa3b   : > { %1841 = vmatprep.subr.bf16.mxu1 %v2834_v7  ;;  %v2374_v7 = vld [vmem:[%s3925_s29] ss:$0 sm:$0xff] }
 0xa3e   : > { %1842 = vmatpush1.bf16.msra.mxu1 %v2832_v8 }
 0xa3f   : > { %1843 = vmatprep.subr.bf16.mxu1 %v2837_v10 }
 0xa42   : > { %1844 = vmatpush1.bf16.msra.mxu1 %v2835_v11 }
 0xabc   : > { %v1695_v56 = vpop.xlane.xlu1 %1694 }
 0xabd   : > { %v1697_v57 = vmul.f32 0.0078125, %v1695_v56 }
 0xabf   : > { %v1698_v58 = vsub.f32 %v1691_v49, %v1697_v57 }
 0xac1   : > { %v1699_v60 = vmul.f32 %v1698_v58, %v1698_v58 }
 0xac3   : > { %1700 = vadd.xlane.f32.xlu0 %v1699_v60 }
 0xb4c   : > { %v1701_v23 = vpop.xlane.xlu0 %1700 }
 0xb4d   : > { %v1702_v24 = vmul.f32 0.0078125, %v1701_v23 }
 0xb4f   : > { %v1703_v9 = vadd.f32 1e-05, %v1702_v24 }
 0xb51   : > { %2870 = vrsqrt.f32 %v1703_v9 }
 0xb5e   : > { %v2871_v25 = vpop.eup %2870 }
 0xb5f   : > { %v1705_v27 = vmul.f32 %v2871_v25, %v1698_v58 }
 0xb61   : > { %v1712_v29 = vmul.f32 %v2338_v26, %v1705_v27 }
 0xb63   : > { %v1719_v30 = vadd.f32 %v2339_v28, %v1712_v29 }
 0xb65   : > { %v1720_v31 = vpack.c.bf16 %v1719_v30, %v1719_v30 }
 0xb67   : > { %1862 = vmatmul.mubr.bf16.vlgmr.msra.gmra.mxu1 %v1720_v31 }
 0xc27   : > { %v1863_v41 = vpop.f32.mrf.mxu1 }
 0xc28   : > { %v1864_v42 = vadd.f32 %v1863_v41, %v1742_v15 }
 0xc29   : > { %v1865_v43 = vpop.f32.mrf.mxu1 }
 0xc2a   : > { %vm1870_vm8 = vcmp.gt.f32.partialorder %v1864_v42, 0.0  ;;  %v1872_v44 = vmul.f32 0.2, %v1864_v42  ;;  %v1866_v46 = vadd.f32 %v1865_v43, %v1746_v40 }
 0xc2b   : > { %v1867_v37 = vpop.f32.mrf.mxu1 }
 0xc2c   : > { %vm1871_vm9 = vcmp.gt.f32.partialorder %v1866_v46, 0.0  ;;  %v1873_v47 = vmul.f32 0.2, %v1866_v46  ;;  %v1874_v48 = vsel %vm1870_vm8, %v1864_v42, %v1872_v44 }
 0xc2d   : > { %v1868_v49 = vpop.f32.mrf.mxu1  ;;  %v1876_v52 = vpack.c.bf16 %v1874_v48, %v1874_v48 }
 0xc2e   : > { %v1875_v50 = vsel %vm1871_vm9, %v1866_v46, %v1873_v47 }
 0xc2f   : > { %v1877_v51 = vpack.c.bf16 %v1875_v50, %v1875_v50 }
 0xc31   : > { %2045 = vmatprep.mubr.bf16.mxu0 %v1877_v51 }
 0xc32   : > { %2046 = vmatmul.mubr.bf16.vlgmr.msra.gmra.mxu0 %v1876_v52 }
 0xcf2   : > { %v2466_v53 = vpop.f32.mrf.mxu0 }
 0xcf4   : > { %v2467_v62 = vpop.f32.mrf.mxu0 }
 0xcf5   : > { %v2468_v54 = vadd.f32 %v2467_v62, %v2466_v53 }
 0xcf6   : > { %v2469_v55 = vpop.f32.mrf.mxu0 }
 0xcf7   : > { %v2048_v56 = vadd.f32 %v2468_v54, %v2356_v59 }
 0xcf8   : > { %v2470_v57 = vpop.f32.mrf.mxu0 }
 0xcf9   : > { %v2053_v58 = vadd.f32 %v2048_v56, %v1719_v30 }
 0xcfb   : > { %2056 = vadd.xlane.f32.xlu1 %v2053_v58 }
 0xd84   : > { %v2057_v60 = vpop.xlane.xlu1 %2056 }
 0xd85   : > { %v2058_v61 = vmul.f32 0.0078125, %v2057_v60 }
 0xd87   : > { %v2059_v0 = vsub.f32 %v2053_v58, %v2058_v61 }
 0xd89   : > { %v2060_v45 = vmul.f32 %v2059_v0, %v2059_v0 }
 0xd8b   : > { %2061 = vadd.xlane.f32.xlu1 %v2060_v45 }
 0xe14   : > { %v2062_v1 = vpop.xlane.xlu1 %2061 }
 0xe15   : > { %v2063_v2 = vmul.f32 0.0078125, %v2062_v1 }
 0xe17   : > { %v2064_v3 = vadd.f32 1e-05, %v2063_v2 }
 0xe19   : > { %2872 = vrsqrt.f32 %v2064_v3 }
 0xe26   : > { %v2873_v4 = vpop.eup %2872 }
 0xe27   : > { %v2066_v6 = vmul.f32 %v2873_v4, %v2059_v0 }
 0xe29   : > { %v2073_v8 = vmul.f32 %v2373_v5, %v2066_v6 }
 0xe2b   : > { %v2080_v10 = vadd.f32 %v2374_v7, %v2073_v8 }
 0xe2d   : > { %2081 = vst [vmem:[%s728_s25] sm:$0xff] %v2080_v10 }
 0xe2e   : > { %3099 = shalt.err (!%p3096_p10)
}
 0xe2f   : > { %s3100_s15 = scalar_lea.hbm %s2096_s17, 128  ;;  %s3104_s25 = scalar_lea.hbm %s3926_s23, 512 }
 0xe30   : > { %p3101_p13 = scmp.ne.s32.totalorder %s2096_s17, %s3100_s15  ;;  %p3105_p6 = scmp.lt.s32.totalorder %s2096_s17, %s3926_s23 }
 0xe31   : > { %p3106_p4 = scmp.lt.s32.totalorder %s3104_s25, %s3100_s15 }
 0xe32   : > { %p3102_p11 = pnand %p3101_p13, %p3533_p12 }
 0xe33   : > { %p3107_p1 = por %p3106_p4, %p3105_p6 }
 0xe34   : > { %p3103_p7 = pneg %p3102_p11 }
 0xe36   : > { %p3108_p2 = pnand %p3107_p1, %p3103_p7 }
 0xe38   : > { %3111 = shalt.err (!%p3108_p2)
}
 0xe39   : > { %2628 = dma.vmem_to_hbm [thread:$0]  (%p3533_p12), %s2099_s4, 128, %s2096_s17, %s2083_s1  }
 0xe3a PF: > { %s3927_s8 = sld [smem:[#allocation27_spill]]  ;;  %p2673_p3 = scmp.ge.s32.totalorder %s3226_s2, 2 }
 0xe3c   : > { %p2657_p5 = pnand %p2673_p3, %p3543_p0 }
 0xe3e   : > { %p2658_p8 = pneg %p2657_p5 }
 0xe40   : > { %s2110_s21 = sand.u32 1, %s3927_s8  }
 0xe41   : > { %s2111_s20 = scalar_lea.sflag [#allocation7], %s2110_s21 }
 0xe42   : > { %3181 = dma.done.wait (%p2658_p8), %s2111_s20, 128  }
 0xe43   : > { %3183 = vsyncadd (%p2658_p8), %s2111_s20, 4294967168  ;;  %s40_s2 = sadd.s32 1, %s3226_s2   ;;  %s3929_s6 = sld [smem:[#allocation28_spill]] }
 0xe44   : > { %p37_p9 = scmp.ge.s32.totalorder %s40_s2, 6   ;;  %s3930_s29 = sld [smem:[#allocation35_spill]] }
 0xe45   : > { %s3931_s10 = sld [smem:[#allocation29_spill]]  ;;  %s3936_s27 = smov %s3190_s28 }
 0xe46   : > { %s3932_s19 = sld [smem:[#allocation34_spill]]  ;;  %s3938_s30 = smov %s3202_s0 }
 0xe47   : > { %s3933_s1 = sld [smem:[#allocation31_spill]]  ;;  %s3940_s20 = smov %s3222_s22 }
 0xe48   : > { %s3934_s21 = sld [smem:[#allocation32_spill]] }
 0xe49   : > { %s3935_s12 = sld [smem:[#allocation33_spill]]  ;;  %s3937_s28 = smov %s3929_s6 }
 0xe4b   : > { %s3939_s0 = smov %s3931_s10  ;;  %39 = sbr.rel (!%p37_p9) target bundleno = 32 (0x20), region = 179 }
 0xe4f   : > { %s3941_s22 = smov %s3935_s12 }
 0xe50   :  { %2116 = vsyncpa [#allocation6], 1 }
 0xe51   :  { %2118 = vsyncpa [#allocation6 + $0x1], 1 }
 0xe52   :  { %2119 = vsyncpa [#allocation9], 1 }
 0xe53   :  { %2121 = vsyncpa [#allocation9 + $0x1], 1 }
 0xe54   :  { %2122 = vsyncpa [#allocation12], 1 }
 0xe55   :  { %2123 = vsyncpa [#allocation15], 1 }
 0xe56   :  { %2124 = vsyncpa [#allocation18], 1 }
 0xe57   :  { %2125 = vsyncpa [#allocation7], 1 }
 0xe58   :  { %2127 = vsyncpa [#allocation7 + $0x1], 1 }

</bundles_post_ra>
